<compile_context>
chip_gen: v7x
topology: tpu7x:2x2x1
jax: 0.10.0
libtpu: 0.0.40
codegen_flags: <defaults>
</compile_context>

<pallas_src>
import jax
import jax.numpy as jnp
from jax.experimental import pallas as pl
from jax.experimental.pallas import tpu as pltpu

F_IN, F_PAD = 21, 32          # input features, padded to a sublane multiple
H1, H2, H3, H4 = 512, 256, 256, 64
OUT, OUT_PAD = 2, 128         # final layer padded to a full lane width


def mlp_kernel(x_ref,
               w1_ref, b1_ref,
               w2_ref, b2_ref,
               w3_ref, b3_ref,
               w4_ref, b4_ref,
               w5_ref, b5_ref,
               o_ref):
    # One (TILE_B, F_PAD) batch tile per grid step; all weights/biases are
    # VMEM-resident across the whole grid (constant index_map).
    h = jnp.dot(x_ref[...], w1_ref[...],
                preferred_element_type=jnp.float32) + b1_ref[...]
    h = jnp.maximum(h, 0.0).astype(jnp.bfloat16)          # ReLU (dropout = id)

    h = jnp.dot(h, w2_ref[...], preferred_element_type=jnp.float32) + b2_ref[...]
    h = jnp.maximum(h, 0.0).astype(jnp.bfloat16)

    h = jnp.dot(h, w3_ref[...], preferred_element_type=jnp.float32) + b3_ref[...]
    h = jnp.maximum(h, 0.0).astype(jnp.bfloat16)

    h = jnp.dot(h, w4_ref[...], preferred_element_type=jnp.float32) + b4_ref[...]
    h = jnp.maximum(h, 0.0).astype(jnp.bfloat16)

    out = jnp.dot(h, w5_ref[...], preferred_element_type=jnp.float32) + b5_ref[...]
    o_ref[...] = out                                        # lane-dense (TILE_B, 128) store


def net_forward(x, params, tile_b=512):
    """x: (B, 21) float32.  params: list of 5 (W[in,out] f32, b[1,out] f32) pairs.

    Returns (B, 2) float32 logits. tile_b should be a multiple of 256
    (fills the v6e/v7x MXU tile; also a multiple of 128 for v5e).
    """
    B = x.shape[0]
    assert x.shape[1] == F_IN and len(params) == 5

    # ---- host-side padding / dtype prep --------------------------------
    b_pad = pl.cdiv(B, tile_b) * tile_b
    x_p = jnp.zeros((b_pad, F_PAD), jnp.bfloat16)
    x_p = x_p.at[:B, :F_IN].set(x.astype(jnp.bfloat16))

    (w1, b1), (w2, b2), (w3, b3), (w4, b4), (w5, b5) = params
    w1_p = jnp.zeros((F_PAD, H1), jnp.bfloat16).at[:F_IN, :].set(w1.astype(jnp.bfloat16))
    w5_p = jnp.zeros((H4, OUT_PAD), jnp.bfloat16).at[:, :OUT].set(w5.astype(jnp.bfloat16))
    b5_p = jnp.zeros((1, OUT_PAD), jnp.float32).at[:, :OUT].set(b5)
    w2_p, w3_p, w4_p = (w2.astype(jnp.bfloat16), w3.astype(jnp.bfloat16),
                        w4.astype(jnp.bfloat16))

    flat_args = [x_p,
                 w1_p, b1, w2_p, b2, w3_p, b3, w4_p, b4, w5_p, b5_p]

    # ---- specs (explicit; weights/biases use constant index_maps) ------
    def const(shape):
        return pl.BlockSpec(shape, lambda i: (0, 0))

    in_specs = [
        pl.BlockSpec((tile_b, F_PAD), lambda i: (i, 0)),     # x streams per step
        const((F_PAD, H1)), const((1, H1)),
        const((H1, H2)),    const((1, H2)),
        const((H2, H3)),    const((1, H3)),
        const((H3, H4)),    const((1, H4)),
        const((H4, OUT_PAD)), const((1, OUT_PAD)),
    ]
    out_specs = pl.BlockSpec((tile_b, OUT_PAD), lambda i: (i, 0))

    per_row_flops = 2 * (F_PAD * H1 + H1 * H2 + H2 * H3 + H3 * H4 + H4 * OUT_PAD)
    weight_elems = F_PAD * H1 + H1 * H2 + H2 * H3 + H3 * H4 + H4 * OUT_PAD
    bias_elems = H1 + H2 + H3 + H4 + OUT_PAD
    cost = pl.CostEstimate(
        flops=int(b_pad * per_row_flops),
        transcendentals=0,
        bytes_accessed=int(weight_elems * 2 + bias_elems * 4
                           + b_pad * F_PAD * 2 + b_pad * OUT_PAD * 4),
    )

    out = pl.pallas_call(
        mlp_kernel,
        out_shape=jax.ShapeDtypeStruct((b_pad, OUT_PAD), jnp.float32),
        grid=(b_pad // tile_b,),
        in_specs=in_specs,
        out_specs=out_specs,
        compiler_params=pltpu.CompilerParams(
            dimension_semantics=("parallel",)),
        cost_estimate=cost,
    )(*flat_args)

    return out[:B, :OUT]


# ---------------------------------------------------------------------------
# Parameter init matching the PyTorch module (xavier_uniform_ weights,
# default nn.Linear bias init), stored as (in, out) so the kernel does x @ W.
# ---------------------------------------------------------------------------
def xavier_uniform(key, fan_in, fan_out):
    bound = jnp.sqrt(6.0 / (fan_in + fan_out))
    return jax.random.uniform(key, (fan_in, fan_out), jnp.float32, -bound, bound)


def init_params(key):
    dims = [(F_IN, H1), (H1, H2), (H2, H3), (H3, H4), (H4, OUT)]
    params = []
    for fan_in, fan_out in dims:
        key, wk = jax.random.split(key)
        w = xavier_uniform(wk, fan_in, fan_out)
        key, bk = jax.random.split(key)
        bb = 1.0 / jnp.sqrt(fan_in)
        b = jax.random.uniform(bk, (1, fan_out), jnp.float32, -bb, bb)
        params.append((w, b))
    return params


def ref_forward(x, params):
    """Pure-JAX reference replicating the kernel's bf16/f32 mixed precision."""
    h = x.astype(jnp.bfloat16)
    for i, (w, b) in enumerate(params):
        h = jnp.dot(h, w.astype(jnp.bfloat16),
                    preferred_element_type=jnp.float32) + b
        if i < len(params) - 1:
            h = jnp.maximum(h, 0.0).astype(jnp.bfloat16)
    return h


if __name__ == "__main__":
    key = jax.random.PRNGKey(0)
    key, xk = jax.random.split(key)

    B = 1000                      # exercises batch padding + a 2-step grid
    x = jax.random.normal(xk, (B, F_IN), jnp.float32)
    params = init_params(key)

    out = net_forward(x, params, tile_b=512)
    out = jax.block_until_ready(out)

    ref = ref_forward(x, params)
    assert out.shape == (B, OUT)
    assert jnp.allclose(out, ref, atol=2e-2, rtol=2e-2), (
        float(jnp.max(jnp.abs(out - ref))))

    print("KERNEL_OK")
</pallas_src>

<mosaic_0001>
module attributes {stable_mosaic.version = 11 : i64} {
  func.func @mlp_kernel(%arg0: i32, %arg1: memref<512x32xbf16, #tpu.memory_space<vmem>>, %arg2: memref<32x512xbf16, #tpu.memory_space<vmem>>, %arg3: memref<1x512xf32, #tpu.memory_space<vmem>>, %arg4: memref<512x256xbf16, #tpu.memory_space<vmem>>, %arg5: memref<1x256xf32, #tpu.memory_space<vmem>>, %arg6: memref<256x256xbf16, #tpu.memory_space<vmem>>, %arg7: memref<1x256xf32, #tpu.memory_space<vmem>>, %arg8: memref<256x64xbf16, #tpu.memory_space<vmem>>, %arg9: memref<1x64xf32, #tpu.memory_space<vmem>>, %arg10: memref<64x128xbf16, #tpu.memory_space<vmem>>, %arg11: memref<1x128xf32, #tpu.memory_space<vmem>>, %arg12: memref<512x128xf32, #tpu.memory_space<vmem>>) attributes {dimension_semantics = [#tpu.dimension_semantics<parallel>], iteration_bounds = array<i64: 2>, scalar_prefetch = 0 : i64, scratch_operands = 0 : i64, tpu.core_type = #tpu.core_type<tc>, window_params = [{transform_indices = @transform_0, window_bounds = array<i64: 512, 32>}, {pipeline_mode = #tpu.pipeline_mode<synchronous>, transform_indices = @transform_1, window_bounds = array<i64: 32, 512>}, {pipeline_mode = #tpu.pipeline_mode<synchronous>, transform_indices = @transform_2, window_bounds = array<i64: 1, 512>}, {pipeline_mode = #tpu.pipeline_mode<synchronous>, transform_indices = @transform_3, window_bounds = array<i64: 512, 256>}, {pipeline_mode = #tpu.pipeline_mode<synchronous>, transform_indices = @transform_4, window_bounds = array<i64: 1, 256>}, {pipeline_mode = #tpu.pipeline_mode<synchronous>, transform_indices = @transform_5, window_bounds = array<i64: 256, 256>}, {pipeline_mode = #tpu.pipeline_mode<synchronous>, transform_indices = @transform_6, window_bounds = array<i64: 1, 256>}, {pipeline_mode = #tpu.pipeline_mode<synchronous>, transform_indices = @transform_7, window_bounds = array<i64: 256, 64>}, {pipeline_mode = #tpu.pipeline_mode<synchronous>, transform_indices = @transform_8, window_bounds = array<i64: 1, 64>}, {pipeline_mode = #tpu.pipeline_mode<synchronous>, transform_indices = @transform_9, window_bounds = array<i64: 64, 128>}, {pipeline_mode = #tpu.pipeline_mode<synchronous>, transform_indices = @transform_10, window_bounds = array<i64: 1, 128>}, {transform_indices = @transform_11, window_bounds = array<i64: 512, 128>}]} {
    %c0 = arith.constant 0 : index
    %c0_0 = arith.constant 0 : index
    %0 = vector.load %arg1[%c0, %c0_0] : memref<512x32xbf16, #tpu.memory_space<vmem>>, vector<512x32xbf16>
    %c0_1 = arith.constant 0 : index
    %c0_2 = arith.constant 0 : index
    %1 = vector.load %arg2[%c0_1, %c0_2] : memref<32x512xbf16, #tpu.memory_space<vmem>>, vector<32x512xbf16>
    %cst = arith.constant dense<0.000000e+00> : vector<512x512xf32>
    %2 = tpu.matmul %0, %1, %cst {dimension_numbers = #tpu.dot_dimension_numbers<[1], [0], [0], [1], [0, 0, 1, 1], [], []>} : vector<512x32xbf16>, vector<32x512xbf16>, vector<512x512xf32> -> vector<512x512xf32>
    %c0_3 = arith.constant 0 : index
    %c0_4 = arith.constant 0 : index
    %3 = vector.load %arg3[%c0_3, %c0_4] : memref<1x512xf32, #tpu.memory_space<vmem>>, vector<1x512xf32>
    %4 = vector.broadcast %3 : vector<1x512xf32> to vector<512x512xf32>
    %5 = arith.addf %2, %4 : vector<512x512xf32>
    %cst_5 = arith.constant 0.000000e+00 : f32
    %6 = vector.broadcast %cst_5 : f32 to vector<512x512xf32>
    %7 = arith.maximumf %5, %6 : vector<512x512xf32>
    %8 = arith.truncf %7 : vector<512x512xf32> to vector<512x512xbf16>
    %c0_6 = arith.constant 0 : index
    %c0_7 = arith.constant 0 : index
    %9 = vector.load %arg4[%c0_6, %c0_7] : memref<512x256xbf16, #tpu.memory_space<vmem>>, vector<512x256xbf16>
    %cst_8 = arith.constant dense<0.000000e+00> : vector<512x256xf32>
    %10 = tpu.matmul %8, %9, %cst_8 {dimension_numbers = #tpu.dot_dimension_numbers<[1], [0], [0], [1], [0, 0, 1, 1], [], []>} : vector<512x512xbf16>, vector<512x256xbf16>, vector<512x256xf32> -> vector<512x256xf32>
    %c0_9 = arith.constant 0 : index
    %c0_10 = arith.constant 0 : index
    %11 = vector.load %arg5[%c0_9, %c0_10] : memref<1x256xf32, #tpu.memory_space<vmem>>, vector<1x256xf32>
    %12 = vector.broadcast %11 : vector<1x256xf32> to vector<512x256xf32>
    %13 = arith.addf %10, %12 : vector<512x256xf32>
    %cst_11 = arith.constant 0.000000e+00 : f32
    %14 = vector.broadcast %cst_11 : f32 to vector<512x256xf32>
    %15 = arith.maximumf %13, %14 : vector<512x256xf32>
    %16 = arith.truncf %15 : vector<512x256xf32> to vector<512x256xbf16>
    %c0_12 = arith.constant 0 : index
    %c0_13 = arith.constant 0 : index
    %17 = vector.load %arg6[%c0_12, %c0_13] : memref<256x256xbf16, #tpu.memory_space<vmem>>, vector<256x256xbf16>
    %cst_14 = arith.constant dense<0.000000e+00> : vector<512x256xf32>
    %18 = tpu.matmul %16, %17, %cst_14 {dimension_numbers = #tpu.dot_dimension_numbers<[1], [0], [0], [1], [0, 0, 1, 1], [], []>} : vector<512x256xbf16>, vector<256x256xbf16>, vector<512x256xf32> -> vector<512x256xf32>
    %c0_15 = arith.constant 0 : index
    %c0_16 = arith.constant 0 : index
    %19 = vector.load %arg7[%c0_15, %c0_16] : memref<1x256xf32, #tpu.memory_space<vmem>>, vector<1x256xf32>
    %20 = vector.broadcast %19 : vector<1x256xf32> to vector<512x256xf32>
    %21 = arith.addf %18, %20 : vector<512x256xf32>
    %cst_17 = arith.constant 0.000000e+00 : f32
    %22 = vector.broadcast %cst_17 : f32 to vector<512x256xf32>
    %23 = arith.maximumf %21, %22 : vector<512x256xf32>
    %24 = arith.truncf %23 : vector<512x256xf32> to vector<512x256xbf16>
    %c0_18 = arith.constant 0 : index
    %c0_19 = arith.constant 0 : index
    %25 = vector.load %arg8[%c0_18, %c0_19] : memref<256x64xbf16, #tpu.memory_space<vmem>>, vector<256x64xbf16>
    %cst_20 = arith.constant dense<0.000000e+00> : vector<512x64xf32>
    %26 = tpu.matmul %24, %25, %cst_20 {dimension_numbers = #tpu.dot_dimension_numbers<[1], [0], [0], [1], [0, 0, 1, 1], [], []>} : vector<512x256xbf16>, vector<256x64xbf16>, vector<512x64xf32> -> vector<512x64xf32>
    %c0_21 = arith.constant 0 : index
    %c0_22 = arith.constant 0 : index
    %27 = vector.load %arg9[%c0_21, %c0_22] : memref<1x64xf32, #tpu.memory_space<vmem>>, vector<1x64xf32>
    %28 = vector.broadcast %27 : vector<1x64xf32> to vector<512x64xf32>
    %29 = arith.addf %26, %28 : vector<512x64xf32>
    %cst_23 = arith.constant 0.000000e+00 : f32
    %30 = vector.broadcast %cst_23 : f32 to vector<512x64xf32>
    %31 = arith.maximumf %29, %30 : vector<512x64xf32>
    %32 = arith.truncf %31 : vector<512x64xf32> to vector<512x64xbf16>
    %c0_24 = arith.constant 0 : index
    %c0_25 = arith.constant 0 : index
    %33 = vector.load %arg10[%c0_24, %c0_25] : memref<64x128xbf16, #tpu.memory_space<vmem>>, vector<64x128xbf16>
    %cst_26 = arith.constant dense<0.000000e+00> : vector<512x128xf32>
    %34 = tpu.matmul %32, %33, %cst_26 {dimension_numbers = #tpu.dot_dimension_numbers<[1], [0], [0], [1], [0, 0, 1, 1], [], []>} : vector<512x64xbf16>, vector<64x128xbf16>, vector<512x128xf32> -> vector<512x128xf32>
    %c0_27 = arith.constant 0 : index
    %c0_28 = arith.constant 0 : index
    %35 = vector.load %arg11[%c0_27, %c0_28] : memref<1x128xf32, #tpu.memory_space<vmem>>, vector<1x128xf32>
    %36 = vector.broadcast %35 : vector<1x128xf32> to vector<512x128xf32>
    %37 = arith.addf %34, %36 : vector<512x128xf32>
    %c0_29 = arith.constant 0 : index
    %c0_30 = arith.constant 0 : index
    %38 = vector.load %arg12[%c0_29, %c0_30] : memref<512x128xf32, #tpu.memory_space<vmem>>, vector<512x128xf32>
    tpu.vector_store %arg12[%c0_29, %c0_30], %37 {strides = array<i32>} : memref<512x128xf32, #tpu.memory_space<vmem>>, vector<512x128xf32>,
    return
  }
  func.func @transform_0(%arg0: i32) -> (i32, i32) {
    %c0_i32 = arith.constant 0 : i32
    %c0_i32_0 = arith.constant 0 : i32
    return %arg0, %c0_i32 : i32, i32
  }
  func.func @transform_1(%arg0: i32) -> (i32, i32) {
    %c0_i32 = arith.constant 0 : i32
    %c0_i32_0 = arith.constant 0 : i32
    %c0_i32_1 = arith.constant 0 : i32
    return %c0_i32, %c0_i32_0 : i32, i32
  }
  func.func @transform_2(%arg0: i32) -> (i32, i32) {
    %c0_i32 = arith.constant 0 : i32
    %c0_i32_0 = arith.constant 0 : i32
    %c0_i32_1 = arith.constant 0 : i32
    return %c0_i32, %c0_i32_0 : i32, i32
  }
  func.func @transform_3(%arg0: i32) -> (i32, i32) {
    %c0_i32 = arith.constant 0 : i32
    %c0_i32_0 = arith.constant 0 : i32
    %c0_i32_1 = arith.constant 0 : i32
    return %c0_i32, %c0_i32_0 : i32, i32
  }
  func.func @transform_4(%arg0: i32) -> (i32, i32) {
    %c0_i32 = arith.constant 0 : i32
    %c0_i32_0 = arith.constant 0 : i32
    %c0_i32_1 = arith.constant 0 : i32
    return %c0_i32, %c0_i32_0 : i32, i32
  }
  func.func @transform_5(%arg0: i32) -> (i32, i32) {
    %c0_i32 = arith.constant 0 : i32
    %c0_i32_0 = arith.constant 0 : i32
    %c0_i32_1 = arith.constant 0 : i32
    return %c0_i32, %c0_i32_0 : i32, i32
  }
  func.func @transform_6(%arg0: i32) -> (i32, i32) {
    %c0_i32 = arith.constant 0 : i32
    %c0_i32_0 = arith.constant 0 : i32
    %c0_i32_1 = arith.constant 0 : i32
    return %c0_i32, %c0_i32_0 : i32, i32
  }
  func.func @transform_7(%arg0: i32) -> (i32, i32) {
    %c0_i32 = arith.constant 0 : i32
    %c0_i32_0 = arith.constant 0 : i32
    %c0_i32_1 = arith.constant 0 : i32
    return %c0_i32, %c0_i32_0 : i32, i32
  }
  func.func @transform_8(%arg0: i32) -> (i32, i32) {
    %c0_i32 = arith.constant 0 : i32
    %c0_i32_0 = arith.constant 0 : i32
    %c0_i32_1 = arith.constant 0 : i32
    return %c0_i32, %c0_i32_0 : i32, i32
  }
  func.func @transform_9(%arg0: i32) -> (i32, i32) {
    %c0_i32 = arith.constant 0 : i32
    %c0_i32_0 = arith.constant 0 : i32
    %c0_i32_1 = arith.constant 0 : i32
    return %c0_i32, %c0_i32_0 : i32, i32
  }
  func.func @transform_10(%arg0: i32) -> (i32, i32) {
    %c0_i32 = arith.constant 0 : i32
    %c0_i32_0 = arith.constant 0 : i32
    %c0_i32_1 = arith.constant 0 : i32
    return %c0_i32, %c0_i32_0 : i32, i32
  }
  func.func @transform_11(%arg0: i32) -> (i32, i32) {
    %c0_i32 = arith.constant 0 : i32
    %c0_i32_0 = arith.constant 0 : i32
    return %arg0, %c0_i32 : i32, i32
  }
}

</mosaic_0001>

<bundles_post_ra>
// kernel: tpu_custom_call.1
= control target key start
LH: loop header
LB: loop body
LE: loop exit
PB: predicated region body
PF: predicated region fallthrough
CT: control target
= control target key end

     0   :  { %16 = vsyncpa [#allocation3], 0  ;;  %s7960_s0 = inlined_call_operand.vmem [shape: bf16[1024,32], index: 0, kind: input, shape index: {}]   ;;  %s7961_s1 = inlined_call_operand.vmem [shape: bf16[32,512], index: 1, kind: input, shape index: {}]   ;;  %s7962_s2 = inlined_call_operand.vmem [shape: f32[1,512], index: 2, kind: input, shape index: {}]   ;;  %s7963_s3 = inlined_call_operand.vmem [shape: bf16[512,256], index: 3, kind: input, shape index: {}]   ;;  %s7964_s4 = inlined_call_operand.vmem [shape: f32[1,256], index: 4, kind: input, shape index: {}]   ;;  %s7965_s5 = inlined_call_operand.hbm [shape: bf16[256,256], index: 5, kind: input, shape index: {}]   ;;  %s7966_s6 = inlined_call_operand.vmem [shape: f32[1,256], index: 6, kind: input, shape index: {}]   ;;  %s7967_s7 = inlined_call_operand.vmem [shape: bf16[256,64], index: 7, kind: input, shape index: {}]   ;;  %s7968_s8 = inlined_call_operand.vmem [shape: f32[1,64], index: 8, kind: input, shape index: {}]   ;;  %s7969_s9 = inlined_call_operand.vmem [shape: bf16[64,128], index: 9, kind: input, shape index: {}]   ;;  %s7970_s10 = inlined_call_operand.vmem [shape: f32[1,128], index: 10, kind: input, shape index: {}]   ;;  %s7971_s11 = inlined_call_operand.hbm [shape: f32[1024,128], index: 11, kind: output, shape index: {}]  }
   0x1   :  { %17 = vsyncpa [#allocation4], 0 }
   0x2   :  { %19 = vsyncpa [#allocation4 + $0x1], 0  ;;  %s6096_s17 = smov 0   ;;  %s6098_s18 = smov 0  }
   0x3   :  { %s6100_s19 = smov 0   ;;  %s6102_s20 = smov 0  }
   0x4 LB: > { %s6117_s21 = sadd.s32 4294967295, %s6027_s20   ;;  %s5025_s22 = sadd.s32 4294967294, %s6027_s20   ;;  %s6027_s20 = sphi %s6102_s20, %s7989_s20   ;;  %s6023_s19 = sphi %s6100_s19, %s7988_s19   ;;  %s6019_s18 = sphi %s6098_s18, %s7987_s18   ;;  %s6015_s17 = sphi %s6096_s17, %s7986_s17  }
   0x5   : > { %s6121_s23 = sadd.s32 1, %s6027_s20   ;;  %s268_s24 = sadd.s32 1, %s6023_s19 }
   0x6   : > { %s265_s25 = ssub.s32 %s6027_s20, %s6121_s23  ;;  %p278_p0 = scmp.ne.s32.totalorder %s6023_s19, %s6019_s18 }
   0x7   : > { %p266_p1 = scmp.eq.s32.totalorder %s265_s25, 0  ;;  %p279_p2 = scmp.eq.s32.totalorder %s6117_s21, 1 }
   0x8   : > { %p284_p3 = scmp.ne.s32.totalorder %s6019_s18, %s6015_s17  ;;  %p285_p4 = scmp.eq.s32.totalorder %s5025_s22, 1 }
   0x9   : > { %s6132_s26 = scalar_select %p266_p1, %s6023_s19, %s268_s24  }
   0xa   : > { %p6134_p5 = por %p279_p2, %p278_p0  ;;  %p6138_p6 = por %p285_p4, %p284_p3 }
   0xb   : > { %7975 = sst [smem:[#allocation8_spill]] %s6132_s26  ;;  %p5026_p7 = scmp.ge.s32.totalorder %s6027_s20, 1 }
   0xc   : > { %s7976_s27 = scalar_select %p6134_p5, 1, 0 }
   0xd   : > { %s7977_s28 = scalar_select %p6138_p6, 1, 0 }
   0xe   : > { %p292_p8 = scmp.lt.s32.totalorder %s6027_s20, 3  ;;  %p7972_p9 = scmp.eq.s32.totalorder %s6117_s21, 0 }
   0xf   : > { %s6029_s30 = smov [#allocation2]   ;;  %s5933_s16 = scalar_lea.hbm %s7965_s5, 4096 }
  0x10   : > { %p6145_p10 = pnand %p5026_p7, %p292_p8  ;;  %s316_s12 = sshll.u32 %s6029_s30, 4  ;;  %s317_s12 = int_to_ptr.vmem [resolvable:$true] %s316_s12 }
  0x11   : > { %p5934_p13 = scmp.ne.s32.totalorder %s7965_s5, %s5933_s16  ;;  %p5940_p3 = scmp.lt.u32.totalorder %s5933_s16, %s7965_s5 }
  0x12   : > { %s7978_s29 = scalar_select %p6145_p10, 1, 0 }
  0x13   : > { %p5668_p11 = pneg %p6145_p10 }
  0x15   : > { %p6153_p12 = pnand %p7972_p9, %p5668_p11 }
  0x17   : > { %p5935_p0 = pneg %p6153_p12 }
  0x19   : > { %p5936_p1 = pnand %p5935_p0, %p5934_p13 }
  0x1b   : > { %p5937_p2 = pneg %p5936_p1 }
  0x1d   : > { %p5942_p4 = pnand %p5940_p3, %p5937_p2 }
  0x1f   : > { %5945 = shalt.err (!%p5942_p4)
}
  0x20   : > { %s5946_s26 = scalar_lea.vmem %s317_s12, 4096  ;;  %p5954_p9 = scmp.lt.s32.totalorder %s317_s12, %s317_s12 }
  0x21   : > { %p5947_p7 = scmp.ne.s32.totalorder %s317_s12, %s5946_s26  ;;  %p5955_p6 = scmp.lt.s32.totalorder %s5946_s26, %s5946_s26 }
  0x23   : > { %p5949_p8 = pnand %p5947_p7, %p5935_p0  ;;  %p5956_p5 = por %p5955_p6, %p5954_p9 }
  0x25   : > { %p5950_p11 = pneg %p5949_p8 }
  0x27   : > { %p5957_p10 = pnand %p5956_p5, %p5950_p11 }
  0x29   : > { %5960 = shalt.err (!%p5957_p10)
}
  0x2a   : > { %s6030_s14 = smov 128   ;;  %s6031_s15 = smov 8  }
  0x2b   : > { %5671 = dma.hbm_to_vmem [thread:$0]  (!%p6153_p12), %s7965_s5, 4096, %s317_s12, [#allocation3], %s6030_s14, %s6030_s14, %s6031_s15  }
  0x2c   : > { %p7980_p13 = scmp.ne.s32.totalorder %s7978_s29, 0 }
  0x2d   : > { %p7981_p1 = scmp.eq.s32.totalorder (!%p7980_p13), %s6117_s21, 0 }
  0x2e   : > { %356 = sbr.rel (%p7980_p13) target bundleno = 1720 (0x6b8), region = 64 }
  0x35   : > { %6006 = dma.done.wait (%p7981_p1), [#allocation3], 4096   ;;  %p7982_p0 = pmov %p7981_p1 }
  0x36   : > { %s5032_s26 = sshll.u32 %s6117_s21, 6  ;;  %v6032_v0 = vmov 0   ;;  %v5717_v1 = vld [vmem:[%s7961_s1 + $0x4] ss:$16 sps:$4 sm:$0xff]   ;;  %v5719_v2 = vld [vmem:[%s7961_s1] ss:$16 sps:$4 sm:$0xff]  }
  0x37   : > { %6008 = vsyncadd (%p7982_p0), [#allocation3], 4294963200  ;;  %827 = vmatprep.mubr.bf16.mxu0 %v6032_v0  ;;  %p397_p5 = scmp.lt.s32.totalorder %s5032_s26, 127  ;;  %1067 = vmatprep.mubr.bf16.mxu1 %v6032_v0  ;;  %v5720_v3 = vld [vmem:[%s7961_s1 + $0x24] ss:$16 sps:$4 sm:$0xff]   ;;  %vm698_vm0 = vcmask 261120  }
  0x38   : > { %795 = vmatprep.subr.bf16.mxu0 %v5717_v1  ;;  %5402 = vmatprep.subr.bf16.mxu1 %v5717_v1  ;;  %v5722_v4 = vld [vmem:[%s7961_s1 + $0x20] ss:$16 sps:$4 sm:$0xff]   ;;  %v5729_v7 = vld [vmem:[%s7963_s3 + $0x4] ss:$8 sps:$4 sm:$0xff]   ;;  %v5734_v9 = vld [vmem:[%s7963_s3 + $0x14] ss:$8 sps:$4 sm:$0xff]  }
  0x39   : > { %s7991_s26 = smov (!%p397_p5, %s5032_s26), 127  ;;  %796 = vmatpush1.bf16.msra.mxu0 %v5719_v2  ;;  %5404 = vmatpush1.bf16.msra.mxu1 %v5719_v2  ;;  %v5727_v6 = vld [vmem:[%s7963_s3] ss:$8 sps:$4 sm:$0xff]   ;;  %v5732_v8 = vld [vmem:[%s7963_s3 + $0x10] ss:$8 sps:$4 sm:$0xff]   ;;  %vm4487_vm1 = vcmask 523264  }
  0x3a   : > { %s5033_s13 = sshll.u32 %s7991_s26, 2  ;;  %797 = vmatprep.subr.bf16.mxu0 %v5720_v3  ;;  %5403 = vmatprep.subr.bf16.mxu1 %v5720_v3  ;;  %v5738_v10 = vld [vmem:[%s7963_s3 + $0x24] ss:$8 sps:$4 sm:$0xff]   ;;  %v5736_v12 = vld [vmem:[%s7963_s3 + $0x20] ss:$8 sps:$4 sm:$0xff]   ;;  %s393_s12 = sand.u32 1, %s6019_s18  }
  0x3b   : > { %s6191_s15 = scalar_lea.vmem %s7960_s0, %s5033_s13  ;;  %v5743_v13 = vld [vmem:[%s7963_s3 + $0x34] ss:$8 sps:$4 sm:$0xff]   ;;  %v5741_v14 = vld [vmem:[%s7963_s3 + $0x30] ss:$8 sps:$4 sm:$0xff]   ;;  %v5747_v15 = vld [vmem:[%s7963_s3 + $0x44] ss:$8 sps:$4 sm:$0xff]  }
  0x3c   : > { %v6200_v5 = vld [vmem:[%s6191_s15] sm:$0xff]   ;;  %v6221_v11 = vld [vmem:[%s6191_s15 + $0x8] sm:$0xff]   ;;  %v6239_v16 = vld [vmem:[%s6191_s15 + $0x10] sm:$0xff]   ;;  %s5031_s13 = sshll.u32 %s393_s12, 9  ;;  %s5293_s30 = sshll.u32 %s6117_s21, 13 }
  0x3d   : > { %798 = vmatpush1.bf16.msra.mxu0 %v5722_v4  ;;  %5405 = vmatpush1.bf16.msra.mxu1 %v5722_v4  ;;  %v5745_v17 = vld [vmem:[%s7963_s3 + $0x40] ss:$8 sps:$4 sm:$0xff]   ;;  %v5752_v18 = vld [vmem:[%s7963_s3 + $0x54] ss:$8 sps:$4 sm:$0xff]   ;;  %v5750_v19 = vld [vmem:[%s7963_s3 + $0x50] ss:$8 sps:$4 sm:$0xff]  }
  0x3e   : > { %2281 = vmatprep.subr.bf16.mxu0 %v5729_v7  ;;  %v5756_v20 = vld [vmem:[%s7963_s3 + $0x64] ss:$8 sps:$4 sm:$0xff]   ;;  %v6257_v21 = vld [vmem:[%s6191_s15 + $0x18] sm:$0xff]   ;;  %v5754_v22 = vld [vmem:[%s7963_s3 + $0x60] ss:$8 sps:$4 sm:$0xff]   ;;  %s7770_s25 = scalar_lea.vmem [#allocation5], %s5031_s13 }
  0x3f   : > { %v5761_v23 = vld [vmem:[%s7963_s3 + $0x74] ss:$8 sps:$4 sm:$0xff]   ;;  %v5759_v24 = vld [vmem:[%s7963_s3 + $0x70] ss:$8 sps:$4 sm:$0xff]   ;;  %v6272_v25 = vld [vmem:[%s6191_s15 + $0x20] sm:$0xff]   ;;  %s4951_s14 = sshll.u32 %s7770_s25, 4  ;;  %s7911_s14 = int_to_ptr.vmem [resolvable:$true] %s4951_s14 }
  0x40   : > { %5074 = vmatmul.mubr.msk.bf16.vlgmr.msra.gmra.mrb[0].mxu0 %vm698_vm0, %v6200_v5  ;;  %v5765_v26 = vld [vmem:[%s7963_s3 + $0x84] ss:$8 sps:$4 sm:$0xff]   ;;  %v5763_v27 = vld [vmem:[%s7963_s3 + $0x80] ss:$8 sps:$4 sm:$0xff]   ;;  %v5770_v28 = vld [vmem:[%s7963_s3 + $0x94] ss:$8 sps:$4 sm:$0xff]  }
  0x41   : > { %837 = vmatprep.mubr.bf16.mxu0 %v6032_v0  ;;  %2282 = vmatpush1.bf16.msra.mxu0 %v5727_v6  ;;  %v5768_v29 = vld [vmem:[%s7963_s3 + $0x90] ss:$8 sps:$4 sm:$0xff]   ;;  %v5774_v30 = vld [vmem:[%s7963_s3 + $0xa4] ss:$8 sps:$4 sm:$0xff]   ;;  %v5772_v32 = vld [vmem:[%s7963_s3 + $0xa0] ss:$8 sps:$4 sm:$0xff]  }
  0x42   : > { %2283 = vmatprep.subr.bf16.mxu0 %v5734_v9  ;;  %v6293_v31 = vld [vmem:[%s6191_s15 + $0x28] sm:$0xff]   ;;  %v5779_v33 = vld [vmem:[%s7963_s3 + $0xb4] ss:$8 sps:$4 sm:$0xff]   ;;  %v5777_v34 = vld [vmem:[%s7963_s3 + $0xb0] ss:$8 sps:$4 sm:$0xff]   ;;  %s7919_s21 = scalar_lea.sflag [#allocation4], %s393_s12 }
  0x43   : > { %v5783_v35 = vld [vmem:[%s7963_s3 + $0xc4] ss:$8 sps:$4 sm:$0xff]   ;;  %v6311_v36 = vld [vmem:[%s6191_s15 + $0x30] sm:$0xff]   ;;  %v5781_v37 = vld [vmem:[%s7963_s3 + $0xc0] ss:$8 sps:$4 sm:$0xff]   ;;  %s5961_s26 = scalar_lea.vmem %s7911_s14, 8192 }
  0x44   : > { %v6320_v38 = vld [vmem:[%s6191_s15 + $0x38] sm:$0xff]   ;;  %v5789_v41 = vld [vmem:[%s6191_s15 + $0xc0] sm:$0xff]   ;;  %v5793_v48 = vld [vmem:[%s6191_s15 + $0xc8] sm:$0xff]   ;;  %p5962_p6 = scmp.ne.s32.totalorder %s7911_s14, %s5961_s26  ;;  %p7983_p9 = scmp.ne.s32.totalorder %s7976_s27, 0 }
  0x45   : > { %2284 = vmatpush1.bf16.msra.mxu0 %v5732_v8  ;;  %v5786_v39 = vld [vmem:[%s7963_s3 + $0xd0] ss:$8 sps:$4 sm:$0xff]   ;;  %v5788_v40 = vld [vmem:[%s7963_s3 + $0xd4] ss:$8 sps:$4 sm:$0xff]   ;;  %5098 = vmatmul.mubr.msk.bf16.vlgmr.msra.gmra.mrb[0].mxu1 %vm698_vm0, %v5789_v41  ;;  %v5796_v44 = vld [vmem:[%s7963_s3 + $0xe4] ss:$8 sps:$4 sm:$0xff]  }
  0x46   : > { %2285 = vmatprep.subr.bf16.mxu0 %v5738_v10  ;;  %v5790_v42 = vld [vmem:[%s7961_s1 + $0x8] ss:$16 sps:$4 sm:$0xff]   ;;  %v5792_v43 = vld [vmem:[%s7961_s1 + $0xc] ss:$16 sps:$4 sm:$0xff]   ;;  %v6343_v45 = vld [vmem:[%s6191_s15 + $0x40] sm:$0xff]   ;;  %1077 = vmatprep.mubr.bf16.mxu1 %v6032_v0  ;;  %p5963_p10 = pnand %p5962_p6, %p7983_p9  ;;  %s6033_s13 = smov [#allocation5]  }
  0x47   : > { %1148 = vmatprep.subr.bf16.mxu1 %v5792_v43  ;;  %v5794_v46 = vld [vmem:[%s7963_s3 + $0xe0] ss:$8 sps:$4 sm:$0xff]   ;;  %v5800_v47 = vld [vmem:[%s7963_s3 + $0xf4] ss:$8 sps:$4 sm:$0xff]   ;;  %v5798_v49 = vld [vmem:[%s7963_s3 + $0xf0] ss:$8 sps:$4 sm:$0xff]  }
  0x48   : > { %5075 = vmatmul.mubr.msk.bf16.gmra.mrb[4].mxu0 %vm698_vm0, %v6221_v11  ;;  %1149 = vmatpush1.bf16.msra.mxu1 %v5790_v42  ;;  %v6360_v50 = vld [vmem:[%s6191_s15 + $0x48] sm:$0xff]   ;;  %v5797_v51 = vld [vmem:[%s6191_s15 + $0xd0] sm:$0xff]   ;;  %v5801_v53 = vld [vmem:[%s6191_s15 + $0xd8] sm:$0xff]   ;;  %p5964_p12 = pneg %p5963_p10  ;;  %s5965_s16 = sshll.u32 %s6033_s13, 4  ;;  %s5966_s16 = int_to_ptr.vmem [resolvable:$false] %s5965_s16 }
  0x49   : > { %847 = vmatprep.mubr.bf16.mxu0 %v6032_v0  ;;  %2286 = vmatpush1.bf16.msra.mxu0 %v5736_v12  ;;  %v6369_v52 = vld [vmem:[%s6191_s15 + $0x50] sm:$0xff]   ;;  %v6378_v54 = vld [vmem:[%s6191_s15 + $0x58] sm:$0xff]   ;;  %v5802_v55 = vld [vmem:[%s6191_s15 + $0xe0] sm:$0xff]   ;;  %s5967_s29 = scalar_lea.vmem %s5966_s16, 16384  ;;  %p5968_p2 = scmp.lt.s32.totalorder %s7911_s14, %s5966_s16 }
  0x4a   : > { %2287 = vmatprep.subr.bf16.mxu0 %v5743_v13  ;;  %v6387_v56 = vld [vmem:[%s6191_s15 + $0x60] sm:$0xff]   ;;  %v5806_v58 = vld [vmem:[%s7961_s1 + $0x28] ss:$16 sps:$4 sm:$0xff]   ;;  %v5808_v59 = vld [vmem:[%s7961_s1 + $0x2c] ss:$16 sps:$4 sm:$0xff]   ;;  %p5969_p3 = scmp.lt.s32.totalorder %s5967_s29, %s5961_s26 }
  0x4b   : > { %v5805_v57 = vld [vmem:[%s7963_s3 + $0x104] ss:$8 sps:$4 sm:$0xff]   ;;  %1150 = vmatprep.subr.bf16.mxu1 %v5808_v59  ;;  %v5810_v62 = vld [vmem:[%s6191_s15 + $0xf0] sm:$0xff]   ;;  %v5814_v1 = vld [vmem:[%s6191_s15 + $0xf8] sm:$0xff]  }
  0x4c   : > { %v5809_v60 = vld [vmem:[%s6191_s15 + $0xe8] sm:$0xff]   ;;  %1151 = vmatpush1.bf16.msra.mxu1 %v5806_v58  ;;  %v6414_v63 = vld [vmem:[%s6191_s15 + $0x70] sm:$0xff]   ;;  %v6423_v2 = vld [vmem:[%s6191_s15 + $0x78] sm:$0xff]   ;;  %p5970_p4 = por %p5969_p3, %p5968_p2 }
  0x4d   : > { %2288 = vmatpush1.bf16.msra.mxu0 %v5741_v14  ;;  %5099 = vmatmul.mubr.msk.bf16.gmra.mrb[4].mxu1 %vm698_vm0, %v5793_v48  ;;  %v6405_v61 = vld [vmem:[%s6191_s15 + $0x68] sm:$0xff]   ;;  %v6431_v3 = vld [vmem:[%s6191_s15 + $0x80] sm:$0xff]   ;;  %v6458_v6 = vld [vmem:[%s6191_s15 + $0x98] sm:$0xff]  }
  0x4e   : > { %2289 = vmatprep.subr.bf16.mxu0 %v5747_v15  ;;  %1087 = vmatprep.mubr.bf16.mxu1 %v6032_v0  ;;  %v6440_v4 = vld [vmem:[%s6191_s15 + $0x88] sm:$0xff]   ;;  %v6467_v7 = vld [vmem:[%s6191_s15 + $0xa0] sm:$0xff]   ;;  %v6485_v9 = vld [vmem:[%s6191_s15 + $0xb0] sm:$0xff]   ;;  %p5971_p7 = pnand %p5970_p4, %p5964_p12 }
  0x4f   : > { %v6476_v8 = vld [vmem:[%s6191_s15 + $0xa8] sm:$0xff]   ;;  %v6494_v10 = vld [vmem:[%s6191_s15 + $0xb8] sm:$0xff]   ;;  %v6515_v14 = vld [vmem:[%s7962_s2] sm:$0xf] }
  0x50   : > { %5076 = vmatmul.mubr.msk.bf16.gmra.mrb[8].mxu0 %vm698_vm0, %v6239_v16  ;;  %v5811_v42 = vld [vmem:[%s7963_s3 + $0x110] ss:$8 sps:$4 sm:$0xff]  }
  0x51   : > { %857 = vmatprep.mubr.bf16.mxu0 %v6032_v0  ;;  %2290 = vmatpush1.bf16.msra.mxu0 %v5745_v17 }
  0x52   : > { %2291 = vmatprep.subr.bf16.mxu0 %v5752_v18 }
  0x55   : > { %2292 = vmatpush1.bf16.msra.mxu0 %v5750_v19  ;;  %5100 = vmatmul.mubr.msk.bf16.gmra.mrb[8].mxu1 %vm698_vm0, %v5797_v51  ;;  %v5815_v51 = vld [vmem:[%s7963_s3 + $0x120] ss:$8 sps:$4 sm:$0xff]  }
  0x56   : > { %2293 = vmatprep.subr.bf16.mxu0 %v5756_v20  ;;  %1097 = vmatprep.mubr.bf16.mxu1 %v6032_v0 }
  0x58   : > { %5077 = vmatmul.mubr.msk.bf16.gmra.mrb[12].mxu0 %vm698_vm0, %v6257_v21 }
  0x59   : > { %867 = vmatprep.mubr.bf16.mxu0 %v6032_v0  ;;  %2294 = vmatpush1.bf16.msra.mxu0 %v5754_v22 }
  0x5a   : > { %2295 = vmatprep.subr.bf16.mxu0 %v5761_v23 }
  0x5d   : > { %2296 = vmatpush1.bf16.msra.mxu0 %v5759_v24  ;;  %5101 = vmatmul.mubr.msk.bf16.gmra.mrb[12].mxu1 %vm698_vm0, %v5801_v53 }
  0x5e   : > { %2297 = vmatprep.subr.bf16.mxu0 %v5765_v26  ;;  %1107 = vmatprep.mubr.bf16.mxu1 %v6032_v0 }
  0x60   : > { %5078 = vmatmul.mubr.msk.bf16.gmra.mrb[16].mxu0 %vm698_vm0, %v6272_v25 }
  0x61   : > { %877 = vmatprep.mubr.bf16.mxu0 %v6032_v0  ;;  %2298 = vmatpush1.bf16.msra.mxu0 %v5763_v27 }
  0x62   : > { %2299 = vmatprep.subr.bf16.mxu0 %v5770_v28 }
  0x65   : > { %2300 = vmatpush1.bf16.msra.mxu0 %v5768_v29  ;;  %5102 = vmatmul.mubr.msk.bf16.gmra.mrb[16].mxu1 %vm698_vm0, %v5802_v55 }
  0x66   : > { %2301 = vmatprep.subr.bf16.mxu0 %v5774_v30  ;;  %1117 = vmatprep.mubr.bf16.mxu1 %v6032_v0 }
  0x68   : > { %5079 = vmatmul.mubr.msk.bf16.gmra.mrb[20].mxu0 %vm698_vm0, %v6293_v31 }
  0x69   : > { %887 = vmatprep.mubr.bf16.mxu0 %v6032_v0  ;;  %2302 = vmatpush1.bf16.msra.mxu0 %v5772_v32 }
  0x6a   : > { %2303 = vmatprep.subr.bf16.mxu0 %v5779_v33  ;;  %v5803_v33 = vld [vmem:[%s7963_s3 + $0x100] ss:$8 sps:$4 sm:$0xff]  }
  0x6d   : > { %2304 = vmatpush1.bf16.msra.mxu0 %v5777_v34  ;;  %5103 = vmatmul.mubr.msk.bf16.gmra.mrb[20].mxu1 %vm698_vm0, %v5809_v60  ;;  %v5818_v60 = vld [vmem:[%s7963_s3 + $0x130] ss:$8 sps:$4 sm:$0xff]  }
  0x6e   : > { %2305 = vmatprep.subr.bf16.mxu0 %v5783_v35  ;;  %1127 = vmatprep.mubr.bf16.mxu1 %v6032_v0 }
  0x70   : > { %5080 = vmatmul.mubr.msk.bf16.gmra.mrb[24].mxu0 %vm698_vm0, %v6311_v36 }
  0x71   : > { %897 = vmatprep.mubr.bf16.mxu0 %v6032_v0  ;;  %2306 = vmatpush1.bf16.msra.mxu0 %v5781_v37 }
  0x72   : > { %2307 = vmatprep.subr.bf16.mxu0 %v5788_v40 }
  0x75   : > { %2308 = vmatpush1.bf16.msra.mxu0 %v5786_v39  ;;  %5104 = vmatmul.mubr.msk.bf16.gmra.mrb[24].mxu1 %vm698_vm0, %v5810_v62 }
  0x76   : > { %2309 = vmatprep.subr.bf16.mxu0 %v5796_v44  ;;  %1137 = vmatprep.mubr.bf16.mxu1 %v6032_v0 }
  0x78   : > { %5081 = vmatmul.mubr.msk.bf16.gmra.mrb[28].mxu0 %vm698_vm0, %v6320_v38 }
  0x79   : > { %907 = vmatprep.mubr.bf16.mxu0 %v6032_v0  ;;  %2310 = vmatpush1.bf16.msra.mxu0 %v5794_v46 }
  0x7a   : > { %2311 = vmatprep.subr.bf16.mxu0 %v5800_v47 }
  0x7d   : > { %2312 = vmatpush1.bf16.msra.mxu0 %v5798_v49  ;;  %5105 = vmatmul.mubr.msk.bf16.gmra.mrb[28].mxu1 %vm698_vm0, %v5814_v1 }
  0x7e   : > { %2634 = vmatprep.subr.bf16.mxu0 %v5805_v57  ;;  %1180 = vmatprep.mubr.bf16.mxu1 %v6032_v0 }
  0x80   : > { %5082 = vmatmul.mubr.msk.bf16.gmra.mrb[32].mxu0 %vm698_vm0, %v6343_v45 }
  0x81   : > { %917 = vmatprep.mubr.bf16.mxu0 %v6032_v0 }
  0x85   : > { %5106 = vmatmul.mubr.msk.bf16.vlgmr.msra.gmra.mrb[32].mxu1 %vm698_vm0, %v6200_v5  ;;  %v6449_v5 = vld [vmem:[%s6191_s15 + $0x90] sm:$0xff]  }
  0x86   : > { %1190 = vmatprep.mubr.bf16.mxu1 %v6032_v0 }
  0x88   : > { %5083 = vmatmul.mubr.msk.bf16.gmra.mrb[36].mxu0 %vm698_vm0, %v6360_v50 }
  0x89   : > { %927 = vmatprep.mubr.bf16.mxu0 %v6032_v0 }
  0x8d   : > { %5107 = vmatmul.mubr.msk.bf16.gmra.mrb[36].mxu1 %vm698_vm0, %v6221_v11  ;;  %v478_v11 = vlaneseq }
  0x8e   : > { %1200 = vmatprep.mubr.bf16.mxu1 %v6032_v0 }
  0x8f   : > { %v6507_v12 = vshrl.u32 %v478_v11, 7 }
  0x90   : > { %5084 = vmatmul.mubr.msk.bf16.gmra.mrb[40].mxu0 %vm698_vm0, %v6369_v52 }
  0x91   : > { %937 = vmatprep.mubr.bf16.mxu0 %v6032_v0  ;;  %v6510_v13 = vsub.s32 0, %v6507_v12  ;;  %v6518_v15 = vsub.s32 1, %v6507_v12 }
  0x93   : > { %v6529_v17 = vrot.slane %v6515_v14, %v6518_v15 }
  0x95   : > { %5108 = vmatmul.mubr.msk.bf16.gmra.mrb[40].mxu1 %vm698_vm0, %v6239_v16  ;;  %v6525_v16 = vrot.slane %v6515_v14, %v6510_v13 }
  0x96   : > { %1210 = vmatprep.mubr.bf16.mxu1 %v6032_v0 }
  0x98   : > { %5085 = vmatmul.mubr.msk.bf16.gmra.mrb[44].mxu0 %vm698_vm0, %v6378_v54 }
  0x99   : > { %947 = vmatprep.mubr.bf16.mxu0 %v6032_v0 }
  0x9d   : > { %5109 = vmatmul.mubr.msk.bf16.gmra.mrb[44].mxu1 %vm698_vm0, %v6257_v21 }
  0x9e   : > { %1220 = vmatprep.mubr.bf16.mxu1 %v6032_v0 }
  0xa0   : > { %5086 = vmatmul.mubr.msk.bf16.gmra.mrb[48].mxu0 %vm698_vm0, %v6387_v56 }
  0xa1   : > { %957 = vmatprep.mubr.bf16.mxu0 %v6032_v0 }
  0xa5   : > { %5110 = vmatmul.mubr.msk.bf16.gmra.mrb[48].mxu1 %vm698_vm0, %v6272_v25 }
  0xa6   : > { %1230 = vmatprep.mubr.bf16.mxu1 %v6032_v0 }
  0xa8   : > { %5087 = vmatmul.mubr.msk.bf16.gmra.mrb[52].mxu0 %vm698_vm0, %v6405_v61 }
  0xa9   : > { %967 = vmatprep.mubr.bf16.mxu0 %v6032_v0 }
  0xad   : > { %5111 = vmatmul.mubr.msk.bf16.gmra.mrb[52].mxu1 %vm698_vm0, %v6293_v31 }
  0xae   : > { %1240 = vmatprep.mubr.bf16.mxu1 %v6032_v0 }
  0xb0   : > { %5088 = vmatmul.mubr.msk.bf16.gmra.mrb[56].mxu0 %vm698_vm0, %v6414_v63 }
  0xb1   : > { %977 = vmatprep.mubr.bf16.mxu0 %v6032_v0 }
  0xb5   : > { %5112 = vmatmul.mubr.msk.bf16.gmra.mrb[56].mxu1 %vm698_vm0, %v6311_v36  ;;  %v5813_v36 = vld [vmem:[%s7963_s3 + $0x114] ss:$8 sps:$4 sm:$0xff]  }
  0xb6   : > { %1250 = vmatprep.mubr.bf16.mxu1 %v6032_v0 }
  0xb8   : > { %5089 = vmatmul.mubr.msk.bf16.gmra.mrb[60].mxu0 %vm698_vm0, %v6423_v2 }
  0xb9   : > { %987 = vmatprep.mubr.bf16.mxu0 %v6032_v0 }
  0xbd   : > { %5113 = vmatmul.mubr.msk.bf16.gmra.mrb[60].mxu1 %vm698_vm0, %v6320_v38 }
  0xbe   : > { %1260 = vmatprep.mubr.bf16.mxu1 %v6032_v0 }
  0xc0   : > { %5090 = vmatmul.mubr.msk.bf16.gmra.mrb[64].mxu0 %vm698_vm0, %v6431_v3 }
  0xc1   : > { %997 = vmatprep.mubr.bf16.mxu0 %v6032_v0 }
  0xc5   : > { %5114 = vmatmul.mubr.msk.bf16.gmra.mrb[64].mxu1 %vm698_vm0, %v6343_v45  ;;  %v5817_v45 = vld [vmem:[%s7963_s3 + $0x124] ss:$8 sps:$4 sm:$0xff]  }
  0xc6   : > { %1270 = vmatprep.mubr.bf16.mxu1 %v6032_v0 }
  0xc8   : > { %5091 = vmatmul.mubr.msk.bf16.gmra.mrb[68].mxu0 %vm698_vm0, %v6440_v4 }
  0xc9   : > { %1007 = vmatprep.mubr.bf16.mxu0 %v6032_v0 }
  0xcd   : > { %5115 = vmatmul.mubr.msk.bf16.gmra.mrb[68].mxu1 %vm698_vm0, %v6360_v50 }
  0xce   : > { %1280 = vmatprep.mubr.bf16.mxu1 %v6032_v0 }
  0xd0   : > { %5092 = vmatmul.mubr.msk.bf16.gmra.mrb[72].mxu0 %vm698_vm0, %v6449_v5 }
  0xd1   : > { %1017 = vmatprep.mubr.bf16.mxu0 %v6032_v0 }
  0xd5   : > { %5116 = vmatmul.mubr.msk.bf16.gmra.mrb[72].mxu1 %vm698_vm0, %v6369_v52 }
  0xd6   : > { %1290 = vmatprep.mubr.bf16.mxu1 %v6032_v0 }
  0xd8   : > { %5093 = vmatmul.mubr.msk.bf16.gmra.mrb[76].mxu0 %vm698_vm0, %v6458_v6 }
  0xd9   : > { %1027 = vmatprep.mubr.bf16.mxu0 %v6032_v0 }
  0xdd   : > { %5117 = vmatmul.mubr.msk.bf16.gmra.mrb[76].mxu1 %vm698_vm0, %v6378_v54  ;;  %v5820_v54 = vld [vmem:[%s7963_s3 + $0x134] ss:$8 sps:$4 sm:$0xff]  }
  0xde   : > { %1300 = vmatprep.mubr.bf16.mxu1 %v6032_v0 }
  0xe0   : > { %5094 = vmatmul.mubr.msk.bf16.gmra.mrb[80].mxu0 %vm698_vm0, %v6467_v7 }
  0xe1   : > { %1037 = vmatprep.mubr.bf16.mxu0 %v6032_v0 }
  0xe5   : > { %5118 = vmatmul.mubr.msk.bf16.gmra.mrb[80].mxu1 %vm698_vm0, %v6387_v56 }
  0xe6   : > { %1310 = vmatprep.mubr.bf16.mxu1 %v6032_v0 }
  0xe8   : > { %5095 = vmatmul.mubr.msk.bf16.gmra.mrb[84].mxu0 %vm698_vm0, %v6476_v8 }
  0xe9   : > { %1047 = vmatprep.mubr.bf16.mxu0 %v6032_v0 }
  0xed   : > { %5119 = vmatmul.mubr.msk.bf16.gmra.mrb[84].mxu1 %vm698_vm0, %v6405_v61  ;;  %v5823_v61 = vld [vmem:[%s7963_s3 + $0x144] ss:$8 sps:$4 sm:$0xff]  }
  0xee   : > { %1320 = vmatprep.mubr.bf16.mxu1 %v6032_v0 }
  0xf0   : > { %5096 = vmatmul.mubr.msk.bf16.gmra.mrb[88].mxu0 %vm698_vm0, %v6485_v9 }
  0xf1   : > { %1057 = vmatprep.mubr.bf16.mxu0 %v6032_v0 }
  0xf5   : > { %5120 = vmatmul.mubr.msk.bf16.gmra.mrb[88].mxu1 %vm698_vm0, %v6414_v63  ;;  %v5829_v63 = vld [vmem:[%s7963_s3 + $0x164] ss:$8 sps:$4 sm:$0xff]  }
  0xf6   : > { %1330 = vmatprep.mubr.bf16.mxu1 %v6032_v0 }
  0xf8   : > { %5097 = vmatmul.mubr.msk.bf16.gmra.mrb[92].mxu0 %vm698_vm0, %v6494_v10 }
  0xfd   : > { %5121 = vmatmul.mubr.msk.bf16.gmra.mrb[92].mxu1 %vm698_vm0, %v6423_v2  ;;  %v5835_v2 = vld [vmem:[%s7963_s3 + $0x184] ss:$8 sps:$4 sm:$0xff]  }
  0xfe   : > { %1340 = vmatprep.mubr.bf16.mxu1 %v6032_v0 }
 0x105   : > { %5122 = vmatmul.mubr.msk.bf16.gmra.mrb[96].mxu1 %vm698_vm0, %v6431_v3  ;;  %v5841_v3 = vld [vmem:[%s7963_s3 + $0x1a4] ss:$8 sps:$4 sm:$0xff]  }
 0x106   : > { %1350 = vmatprep.mubr.bf16.mxu1 %v6032_v0 }
 0x10d   : > { %5123 = vmatmul.mubr.msk.bf16.gmra.mrb[100].mxu1 %vm698_vm0, %v6440_v4 }
 0x10e   : > { %1360 = vmatprep.mubr.bf16.mxu1 %v6032_v0 }
 0x113   : > { %v829_v18 = vpop.f32.mrb[0].mxu0 }
 0x114   : > { %v830_v19 = vadd.f32 %v829_v18, %v6525_v16  ;;  %v831_v20 = vpop.f32.mrb[1].mxu0 }
 0x115   : > { %v832_v21 = vadd.f32 %v831_v20, %v6529_v17  ;;  %v833_v22 = vpop.f32.mrb[2].mxu0  ;;  %5124 = vmatmul.mubr.msk.bf16.gmra.mrb[104].mxu1 %vm698_vm0, %v6449_v5  ;;  %v5844_v5 = vld [vmem:[%s7963_s3 + $0x1b4] ss:$8 sps:$4 sm:$0xff]  }
 0x116   : > { %v834_v23 = vadd.f32 %v833_v22, %v6525_v16  ;;  %v835_v24 = vpop.f32.mrb[3].mxu0  ;;  %v1501_v26 = vmax.f32 %v830_v19, 0.0  ;;  %v5821_v22 = vld [vmem:[%s7963_s3 + $0x140] ss:$8 sps:$4 sm:$0xff]   ;;  %1370 = vmatprep.mubr.bf16.mxu1 %v6032_v0 }
 0x117   : > { %v836_v25 = vadd.f32 %v835_v24, %v6529_v17  ;;  %v1502_v28 = vmax.f32 %v832_v21, 0.0 }
 0x118   : > { %v1505_v27 = vmax.f32 %v834_v23, 0.0 }
 0x119   : > { %v1506_v29 = vmax.f32 %v836_v25, 0.0  ;;  %v5826_v25 = vld [vmem:[%s7963_s3 + $0x154] ss:$8 sps:$4 sm:$0xff]  }
 0x11a   : > { %v1757_v30 = vpack.c.bf16 %v1505_v27, %v1501_v26 }
 0x11b   : > { %v839_v31 = vpop.f32.mrb[4].mxu0  ;;  %v1758_v32 = vpack.c.bf16 %v1506_v29, %v1502_v28 }
 0x11c   : > { %v840_v34 = vadd.f32 %v839_v31, %v6525_v16  ;;  %v841_v35 = vpop.f32.mrb[5].mxu0  ;;  %v5824_v31 = vld [vmem:[%s7963_s3 + $0x150] ss:$8 sps:$4 sm:$0xff]  }
 0x11d   : > { %v842_v37 = vadd.f32 %v841_v35, %v6529_v17  ;;  %v843_v38 = vpop.f32.mrb[6].mxu0  ;;  %2313 = vmatprep.mubr.bf16.mxu0 %v1758_v32  ;;  %5125 = vmatmul.mubr.msk.bf16.gmra.mrb[108].mxu1 %vm698_vm0, %v6458_v6 }
 0x11e   : > { %v844_v39 = vadd.f32 %v843_v38, %v6525_v16  ;;  %v845_v40 = vpop.f32.mrb[7].mxu0  ;;  %2314 = vmatmul.mubr.bf16.vlgmr.msra.gmra.mrb[96].mxu0 %v1757_v30  ;;  %v1509_v43 = vmax.f32 %v840_v34, 0.0  ;;  %1380 = vmatprep.mubr.bf16.mxu1 %v6032_v0 }
 0x11f   : > { %v846_v41 = vadd.f32 %v845_v40, %v6529_v17  ;;  %2635 = vmatpush1.bf16.msra.mxu0 %v5803_v33  ;;  %v1510_v46 = vmax.f32 %v842_v37, 0.0 }
 0x120   : > { %v1513_v44 = vmax.f32 %v844_v39, 0.0  ;;  %2636 = vmatprep.subr.bf16.mxu0 %v5813_v36  ;;  %v5827_v39 = vld [vmem:[%s7963_s3 + $0x160] ss:$8 sps:$4 sm:$0xff]  }
 0x121   : > { %v1514_v47 = vmax.f32 %v846_v41, 0.0 }
 0x122   : > { %v1761_v48 = vpack.c.bf16 %v1513_v44, %v1509_v43 }
 0x123   : > { %v849_v49 = vpop.f32.mrb[8].mxu0  ;;  %v1762_v50 = vpack.c.bf16 %v1514_v47, %v1510_v46  ;;  %2637 = vmatpush1.bf16.msra.mxu0 %v5811_v42  ;;  %v5832_v42 = vld [vmem:[%s7963_s3 + $0x174] ss:$8 sps:$4 sm:$0xff]  }
 0x124   : > { %v850_v52 = vadd.f32 %v849_v49, %v6525_v16  ;;  %v851_v53 = vpop.f32.mrb[9].mxu0  ;;  %2638 = vmatprep.subr.bf16.mxu0 %v5817_v45 }
 0x125   : > { %v852_v55 = vadd.f32 %v851_v53, %v6529_v17  ;;  %v853_v56 = vpop.f32.mrb[10].mxu0  ;;  %2323 = vmatprep.mubr.bf16.mxu0 %v1762_v50  ;;  %5126 = vmatmul.mubr.msk.bf16.gmra.mrb[112].mxu1 %vm698_vm0, %v6467_v7 }
 0x126   : > { %v854_v57 = vadd.f32 %v853_v56, %v6525_v16  ;;  %v855_v58 = vpop.f32.mrb[11].mxu0  ;;  %2324 = vmatmul.mubr.bf16.gmra.mrb[100].mxu0 %v1761_v48  ;;  %v1517_v62 = vmax.f32 %v850_v52, 0.0  ;;  %v5830_v48 = vld [vmem:[%s7963_s3 + $0x170] ss:$8 sps:$4 sm:$0xff]   ;;  %v5833_v56 = vld [vmem:[%s7963_s3 + $0x180] ss:$8 sps:$4 sm:$0xff]   ;;  %1390 = vmatprep.mubr.bf16.mxu1 %v6032_v0 }
 0x127   : > { %v856_v59 = vadd.f32 %v855_v58, %v6529_v17  ;;  %2639 = vmatpush1.bf16.msra.mxu0 %v5815_v51  ;;  %v1518_v11 = vmax.f32 %v852_v55, 0.0 }
 0x128   : > { %v1521_v1 = vmax.f32 %v854_v57, 0.0  ;;  %2640 = vmatprep.subr.bf16.mxu0 %v5820_v54 }
 0x129   : > { %v1522_v18 = vmax.f32 %v856_v59, 0.0  ;;  %v5838_v59 = vld [vmem:[%s7963_s3 + $0x194] ss:$8 sps:$4 sm:$0xff]  }
 0x12a   : > { %v1765_v19 = vpack.c.bf16 %v1521_v1, %v1517_v62 }
 0x12b   : > { %v859_v20 = vpop.f32.mrb[12].mxu0  ;;  %v1766_v21 = vpack.c.bf16 %v1522_v18, %v1518_v11  ;;  %2641 = vmatpush1.bf16.msra.mxu0 %v5818_v60  ;;  %v5836_v18 = vld [vmem:[%s7963_s3 + $0x190] ss:$8 sps:$4 sm:$0xff]  }
 0x12c   : > { %v860_v23 = vadd.f32 %v859_v20, %v6525_v16  ;;  %v861_v24 = vpop.f32.mrb[13].mxu0  ;;  %2642 = vmatprep.subr.bf16.mxu0 %v5823_v61 }
 0x12d   : > { %v862_v26 = vadd.f32 %v861_v24, %v6529_v17  ;;  %v863_v27 = vpop.f32.mrb[14].mxu0  ;;  %2333 = vmatprep.mubr.bf16.mxu0 %v1766_v21  ;;  %5127 = vmatmul.mubr.msk.bf16.gmra.mrb[116].mxu1 %vm698_vm0, %v6476_v8 }
 0x12e   : > { %v864_v28 = vadd.f32 %v863_v27, %v6525_v16  ;;  %v865_v29 = vpop.f32.mrb[15].mxu0  ;;  %2334 = vmatmul.mubr.bf16.gmra.mrb[104].mxu0 %v1765_v19  ;;  %v1525_v32 = vmax.f32 %v860_v23, 0.0  ;;  %1400 = vmatprep.mubr.bf16.mxu1 %v6032_v0 }
 0x12f   : > { %v866_v30 = vadd.f32 %v865_v29, %v6529_v17  ;;  %2643 = vmatpush1.bf16.msra.mxu0 %v5821_v22  ;;  %v1526_v34 = vmax.f32 %v862_v26, 0.0  ;;  %v5839_v26 = vld [vmem:[%s7963_s3 + $0x1a0] ss:$8 sps:$4 sm:$0xff]  }
 0x130   : > { %v1529_v33 = vmax.f32 %v864_v28, 0.0  ;;  %2644 = vmatprep.subr.bf16.mxu0 %v5826_v25 }
 0x131   : > { %v1530_v35 = vmax.f32 %v866_v30, 0.0 }
 0x132   : > { %v1769_v36 = vpack.c.bf16 %v1529_v33, %v1525_v32 }
 0x133   : > { %v869_v37 = vpop.f32.mrb[16].mxu0  ;;  %v1770_v38 = vpack.c.bf16 %v1530_v35, %v1526_v34  ;;  %2645 = vmatpush1.bf16.msra.mxu0 %v5824_v31 }
 0x134   : > { %v870_v40 = vadd.f32 %v869_v37, %v6525_v16  ;;  %v871_v41 = vpop.f32.mrb[17].mxu0  ;;  %2646 = vmatprep.subr.bf16.mxu0 %v5829_v63 }
 0x135   : > { %v872_v43 = vadd.f32 %v871_v41, %v6529_v17  ;;  %v873_v44 = vpop.f32.mrb[18].mxu0  ;;  %2343 = vmatprep.mubr.bf16.mxu0 %v1770_v38  ;;  %5128 = vmatmul.mubr.msk.bf16.gmra.mrb[120].mxu1 %vm698_vm0, %v6485_v9 }
 0x136   : > { %v874_v45 = vadd.f32 %v873_v44, %v6525_v16  ;;  %v875_v46 = vpop.f32.mrb[19].mxu0  ;;  %2344 = vmatmul.mubr.bf16.gmra.mrb[108].mxu0 %v1769_v36  ;;  %v1533_v49 = vmax.f32 %v870_v40, 0.0  ;;  %1410 = vmatprep.mubr.bf16.mxu1 %v6032_v0 }
 0x137   : > { %v876_v47 = vadd.f32 %v875_v46, %v6529_v17  ;;  %2647 = vmatpush1.bf16.msra.mxu0 %v5827_v39  ;;  %v1534_v51 = vmax.f32 %v872_v43, 0.0 }
 0x138   : > { %v1537_v50 = vmax.f32 %v874_v45, 0.0  ;;  %2648 = vmatprep.subr.bf16.mxu0 %v5832_v42 }
 0x139   : > { %v1538_v52 = vmax.f32 %v876_v47, 0.0 }
 0x13a   : > { %v1773_v53 = vpack.c.bf16 %v1537_v50, %v1533_v49 }
 0x13b   : > { %v879_v54 = vpop.f32.mrb[20].mxu0  ;;  %v1774_v55 = vpack.c.bf16 %v1538_v52, %v1534_v51  ;;  %2649 = vmatpush1.bf16.msra.mxu0 %v5830_v48  ;;  %v1069_v48 = vpop.f32.mrb[0].mxu1  ;;  %v5842_v52 = vld [vmem:[%s7963_s3 + $0x1b0] ss:$8 sps:$4 sm:$0xff]  }
 0x13c   : > { %v880_v57 = vadd.f32 %v879_v54, %v6525_v16  ;;  %v881_v58 = vpop.f32.mrb[21].mxu0  ;;  %2650 = vmatprep.subr.bf16.mxu0 %v5835_v2  ;;  %v1071_v2 = vpop.f32.mrb[1].mxu1 }
 0x13d   : > { %v882_v60 = vadd.f32 %v881_v58, %v6529_v17  ;;  %v883_v62 = vpop.f32.mrb[22].mxu0  ;;  %2353 = vmatprep.mubr.bf16.mxu0 %v1774_v55  ;;  %5129 = vmatmul.mubr.msk.bf16.gmra.mrb[124].mxu1 %vm698_vm0, %v6494_v10  ;;  %v5856_v10 = vld [vmem:[%s7963_s3 + $0x1e4] ss:$8 sps:$4 sm:$0xff]  }
 0x13e   : > { %v884_v1 = vadd.f32 %v883_v62, %v6525_v16  ;;  %v885_v61 = vpop.f32.mrb[23].mxu0  ;;  %2354 = vmatmul.mubr.bf16.gmra.mrb[112].mxu0 %v1773_v53  ;;  %v1541_v19 = vmax.f32 %v880_v57, 0.0  ;;  %v1073_v53 = vpop.f32.mrb[2].mxu1  ;;  %v1072_v57 = vadd.f32 %v1071_v2, %v6529_v17  ;;  %1420 = vmatprep.mubr.bf16.mxu1 %v6032_v0 }
 0x13f   : > { %v886_v11 = vadd.f32 %v885_v61, %v6529_v17  ;;  %2651 = vmatpush1.bf16.msra.mxu0 %v5833_v56  ;;  %v1542_v21 = vmax.f32 %v882_v60, 0.0  ;;  %v1070_v56 = vadd.f32 %v1069_v48, %v6525_v16  ;;  %v1074_v58 = vadd.f32 %v1073_v53, %v6525_v16 }
 0x140   : > { %v1545_v20 = vmax.f32 %v884_v1, 0.0  ;;  %2652 = vmatprep.subr.bf16.mxu0 %v5838_v59  ;;  %v1075_v59 = vpop.f32.mrb[3].mxu1 }
 0x141   : > { %v1546_v22 = vmax.f32 %v886_v11, 0.0  ;;  %v1076_v1 = vadd.f32 %v1075_v59, %v6529_v17 }
 0x142   : > { %v1777_v23 = vpack.c.bf16 %v1545_v20, %v1541_v19  ;;  %v1694_v19 = vmax.f32 %v1072_v57, 0.0  ;;  %v1697_v20 = vmax.f32 %v1074_v58, 0.0 }
 0x143   : > { %v889_v24 = vpop.f32.mrb[24].mxu0  ;;  %v1778_v25 = vpack.c.bf16 %v1546_v22, %v1542_v21  ;;  %2653 = vmatpush1.bf16.msra.mxu0 %v5836_v18  ;;  %v1693_v18 = vmax.f32 %v1070_v56, 0.0 }
 0x144   : > { %v890_v27 = vadd.f32 %v889_v24, %v6525_v16  ;;  %v891_v28 = vpop.f32.mrb[25].mxu0  ;;  %2654 = vmatprep.subr.bf16.mxu0 %v5841_v3  ;;  %v1079_v3 = vpop.f32.mrb[4].mxu1 }
 0x145   : > { %v892_v29 = vadd.f32 %v891_v28, %v6529_v17  ;;  %v893_v30 = vpop.f32.mrb[26].mxu0  ;;  %2363 = vmatprep.mubr.bf16.mxu0 %v1778_v25  ;;  %v1080_v25 = vadd.f32 %v1079_v3, %v6525_v16  ;;  %v5847_v28 = vld [vmem:[%s7963_s3 + $0x1c4] ss:$8 sps:$4 sm:$0xff]  }
 0x146   : > { %v894_v31 = vadd.f32 %v893_v30, %v6525_v16  ;;  %v895_v32 = vpop.f32.mrb[27].mxu0  ;;  %2364 = vmatmul.mubr.bf16.gmra.mrb[116].mxu0 %v1777_v23  ;;  %v1549_v63 = vmax.f32 %v890_v27, 0.0  ;;  %v1698_v23 = vmax.f32 %v1076_v1, 0.0  ;;  %v5845_v27 = vld [vmem:[%s7963_s3 + $0x1c0] ss:$8 sps:$4 sm:$0xff]  }
 0x147   : > { %v896_v33 = vadd.f32 %v895_v32, %v6529_v17  ;;  %2655 = vmatpush1.bf16.msra.mxu0 %v5839_v26  ;;  %v1550_v35 = vmax.f32 %v892_v29, 0.0  ;;  %v1081_v26 = vpop.f32.mrb[5].mxu1  ;;  %v6674_v29 = vpack.c.bf16 %v1697_v20, %v1693_v18 }
 0x148   : > { %v1553_v34 = vmax.f32 %v894_v31, 0.0  ;;  %2656 = vmatprep.subr.bf16.mxu0 %v5844_v5  ;;  %v1082_v31 = vadd.f32 %v1081_v26, %v6529_v17  ;;  %v1083_v32 = vpop.f32.mrb[6].mxu1 }
 0x149   : > { %v1554_v36 = vmax.f32 %v896_v33, 0.0  ;;  %v6677_v33 = vpack.c.bf16 %v1698_v23, %v1694_v19 }
 0x14a   : > { %v1781_v37 = vpack.c.bf16 %v1553_v34, %v1549_v63 }
 0x14b   : > { %v899_v38 = vpop.f32.mrb[28].mxu0  ;;  %v1782_v39 = vpack.c.bf16 %v1554_v36, %v1550_v35  ;;  %2657 = vmatpush1.bf16.msra.mxu0 %v5842_v52  ;;  %v1084_v35 = vadd.f32 %v1083_v32, %v6525_v16  ;;  %v1085_v36 = vpop.f32.mrb[7].mxu1 }
 0x14c   : > { %v900_v40 = vadd.f32 %v899_v38, %v6525_v16  ;;  %v901_v41 = vpop.f32.mrb[29].mxu0  ;;  %2658 = vmatprep.subr.bf16.mxu0 %v5847_v28  ;;  %v1702_v38 = vmax.f32 %v1082_v31, 0.0 }
 0x14d   : > { %v902_v4 = vadd.f32 %v901_v41, %v6529_v17  ;;  %v903_v42 = vpop.f32.mrb[30].mxu0  ;;  %2373 = vmatprep.mubr.bf16.mxu0 %v1782_v39  ;;  %v1086_v39 = vadd.f32 %v1085_v36, %v6529_v17 }
 0x14e   : > { %v904_v43 = vadd.f32 %v903_v42, %v6525_v16  ;;  %v905_v44 = vpop.f32.mrb[31].mxu0  ;;  %2374 = vmatmul.mubr.bf16.gmra.mrb[120].mxu0 %v1781_v37  ;;  %v1557_v46 = vmax.f32 %v900_v40, 0.0  ;;  %v1705_v42 = vmax.f32 %v1084_v35, 0.0 }
 0x14f   : > { %v906_v45 = vadd.f32 %v905_v44, %v6529_v17  ;;  %v1558_v49 = vmax.f32 %v902_v4, 0.0  ;;  %2659 = vmatpush1.bf16.msra.mxu0 %v5845_v27  ;;  %v1701_v4 = vmax.f32 %v1080_v25, 0.0 }
 0x150   : > { %v1561_v47 = vmax.f32 %v904_v43, 0.0 }
 0x151   : > { %v1562_v50 = vmax.f32 %v906_v45, 0.0  ;;  %v1706_v45 = vmax.f32 %v1086_v39, 0.0  ;;  %v6691_v53 = vpack.c.bf16 %v1705_v42, %v1701_v4 }
 0x152   : > { %v1785_v51 = vpack.c.bf16 %v1561_v47, %v1557_v46 }
 0x153   : > { %v909_v54 = vpop.f32.mrb[32].mxu0  ;;  %v1786_v55 = vpack.c.bf16 %v1562_v50, %v1558_v49  ;;  %v1089_v50 = vpop.f32.mrb[8].mxu1  ;;  %v6686_v2 = vpack.c.bf16 %v1706_v45, %v1702_v38 }
 0x154   : > { %v910_v60 = vadd.f32 %v909_v54, %v6525_v16  ;;  %v911_v62 = vpop.f32.mrb[33].mxu0  ;;  %v1090_v52 = vadd.f32 %v1089_v50, %v6525_v16  ;;  %v1091_v5 = vpop.f32.mrb[9].mxu1 }
 0x155   : > { %v912_v61 = vadd.f32 %v911_v62, %v6529_v17  ;;  %v913_v11 = vpop.f32.mrb[34].mxu0  ;;  %2383 = vmatprep.mubr.bf16.mxu0 %v1786_v55  ;;  %v1092_v56 = vadd.f32 %v1091_v5, %v6529_v17  ;;  %v1093_v57 = vpop.f32.mrb[10].mxu1 }
 0x156   : > { %v914_v21 = vadd.f32 %v913_v11, %v6525_v16  ;;  %v915_v22 = vpop.f32.mrb[35].mxu0  ;;  %2384 = vmatmul.mubr.bf16.gmra.mrb[124].mxu0 %v1785_v51  ;;  %v1565_v30 = vmax.f32 %v910_v60, 0.0  ;;  %v1094_v7 = vadd.f32 %v1093_v57, %v6525_v16  ;;  %v1095_v60 = vpop.f32.mrb[11].mxu1  ;;  %v1709_v19 = vmax.f32 %v1090_v52, 0.0 }
 0x157   : > { %v916_v24 = vadd.f32 %v915_v22, %v6529_v17  ;;  %v1566_v63 = vmax.f32 %v912_v61, 0.0  ;;  %v1710_v1 = vmax.f32 %v1092_v56, 0.0  ;;  %v1096_v61 = vadd.f32 %v1095_v60, %v6529_v17 }
 0x158   : > { %v1569_v6 = vmax.f32 %v914_v21, 0.0  ;;  %v1713_v20 = vmax.f32 %v1094_v7, 0.0 }
 0x159   : > { %v1570_v34 = vmax.f32 %v916_v24, 0.0  ;;  %v1714_v23 = vmax.f32 %v1096_v61, 0.0 }
 0x15a   : > { %v1789_v37 = vpack.c.bf16 %v1569_v6, %v1565_v30  ;;  %v5848_v30 = vld [vmem:[%s7963_s3 + $0x1d0] ss:$8 sps:$4 sm:$0xff]   ;;  %v5850_v6 = vld [vmem:[%s7963_s3 + $0x1d4] ss:$8 sps:$4 sm:$0xff]   ;;  %v6711_v31 = vpack.c.bf16 %v1713_v20, %v1709_v19 }
 0x15b   : > { %v1790_v40 = vpack.c.bf16 %v1570_v34, %v1566_v63  ;;  %v919_v41 = vpop.f32.mrb[36].mxu0  ;;  %v6701_v27 = vpack.c.bf16 %v1714_v23, %v1710_v1  ;;  %v1099_v34 = vpop.f32.mrb[12].mxu1  ;;  %2660 = vmatprep.subr.bf16.mxu0 %v5850_v6 }
 0x15c   : > { %v920_v43 = vadd.f32 %v919_v41, %v6525_v16  ;;  %v921_v44 = vpop.f32.mrb[37].mxu0  ;;  %v1100_v36 = vadd.f32 %v1099_v34, %v6525_v16  ;;  %2661 = vmatpush1.bf16.msra.mxu0 %v5848_v30 }
 0x15d   : > { %v922_v46 = vadd.f32 %v921_v44, %v6529_v17  ;;  %v923_v47 = vpop.f32.mrb[38].mxu0  ;;  %2393 = vmatprep.mubr.bf16.mxu0 %v1790_v40  ;;  %2662 = vmatprep.subr.bf16.mxu0 %v5856_v10 }
 0x15e   : > { %v924_v48 = vadd.f32 %v923_v47, %v6525_v16  ;;  %v925_v49 = vpop.f32.mrb[39].mxu0  ;;  %2394 = vmatmul.mubr.bf16.gmra.mrb[128].mxu0 %v1789_v37  ;;  %v1573_v54 = vmax.f32 %v920_v43, 0.0  ;;  %v1101_v37 = vpop.f32.mrb[13].mxu1  ;;  %v1717_v42 = vmax.f32 %v1100_v36, 0.0  ;;  %v5851_v36 = vld [vmem:[#allocation2] ss:$8 sps:$4 sm:$0xff]  }
 0x15f   : > { %v926_v51 = vadd.f32 %v925_v49, %v6529_v17  ;;  %v1574_v58 = vmax.f32 %v922_v46, 0.0  ;;  %v1102_v39 = vadd.f32 %v1101_v37, %v6529_v17  ;;  %v1103_v40 = vpop.f32.mrb[14].mxu1  ;;  %v5853_v37 = vld [vmem:[#allocation2 + $0x4] ss:$8 sps:$4 sm:$0xff]  }
 0x160   : > { %v1577_v55 = vmax.f32 %v924_v48, 0.0  ;;  %v1104_v43 = vadd.f32 %v1103_v40, %v6525_v16  ;;  %v1105_v44 = vpop.f32.mrb[15].mxu1  ;;  %3383 = vmatprep.subr.bf16.mxu1 %v5853_v37 }
 0x161   : > { %v1578_v59 = vmax.f32 %v926_v51, 0.0  ;;  %v1718_v47 = vmax.f32 %v1102_v39, 0.0  ;;  %v1106_v48 = vadd.f32 %v1105_v44, %v6529_v17  ;;  %3384 = vmatpush1.bf16.msra.mxu1 %v5851_v36 }
 0x162   : > { %v1793_v62 = vpack.c.bf16 %v1577_v55, %v1573_v54  ;;  %v1721_v51 = vmax.f32 %v1104_v43, 0.0 }
 0x163   : > { %v1794_v11 = vpack.c.bf16 %v1578_v59, %v1574_v58  ;;  %v929_v18 = vpop.f32.mrb[40].mxu0  ;;  %v1722_v54 = vmax.f32 %v1106_v48, 0.0  ;;  %v1109_v59 = vpop.f32.mrb[16].mxu1 }
 0x164   : > { %v930_v21 = vadd.f32 %v929_v18, %v6525_v16  ;;  %v931_v22 = vpop.f32.mrb[41].mxu0  ;;  %v6724_v56 = vpack.c.bf16 %v1721_v51, %v1717_v42  ;;  %v1110_v1 = vadd.f32 %v1109_v59, %v6525_v16  ;;  %v1111_v61 = vpop.f32.mrb[17].mxu1 }
 0x165   : > { %v932_v3 = vadd.f32 %v931_v22, %v6529_v17  ;;  %v933_v24 = vpop.f32.mrb[42].mxu0  ;;  %2403 = vmatprep.mubr.bf16.mxu0 %v1794_v11  ;;  %v6726_v7 = vpack.c.bf16 %v1722_v54, %v1718_v47  ;;  %v1112_v18 = vadd.f32 %v1111_v61, %v6529_v17  ;;  %v1113_v9 = vpop.f32.mrb[18].mxu1 }
 0x166   : > { %v934_v25 = vadd.f32 %v933_v24, %v6525_v16  ;;  %v935_v26 = vpop.f32.mrb[43].mxu0  ;;  %2404 = vmatmul.mubr.bf16.gmra.mrb[132].mxu0 %v1793_v62  ;;  %v1581_v32 = vmax.f32 %v930_v21, 0.0  ;;  %v1725_v21 = vmax.f32 %v1110_v1, 0.0  ;;  %v1114_v22 = vadd.f32 %v1113_v9, %v6525_v16  ;;  %v1115_v23 = vpop.f32.mrb[19].mxu1 }
 0x167   : > { %v936_v28 = vadd.f32 %v935_v26, %v6529_v17  ;;  %v1582_v8 = vmax.f32 %v932_v3, 0.0  ;;  %v1116_v26 = vadd.f32 %v1115_v23, %v6529_v17  ;;  %v1119_v40 = vpop.f32.mrb[20].mxu1 }
 0x168   : > { %v1585_v63 = vmax.f32 %v934_v25, 0.0  ;;  %v1726_v25 = vmax.f32 %v1112_v18, 0.0  ;;  %v1729_v6 = vmax.f32 %v1114_v22, 0.0  ;;  %v1120_v44 = vadd.f32 %v1119_v40, %v6525_v16  ;;  %v5925_v18 = vld [vmem:[%s6191_s15 + $0xc0] sm:$0xff]  }
 0x169   : > { %v1586_v35 = vmax.f32 %v936_v28, 0.0  ;;  %v1730_v34 = vmax.f32 %v1116_v26, 0.0  ;;  %5130 = vmatmul.mubr.msk.bf16.gmra.mrb[128].mxu1 %vm698_vm0, %v5925_v18 }
 0x16a   : > { %v1797_v38 = vpack.c.bf16 %v1585_v63, %v1581_v32  ;;  %v1733_v51 = vmax.f32 %v1120_v44, 0.0  ;;  %1430 = vmatprep.mubr.bf16.mxu1 %v6032_v0 }
 0x16b   : > { %v1798_v41 = vpack.c.bf16 %v1586_v35, %v1582_v8  ;;  %v939_v4 = vpop.f32.mrb[44].mxu0 }
 0x16c   : > { %v940_v45 = vadd.f32 %v939_v4, %v6525_v16  ;;  %v941_v46 = vpop.f32.mrb[45].mxu0  ;;  %v5854_v4 = vld [vmem:[%s7963_s3 + $0x1e0] ss:$8 sps:$4 sm:$0xff]  }
 0x16d   : > { %v942_v49 = vadd.f32 %v941_v46, %v6529_v17  ;;  %v943_v50 = vpop.f32.mrb[46].mxu0  ;;  %2413 = vmatprep.mubr.bf16.mxu0 %v1798_v41  ;;  %v6741_v41 = vpack.c.bf16 %v1730_v34, %v1726_v25  ;;  %2663 = vmatpush1.bf16.msra.mxu0 %v5854_v4 }
 0x16e   : > { %v944_v52 = vadd.f32 %v943_v50, %v6525_v16  ;;  %v945_v5 = vpop.f32.mrb[47].mxu0  ;;  %2414 = vmatmul.mubr.bf16.gmra.mrb[136].mxu0 %v1797_v38  ;;  %v1589_v57 = vmax.f32 %v940_v45, 0.0  ;;  %v6739_v38 = vpack.c.bf16 %v1729_v6, %v1725_v21  ;;  %v1121_v45 = vpop.f32.mrb[21].mxu1 }
 0x16f   : > { %v946_v55 = vadd.f32 %v945_v5, %v6529_v17  ;;  %v1590_v60 = vmax.f32 %v942_v49, 0.0  ;;  %v1122_v47 = vadd.f32 %v1121_v45, %v6529_v17  ;;  %v1123_v48 = vpop.f32.mrb[22].mxu1 }
 0x170   : > { %v1593_v58 = vmax.f32 %v944_v52, 0.0  ;;  %v1124_v52 = vadd.f32 %v1123_v48, %v6525_v16  ;;  %v1125_v5 = vpop.f32.mrb[23].mxu1 }
 0x171   : > { %v1594_v62 = vmax.f32 %v946_v55, 0.0  ;;  %v1129_v22 = vpop.f32.mrb[24].mxu1 }
 0x172   : > { %v1801_v11 = vpack.c.bf16 %v1593_v58, %v1589_v57  ;;  %v1734_v57 = vmax.f32 %v1122_v47, 0.0  ;;  %v1126_v58 = vadd.f32 %v1125_v5, %v6529_v17  ;;  %v1130_v25 = vadd.f32 %v1129_v22, %v6525_v16  ;;  %v1131_v26 = vpop.f32.mrb[25].mxu1 }
 0x173   : > { %v1802_v19 = vpack.c.bf16 %v1594_v62, %v1590_v60  ;;  %v949_v20 = vpop.f32.mrb[48].mxu0  ;;  %v1737_v62 = vmax.f32 %v1124_v52, 0.0  ;;  %v1133_v6 = vpop.f32.mrb[26].mxu1 }
 0x174   : > { %v950_v3 = vadd.f32 %v949_v20, %v6525_v16  ;;  %v951_v24 = vpop.f32.mrb[49].mxu0  ;;  %v1741_v34 = vmax.f32 %v1130_v25, 0.0 }
 0x175   : > { %v952_v28 = vadd.f32 %v951_v24, %v6529_v17  ;;  %v953_v30 = vpop.f32.mrb[50].mxu0  ;;  %2423 = vmatprep.mubr.bf16.mxu0 %v1802_v19  ;;  %v6760_v19 = vpack.c.bf16 %v1737_v62, %v1733_v51 }
 0x176   : > { %v954_v32 = vadd.f32 %v953_v30, %v6525_v16  ;;  %v955_v63 = vpop.f32.mrb[51].mxu0  ;;  %2424 = vmatmul.mubr.bf16.gmra.mrb[140].mxu0 %v1801_v11  ;;  %v1597_v8 = vmax.f32 %v950_v3, 0.0  ;;  %v1738_v11 = vmax.f32 %v1126_v58, 0.0  ;;  %v1132_v30 = vadd.f32 %v1131_v26, %v6529_v17 }
 0x177   : > { %v956_v35 = vadd.f32 %v955_v63, %v6529_v17  ;;  %v1598_v42 = vmax.f32 %v952_v28, 0.0 }
 0x178   : > { %v1601_v39 = vmax.f32 %v954_v32, 0.0  ;;  %v6762_v23 = vpack.c.bf16 %v1738_v11, %v1734_v57  ;;  %v5862_v57 = vld [vmem:[%s7963_s3 + $0x1f4] ss:$8 sps:$4 sm:$0xff]  }
 0x179   : > { %v1602_v43 = vmax.f32 %v956_v35, 0.0  ;;  %v1135_v35 = vpop.f32.mrb[27].mxu1  ;;  %2664 = vmatprep.subr.bf16.mxu0 %v5862_v57 }
 0x17a   : > { %v1805_v46 = vpack.c.bf16 %v1601_v39, %v1597_v8  ;;  %v1134_v8 = vadd.f32 %v1133_v6, %v6525_v16  ;;  %v1742_v39 = vmax.f32 %v1132_v30, 0.0  ;;  %v1136_v40 = vadd.f32 %v1135_v35, %v6529_v17  ;;  %v1139_v5 = vpop.f32.mrb[28].mxu1 }
 0x17b   : > { %v1806_v49 = vpack.c.bf16 %v1602_v43, %v1598_v42  ;;  %v959_v50 = vpop.f32.mrb[52].mxu0  ;;  %v1141_v62 = vpop.f32.mrb[29].mxu1  ;;  %v488_v35 = vsub.s32 2, %v6507_v12 }
 0x17c   : > { %v960_v54 = vadd.f32 %v959_v50, %v6525_v16  ;;  %v961_v55 = vpop.f32.mrb[53].mxu0  ;;  %v1745_v42 = vmax.f32 %v1134_v8, 0.0  ;;  %v1746_v45 = vmax.f32 %v1136_v40, 0.0  ;;  %v5859_v50 = vld [vmem:[#allocation2 + $0x14] ss:$8 sps:$4 sm:$0xff]   ;;  %v1143_v11 = vpop.f32.mrb[30].mxu1 }
 0x17d   : > { %v962_v59 = vadd.f32 %v961_v55, %v6529_v17  ;;  %v963_v60 = vpop.f32.mrb[54].mxu0  ;;  %2433 = vmatprep.mubr.bf16.mxu0 %v1806_v49  ;;  %v5857_v49 = vld [vmem:[#allocation2 + $0x10] ss:$8 sps:$4 sm:$0xff]   ;;  %3385 = vmatprep.subr.bf16.mxu1 %v5859_v50  ;;  %v1145_v22 = vpop.f32.mrb[31].mxu1 }
 0x17e   : > { %v964_v1 = vadd.f32 %v963_v60, %v6525_v16  ;;  %v965_v61 = vpop.f32.mrb[55].mxu0  ;;  %2434 = vmatmul.mubr.bf16.gmra.mrb[144].mxu0 %v1805_v46  ;;  %v1605_v20 = vmax.f32 %v960_v54, 0.0  ;;  %v5926_v46 = vld [vmem:[%s6191_s15 + $0xc8] sm:$0xff]   ;;  %v6775_v51 = vpack.c.bf16 %v1745_v42, %v1741_v34  ;;  %v6777_v54 = vpack.c.bf16 %v1746_v45, %v1742_v39  ;;  %v5860_v55 = vld [vmem:[%s7963_s3 + $0x1f0] ss:$8 sps:$4 sm:$0xff]   ;;  %3386 = vmatpush1.bf16.msra.mxu1 %v5857_v49  ;;  %v1182_v42 = vpop.f32.mrb[32].mxu1 }
 0x17f   : > { %v966_v9 = vadd.f32 %v965_v61, %v6529_v17  ;;  %v1606_v3 = vmax.f32 %v962_v59, 0.0  ;;  %5131 = vmatmul.mubr.msk.bf16.gmra.mrb[132].mxu1 %vm698_vm0, %v5926_v46  ;;  %v1140_v60 = vadd.f32 %v1139_v5, %v6525_v16  ;;  %v1142_v61 = vadd.f32 %v1141_v62, %v6529_v17  ;;  %2665 = vmatpush1.bf16.msra.mxu0 %v5860_v55  ;;  %v5927_v8 = vld [vmem:[%s6191_s15 + $0xd0] sm:$0xff]  }
 0x180   : > { %v1609_v21 = vmax.f32 %v964_v1, 0.0  ;;  %1440 = vmatprep.mubr.bf16.mxu1 %v6032_v0  ;;  %v1146_v26 = vadd.f32 %v1145_v22, %v6529_v17 }
 0x181   : > { %v1610_v24 = vmax.f32 %v966_v9, 0.0  ;;  %v1750_v25 = vmax.f32 %v1142_v61, 0.0 }
 0x182   : > { %v1809_v28 = vpack.c.bf16 %v1609_v21, %v1605_v20  ;;  %v1749_v20 = vmax.f32 %v1140_v60, 0.0  ;;  %v1144_v21 = vadd.f32 %v1143_v11, %v6525_v16  ;;  %v1754_v34 = vmax.f32 %v1146_v26, 0.0 }
 0x183   : > { %v1810_v32 = vpack.c.bf16 %v1610_v24, %v1606_v3  ;;  %v969_v63 = vpop.f32.mrb[56].mxu0 }
 0x184   : > { %v970_v36 = vadd.f32 %v969_v63, %v6525_v16  ;;  %v971_v37 = vpop.f32.mrb[57].mxu0  ;;  %v1753_v6 = vmax.f32 %v1144_v21, 0.0  ;;  %v5928_v21 = vld [vmem:[%s6191_s15 + $0xd8] sm:$0xff]  }
 0x185   : > { %v972_v4 = vadd.f32 %v971_v37, %v6529_v17  ;;  %v973_v10 = vpop.f32.mrb[58].mxu0  ;;  %2443 = vmatprep.mubr.bf16.mxu0 %v1810_v32  ;;  %v492_v37 = vsub.s32 3, %v6507_v12 }
 0x186   : > { %v974_v43 = vadd.f32 %v973_v10, %v6525_v16  ;;  %v975_v44 = vpop.f32.mrb[59].mxu0  ;;  %2444 = vmatmul.mubr.bf16.gmra.mrb[148].mxu0 %v1809_v28  ;;  %v1613_v47 = vmax.f32 %v970_v36, 0.0  ;;  %v6798_v39 = vpack.c.bf16 %v1753_v6, %v1749_v20  ;;  %v6801_v10 = vrot.slane %v6515_v14, %v488_v35 }
 0x187   : > { %v976_v48 = vadd.f32 %v975_v44, %v6529_v17  ;;  %v1614_v58 = vmax.f32 %v972_v4, 0.0  ;;  %5132 = vmatmul.mubr.msk.bf16.gmra.mrb[136].mxu1 %vm698_vm0, %v5927_v8  ;;  %v6806_v46 = vrot.slane %v6515_v14, %v492_v37 }
 0x188   : > { %v1617_v52 = vmax.f32 %v974_v43, 0.0  ;;  %1450 = vmatprep.mubr.bf16.mxu1 %v6032_v0  ;;  %v6803_v43 = vpack.c.bf16 %v1754_v34, %v1750_v25  ;;  %v1183_v12 = vadd.f32 %v1182_v42, %v6801_v10  ;;  %v5865_v25 = vld [vmem:[#allocation2 + $0x24] ss:$8 sps:$4 sm:$0xff]  }
 0x189   : > { %v1618_v59 = vmax.f32 %v976_v48, 0.0  ;;  %3387 = vmatprep.subr.bf16.mxu1 %v5865_v25 }
 0x18a   : > { %v1813_v1 = vpack.c.bf16 %v1617_v52, %v1613_v47  ;;  %v1184_v47 = vpop.f32.mrb[33].mxu1  ;;  %v1503_v60 = vmax.f32 %v1183_v12, 0.0 }
 0x18b   : > { %v1814_v18 = vpack.c.bf16 %v1618_v59, %v1614_v58  ;;  %v979_v9 = vpop.f32.mrb[60].mxu0  ;;  %v1186_v49 = vpop.f32.mrb[34].mxu1  ;;  %v1185_v5 = vadd.f32 %v1184_v47, %v6806_v46 }
 0x18c   : > { %v980_v3 = vadd.f32 %v979_v9, %v6525_v16  ;;  %v981_v24 = vpop.f32.mrb[61].mxu0  ;;  %v1187_v55 = vadd.f32 %v1186_v49, %v6801_v10  ;;  %v1188_v57 = vpop.f32.mrb[35].mxu1 }
 0x18d   : > { %v982_v28 = vadd.f32 %v981_v24, %v6529_v17  ;;  %v983_v30 = vpop.f32.mrb[62].mxu0  ;;  %2453 = vmatprep.mubr.bf16.mxu0 %v1814_v18  ;;  %v1189_v14 = vadd.f32 %v1188_v57, %v6806_v46  ;;  %v1504_v61 = vmax.f32 %v1185_v5, 0.0  ;;  %v5863_v24 = vld [vmem:[#allocation2 + $0x20] ss:$8 sps:$4 sm:$0xff]  }
 0x18e   : > { %v984_v32 = vadd.f32 %v983_v30, %v6525_v16  ;;  %v985_v63 = vpop.f32.mrb[63].mxu0  ;;  %2454 = vmatmul.mubr.bf16.gmra.mrb[152].mxu0 %v1813_v1  ;;  %v1621_v40 = vmax.f32 %v980_v3, 0.0  ;;  %v1507_v11 = vmax.f32 %v1187_v55, 0.0  ;;  %v1192_v30 = vpop.f32.mrb[36].mxu1  ;;  %3388 = vmatpush1.bf16.msra.mxu1 %v5863_v24 }
 0x18f   : > { %v986_v36 = vadd.f32 %v985_v63, %v6529_v17  ;;  %v1622_v44 = vmax.f32 %v982_v28, 0.0  ;;  %v1508_v20 = vmax.f32 %v1189_v14, 0.0  ;;  %5133 = vmatmul.mubr.msk.bf16.gmra.mrb[140].mxu1 %vm698_vm0, %v5928_v21  ;;  %v1193_v34 = vadd.f32 %v1192_v30, %v6801_v10  ;;  %v1194_v8 = vpop.f32.mrb[37].mxu1 }
 0x190   : > { %v1625_v4 = vmax.f32 %v984_v32, 0.0  ;;  %v6818_v3 = vpack.c.bf16 %v1507_v11, %v1503_v60  ;;  %1460 = vmatprep.mubr.bf16.mxu1 %v6032_v0  ;;  %v1196_v37 = vpop.f32.mrb[38].mxu1 }
 0x191   : > { %v1626_v45 = vmax.f32 %v986_v36, 0.0  ;;  %v6821_v6 = vpack.c.bf16 %v1508_v20, %v1504_v61  ;;  %v1195_v36 = vadd.f32 %v1194_v8, %v6806_v46  ;;  %v1511_v42 = vmax.f32 %v1193_v34, 0.0 }
 0x192   : > { %v1817_v48 = vpack.c.bf16 %v1625_v4, %v1621_v40 }
 0x193   : > { %v1818_v50 = vpack.c.bf16 %v1626_v45, %v1622_v44  ;;  %v989_v52 = vpop.f32.mrb[64].mxu0  ;;  %v1197_v44 = vadd.f32 %v1196_v37, %v6801_v10  ;;  %v1198_v45 = vpop.f32.mrb[39].mxu1  ;;  %v1512_v12 = vmax.f32 %v1195_v36, 0.0 }
 0x194   : > { %v990_v58 = vadd.f32 %v989_v52, %v6525_v16  ;;  %v991_v59 = vpop.f32.mrb[65].mxu0  ;;  %v1199_v49 = vadd.f32 %v1198_v45, %v6806_v46  ;;  %v1202_v61 = vpop.f32.mrb[40].mxu1 }
 0x195   : > { %v992_v62 = vadd.f32 %v991_v59, %v6529_v17  ;;  %v993_v1 = vpop.f32.mrb[66].mxu0  ;;  %2463 = vmatprep.mubr.bf16.mxu0 %v1818_v50  ;;  %v1515_v5 = vmax.f32 %v1197_v44, 0.0  ;;  %v5929_v59 = vld [vmem:[%s6191_s15 + $0xe0] sm:$0xff]   ;;  %v1203_v20 = vadd.f32 %v1202_v61, %v6801_v10  ;;  %v1204_v21 = vpop.f32.mrb[41].mxu1 }
 0x196   : > { %v994_v18 = vadd.f32 %v993_v1, %v6525_v16  ;;  %v995_v9 = vpop.f32.mrb[67].mxu0  ;;  %2464 = vmatmul.mubr.bf16.gmra.mrb[156].mxu0 %v1817_v48  ;;  %v1629_v26 = vmax.f32 %v990_v58, 0.0  ;;  %v1516_v58 = vmax.f32 %v1199_v49, 0.0  ;;  %v1205_v24 = vadd.f32 %v1204_v21, %v6806_v46  ;;  %v1206_v25 = vpop.f32.mrb[42].mxu1  ;;  %v5868_v49 = vld [vmem:[#allocation2 + $0x34] ss:$8 sps:$4 sm:$0xff]  }
 0x197   : > { %v996_v22 = vadd.f32 %v995_v9, %v6529_v17  ;;  %v1630_v32 = vmax.f32 %v992_v62, 0.0  ;;  %5134 = vmatmul.mubr.msk.bf16.gmra.mrb[144].mxu1 %vm698_vm0, %v5929_v59  ;;  %v6834_v14 = vpack.c.bf16 %v1515_v5, %v1511_v42  ;;  %v1519_v30 = vmax.f32 %v1203_v20, 0.0  ;;  %3389 = vmatprep.subr.bf16.mxu1 %v5868_v49 }
 0x198   : > { %v1633_v28 = vmax.f32 %v994_v18, 0.0  ;;  %1470 = vmatprep.mubr.bf16.mxu1 %v6032_v0  ;;  %v6836_v11 = vpack.c.bf16 %v1516_v58, %v1512_v12  ;;  %v5866_v12 = vld [vmem:[#allocation2 + $0x30] ss:$8 sps:$4 sm:$0xff]  }
 0x199   : > { %v1634_v63 = vmax.f32 %v996_v22, 0.0  ;;  %3390 = vmatpush1.bf16.msra.mxu1 %v5866_v12 }
 0x19a   : > { %v1821_v35 = vpack.c.bf16 %v1633_v28, %v1629_v26 }
 0x19b   : > { %v1822_v40 = vpack.c.bf16 %v1634_v63, %v1630_v32  ;;  %v999_v4 = vpop.f32.mrb[68].mxu0  ;;  %v1207_v32 = vadd.f32 %v1206_v25, %v6801_v10  ;;  %v1208_v63 = vpop.f32.mrb[43].mxu1 }
 0x19c   : > { %v1000_v47 = vadd.f32 %v999_v4, %v6525_v16  ;;  %v1001_v48 = vpop.f32.mrb[69].mxu0  ;;  %v1209_v36 = vadd.f32 %v1208_v63, %v6806_v46 }
 0x19d   : > { %v1002_v50 = vadd.f32 %v1001_v48, %v6529_v17  ;;  %v1003_v52 = vpop.f32.mrb[70].mxu0  ;;  %2473 = vmatprep.mubr.bf16.mxu0 %v1822_v40  ;;  %v1523_v4 = vmax.f32 %v1207_v32, 0.0 }
 0x19e   : > { %v1004_v55 = vadd.f32 %v1003_v52, %v6525_v16  ;;  %v1005_v57 = vpop.f32.mrb[71].mxu0  ;;  %2474 = vmatmul.mubr.bf16.gmra.mrb[160].mxu0 %v1821_v35  ;;  %v1637_v62 = vmax.f32 %v1000_v47, 0.0  ;;  %v1520_v35 = vmax.f32 %v1205_v24, 0.0  ;;  %v1524_v45 = vmax.f32 %v1209_v36, 0.0  ;;  %v5930_v47 = vld [vmem:[%s6191_s15 + $0xe8] sm:$0xff]  }
 0x19f   : > { %v1006_v60 = vadd.f32 %v1005_v57, %v6529_v17  ;;  %v1638_v18 = vmax.f32 %v1002_v50, 0.0  ;;  %5135 = vmatmul.mubr.msk.bf16.gmra.mrb[148].mxu1 %vm698_vm0, %v5930_v47  ;;  %v6849_v50 = vpack.c.bf16 %v1523_v4, %v1519_v30 }
 0x1a0   : > { %v1641_v1 = vmax.f32 %v1004_v55, 0.0  ;;  %1480 = vmatprep.mubr.bf16.mxu1 %v6032_v0  ;;  %v1212_v55 = vpop.f32.mrb[44].mxu1  ;;  %v6851_v57 = vpack.c.bf16 %v1524_v45, %v1520_v35 }
 0x1a1   : > { %v1642_v9 = vmax.f32 %v1006_v60, 0.0  ;;  %v1213_v60 = vadd.f32 %v1212_v55, %v6801_v10 }
 0x1a2   : > { %v1825_v22 = vpack.c.bf16 %v1641_v1, %v1637_v62  ;;  %v1214_v62 = vpop.f32.mrb[45].mxu1 }
 0x1a3   : > { %v1826_v26 = vpack.c.bf16 %v1642_v9, %v1638_v18  ;;  %v1009_v28 = vpop.f32.mrb[72].mxu0  ;;  %v1215_v61 = vadd.f32 %v1214_v62, %v6806_v46  ;;  %v1216_v18 = vpop.f32.mrb[46].mxu1  ;;  %v1527_v21 = vmax.f32 %v1213_v60, 0.0 }
 0x1a4   : > { %v1010_v34 = vadd.f32 %v1009_v28, %v6525_v16  ;;  %v1011_v8 = vpop.f32.mrb[73].mxu0  ;;  %v1218_v24 = vpop.f32.mrb[47].mxu1 }
 0x1a5   : > { %v1012_v37 = vadd.f32 %v1011_v8, %v6529_v17  ;;  %v1013_v40 = vpop.f32.mrb[74].mxu0  ;;  %2483 = vmatprep.mubr.bf16.mxu0 %v1826_v26  ;;  %v1528_v28 = vmax.f32 %v1215_v61, 0.0  ;;  %v1219_v30 = vadd.f32 %v1218_v24, %v6806_v46  ;;  %v1222_v45 = vpop.f32.mrb[48].mxu1 }
 0x1a6   : > { %v1014_v42 = vadd.f32 %v1013_v40, %v6525_v16  ;;  %v1015_v44 = vpop.f32.mrb[75].mxu0  ;;  %2484 = vmatmul.mubr.bf16.gmra.mrb[164].mxu0 %v1825_v22  ;;  %v1645_v52 = vmax.f32 %v1010_v34, 0.0  ;;  %v1217_v22 = vadd.f32 %v1216_v18, %v6801_v10  ;;  %v1223_v49 = vadd.f32 %v1222_v45, %v6801_v10 }
 0x1a7   : > { %v1016_v48 = vadd.f32 %v1015_v44, %v6529_v17  ;;  %v1646_v58 = vmax.f32 %v1012_v37, 0.0  ;;  %v1532_v36 = vmax.f32 %v1219_v30, 0.0  ;;  %v5931_v37 = vld [vmem:[%s6191_s15 + $0xf0] sm:$0xff]  }
 0x1a8   : > { %v1649_v5 = vmax.f32 %v1014_v42, 0.0  ;;  %v1531_v34 = vmax.f32 %v1217_v22, 0.0  ;;  %5136 = vmatmul.mubr.msk.bf16.gmra.mrb[152].mxu1 %vm698_vm0, %v5931_v37  ;;  %v1535_v62 = vmax.f32 %v1223_v49, 0.0 }
 0x1a9   : > { %v1650_v59 = vmax.f32 %v1016_v48, 0.0  ;;  %1490 = vmatprep.mubr.bf16.mxu1 %v6032_v0  ;;  %v6866_v47 = vpack.c.bf16 %v1532_v36, %v1528_v28 }
 0x1aa   : > { %v1829_v1 = vpack.c.bf16 %v1649_v5, %v1645_v52  ;;  %v6864_v4 = vpack.c.bf16 %v1531_v34, %v1527_v21  ;;  %v1224_v52 = vpop.f32.mrb[49].mxu1  ;;  %v5869_v34 = vld [vmem:[#allocation2 + $0x40] ss:$8 sps:$4 sm:$0xff]  }
 0x1ab   : > { %v1830_v9 = vpack.c.bf16 %v1650_v59, %v1646_v58  ;;  %v1019_v20 = vpop.f32.mrb[76].mxu0  ;;  %v1225_v55 = vadd.f32 %v1224_v52, %v6806_v46  ;;  %v1226_v58 = vpop.f32.mrb[50].mxu1 }
 0x1ac   : > { %v1020_v25 = vadd.f32 %v1019_v20, %v6525_v16  ;;  %v1021_v26 = vpop.f32.mrb[77].mxu0  ;;  %v1228_v61 = vpop.f32.mrb[51].mxu1 }
 0x1ad   : > { %v1022_v32 = vadd.f32 %v1021_v26, %v6529_v17  ;;  %v1023_v63 = vpop.f32.mrb[78].mxu0  ;;  %2493 = vmatprep.mubr.bf16.mxu0 %v1830_v9  ;;  %v1536_v20 = vmax.f32 %v1225_v55, 0.0  ;;  %v1229_v21 = vadd.f32 %v1228_v61, %v6806_v46 }
 0x1ae   : > { %v1024_v8 = vadd.f32 %v1023_v63, %v6525_v16  ;;  %v1025_v35 = vpop.f32.mrb[79].mxu0  ;;  %2494 = vmatmul.mubr.bf16.gmra.mrb[168].mxu0 %v1829_v1  ;;  %v1653_v42 = vmax.f32 %v1020_v25, 0.0  ;;  %v1227_v1 = vadd.f32 %v1226_v58, %v6801_v10 }
 0x1af   : > { %v1026_v40 = vadd.f32 %v1025_v35, %v6529_v17  ;;  %v1654_v48 = vmax.f32 %v1022_v32, 0.0  ;;  %v1540_v30 = vmax.f32 %v1229_v21, 0.0  ;;  %v5932_v32 = vld [vmem:[%s6191_s15 + $0xf8] sm:$0xff]   ;;  %s7909_s15 = scalar_lea.hbm %s7971_s11, %s5293_s30 }
 0x1b0   : > { %v1657_v44 = vmax.f32 %v1024_v8, 0.0  ;;  %v1539_v25 = vmax.f32 %v1227_v1, 0.0  ;;  %5137 = vmatmul.mubr.msk.bf16.gmra.mrb[156].mxu1 %vm698_vm0, %v5932_v32  ;;  %v5871_v8 = vld [vmem:[#allocation2 + $0x44] ss:$8 sps:$4 sm:$0xff]  }
 0x1b1   : > { %v1658_v12 = vmax.f32 %v1026_v40, 0.0  ;;  %v1232_v40 = vpop.f32.mrb[52].mxu1  ;;  %3391 = vmatprep.subr.bf16.mxu1 %v5871_v8 }
 0x1b2   : > { %v1833_v5 = vpack.c.bf16 %v1657_v44, %v1653_v42  ;;  %v6878_v35 = vpack.c.bf16 %v1539_v25, %v1535_v62  ;;  %v6880_v42 = vpack.c.bf16 %v1540_v30, %v1536_v20  ;;  %3392 = vmatpush1.bf16.msra.mxu1 %v5869_v34 }
 0x1b3   : > { %v1834_v59 = vpack.c.bf16 %v1658_v12, %v1654_v48  ;;  %v1029_v60 = vpop.f32.mrb[80].mxu0  ;;  %v1233_v48 = vadd.f32 %v1232_v40, %v6801_v10  ;;  %v1234_v12 = vpop.f32.mrb[53].mxu1 }
 0x1b4   : > { %v1030_v18 = vadd.f32 %v1029_v60, %v6525_v16  ;;  %v1031_v9 = vpop.f32.mrb[81].mxu0  ;;  %v1235_v52 = vadd.f32 %v1234_v12, %v6806_v46 }
 0x1b5   : > { %v1032_v22 = vadd.f32 %v1031_v9, %v6529_v17  ;;  %v1033_v24 = vpop.f32.mrb[82].mxu0  ;;  %2503 = vmatprep.mubr.bf16.mxu0 %v1834_v59  ;;  %v1543_v59 = vmax.f32 %v1233_v48, 0.0 }
 0x1b6   : > { %v1034_v26 = vadd.f32 %v1033_v24, %v6525_v16  ;;  %v1035_v28 = vpop.f32.mrb[83].mxu0  ;;  %2504 = vmatmul.mubr.bf16.gmra.mrb[172].mxu0 %v1833_v5  ;;  %v1661_v36 = vmax.f32 %v1030_v18, 0.0  ;;  %v1236_v5 = vpop.f32.mrb[54].mxu1  ;;  %v1544_v18 = vmax.f32 %v1235_v52, 0.0 }
 0x1b7   : > { %v1036_v63 = vadd.f32 %v1035_v28, %v6529_v17  ;;  %v1662_v44 = vmax.f32 %v1032_v22, 0.0  ;;  %v1237_v60 = vadd.f32 %v1236_v5, %v6801_v10  ;;  %v1238_v62 = vpop.f32.mrb[55].mxu1 }
 0x1b8   : > { %v1665_v37 = vmax.f32 %v1034_v26, 0.0  ;;  %v1239_v9 = vadd.f32 %v1238_v62, %v6806_v46  ;;  %v1242_v34 = vpop.f32.mrb[56].mxu1 }
 0x1b9   : > { %v1666_v45 = vmax.f32 %v1036_v63, 0.0  ;;  %v1547_v22 = vmax.f32 %v1237_v60, 0.0  ;;  %v1243_v40 = vadd.f32 %v1242_v34, %v6801_v10 }
 0x1ba   : > { %v1837_v49 = vpack.c.bf16 %v1665_v37, %v1661_v36  ;;  %v1548_v26 = vmax.f32 %v1239_v9, 0.0 }
 0x1bb   : > { %v1838_v55 = vpack.c.bf16 %v1666_v45, %v1662_v44  ;;  %v1039_v58 = vpop.f32.mrb[84].mxu0  ;;  %v6890_v30 = vpack.c.bf16 %v1547_v22, %v1543_v59  ;;  %v1244_v44 = vpop.f32.mrb[57].mxu1  ;;  %v1551_v5 = vmax.f32 %v1243_v40, 0.0 }
 0x1bc   : > { %v1040_v1 = vadd.f32 %v1039_v58, %v6525_v16  ;;  %v1041_v61 = vpop.f32.mrb[85].mxu0  ;;  %v6892_v8 = vpack.c.bf16 %v1548_v26, %v1544_v18  ;;  %v1245_v48 = vadd.f32 %v1244_v44, %v6806_v46  ;;  %v1246_v12 = vpop.f32.mrb[58].mxu1  ;;  %v5874_v26 = vld [vmem:[#allocation2 + $0x54] ss:$8 sps:$4 sm:$0xff]  }
 0x1bd   : > { %v1042_v20 = vadd.f32 %v1041_v61, %v6529_v17  ;;  %v1043_v21 = vpop.f32.mrb[86].mxu0  ;;  %2513 = vmatprep.mubr.bf16.mxu0 %v1838_v55  ;;  %v1247_v55 = vadd.f32 %v1246_v12, %v6801_v10  ;;  %v1248_v58 = vpop.f32.mrb[59].mxu1  ;;  %3393 = vmatprep.subr.bf16.mxu1 %v5874_v26 }
 0x1be   : > { %v1044_v24 = vadd.f32 %v1043_v21, %v6525_v16  ;;  %v1045_v25 = vpop.f32.mrb[87].mxu0  ;;  %2514 = vmatmul.mubr.bf16.gmra.mrb[176].mxu0 %v1837_v49  ;;  %v1669_v32 = vmax.f32 %v1040_v1, 0.0  ;;  %v1552_v62 = vmax.f32 %v1245_v48, 0.0  ;;  %v1249_v1 = vadd.f32 %v1248_v58, %v6806_v46  ;;  %v1252_v34 = vpop.f32.mrb[60].mxu1 }
 0x1bf   : > { %v1046_v28 = vadd.f32 %v1045_v25, %v6529_v17  ;;  %v1670_v36 = vmax.f32 %v1042_v20, 0.0  ;;  %v1555_v9 = vmax.f32 %v1247_v55, 0.0  ;;  %v5872_v25 = vld [vmem:[#allocation2 + $0x50] ss:$8 sps:$4 sm:$0xff]   ;;  %v1253_v44 = vadd.f32 %v1252_v34, %v6801_v10  ;;  %v1254_v48 = vpop.f32.mrb[61].mxu1 }
 0x1c0   : > { %v1673_v63 = vmax.f32 %v1044_v24, 0.0  ;;  %v1556_v22 = vmax.f32 %v1249_v1, 0.0  ;;  %3394 = vmatpush1.bf16.msra.mxu1 %v5872_v25 }
 0x1c1   : > { %v1674_v37 = vmax.f32 %v1046_v28, 0.0  ;;  %v6902_v28 = vpack.c.bf16 %v1555_v9, %v1551_v5  ;;  %v1559_v5 = vmax.f32 %v1253_v44, 0.0 }
 0x1c2   : > { %v1841_v45 = vpack.c.bf16 %v1673_v63, %v1669_v32 }
 0x1c3   : > { %v1842_v49 = vpack.c.bf16 %v1674_v37, %v1670_v36  ;;  %v1049_v52 = vpop.f32.mrb[88].mxu0  ;;  %v6904_v36 = vpack.c.bf16 %v1556_v22, %v1552_v62 }
 0x1c4   : > { %v1050_v59 = vadd.f32 %v1049_v52, %v6525_v16  ;;  %v1051_v60 = vpop.f32.mrb[89].mxu0 }
 0x1c5   : > { %v1052_v61 = vadd.f32 %v1051_v60, %v6529_v17  ;;  %v1053_v18 = vpop.f32.mrb[90].mxu0  ;;  %2523 = vmatprep.mubr.bf16.mxu0 %v1842_v49  ;;  %v1256_v49 = vpop.f32.mrb[62].mxu1 }
 0x1c6   : > { %v1054_v20 = vadd.f32 %v1053_v18, %v6525_v16  ;;  %v1055_v21 = vpop.f32.mrb[91].mxu0  ;;  %2524 = vmatmul.mubr.bf16.gmra.mrb[180].mxu0 %v1841_v45  ;;  %v1677_v32 = vmax.f32 %v1050_v59, 0.0  ;;  %v1255_v45 = vadd.f32 %v1254_v48, %v6806_v46  ;;  %v1257_v58 = vadd.f32 %v1256_v49, %v6801_v10  ;;  %v1258_v59 = vpop.f32.mrb[63].mxu1 }
 0x1c7   : > { %v1056_v24 = vadd.f32 %v1055_v21, %v6529_v17  ;;  %v1678_v37 = vmax.f32 %v1052_v61, 0.0  ;;  %v1259_v61 = vadd.f32 %v1258_v59, %v6806_v46  ;;  %v1262_v34 = vpop.f32.mrb[64].mxu1 }
 0x1c8   : > { %v1681_v63 = vmax.f32 %v1054_v20, 0.0  ;;  %v1560_v1 = vmax.f32 %v1255_v45, 0.0  ;;  %v1563_v20 = vmax.f32 %v1257_v58, 0.0  ;;  %v1263_v48 = vadd.f32 %v1262_v34, %v6801_v10  ;;  %v1264_v45 = vpop.f32.mrb[65].mxu1 }
 0x1c9   : > { %v1682_v40 = vmax.f32 %v1056_v24, 0.0  ;;  %v1564_v24 = vmax.f32 %v1259_v61, 0.0  ;;  %v5877_v61 = vld [vmem:[#allocation2 + $0x64] ss:$8 sps:$4 sm:$0xff]  }
 0x1ca   : > { %v1845_v12 = vpack.c.bf16 %v1681_v63, %v1677_v32  ;;  %v6914_v26 = vpack.c.bf16 %v1563_v20, %v1559_v5  ;;  %3395 = vmatprep.subr.bf16.mxu1 %v5877_v61  ;;  %v5880_v61 = vld [vmem:[#allocation2 + $0x74] ss:$8 sps:$4 sm:$0xff]  }
 0x1cb   : > { %v1846_v52 = vpack.c.bf16 %v1682_v40, %v1678_v37  ;;  %v1059_v55 = vpop.f32.mrb[92].mxu0  ;;  %v6916_v37 = vpack.c.bf16 %v1564_v24, %v1560_v1  ;;  %v5875_v1 = vld [vmem:[#allocation2 + $0x60] ss:$8 sps:$4 sm:$0xff]  }
 0x1cc   : > { %v1060_v60 = vadd.f32 %v1059_v55, %v6525_v16  ;;  %v1061_v62 = vpop.f32.mrb[93].mxu0  ;;  %v1567_v55 = vmax.f32 %v1263_v48, 0.0  ;;  %3396 = vmatpush1.bf16.msra.mxu1 %v5875_v1  ;;  %v5878_v1 = vld [vmem:[#allocation2 + $0x70] ss:$8 sps:$4 sm:$0xff]  }
 0x1cd   : > { %v1062_v18 = vadd.f32 %v1061_v62, %v6529_v17  ;;  %v1063_v9 = vpop.f32.mrb[94].mxu0  ;;  %2533 = vmatprep.mubr.bf16.mxu0 %v1846_v52  ;;  %v1266_v52 = vpop.f32.mrb[66].mxu1  ;;  %3397 = vmatprep.subr.bf16.mxu1 %v5880_v61  ;;  %v5883_v61 = vld [vmem:[#allocation2 + $0x84] ss:$8 sps:$4 sm:$0xff]  }
 0x1ce   : > { %v1064_v21 = vadd.f32 %v1063_v9, %v6525_v16  ;;  %v1065_v22 = vpop.f32.mrb[95].mxu0  ;;  %2534 = vmatmul.mubr.bf16.gmra.mrb[184].mxu0 %v1845_v12  ;;  %v1685_v32 = vmax.f32 %v1060_v60, 0.0  ;;  %v1265_v16 = vadd.f32 %v1264_v45, %v6806_v46  ;;  %v1268_v5 = vpop.f32.mrb[67].mxu1 }
 0x1cf   : > { %v1066_v25 = vadd.f32 %v1065_v22, %v6529_v17  ;;  %v1686_v40 = vmax.f32 %v1062_v18, 0.0  ;;  %v1267_v17 = vadd.f32 %v1266_v52, %v6801_v10  ;;  %v1269_v59 = vadd.f32 %v1268_v5, %v6806_v46  ;;  %v1272_v9 = vpop.f32.mrb[68].mxu1 }
 0x1d0   : > { %v1689_v63 = vmax.f32 %v1064_v21, 0.0  ;;  %v1568_v58 = vmax.f32 %v1265_v16, 0.0  ;;  %v1273_v21 = vadd.f32 %v1272_v9, %v6801_v10  ;;  %v1274_v22 = vpop.f32.mrb[69].mxu1  ;;  %3398 = vmatpush1.bf16.msra.mxu1 %v5878_v1  ;;  %v5881_v1 = vld [vmem:[#allocation2 + $0x80] ss:$8 sps:$4 sm:$0xff]  }
 0x1d1   : > { %v1690_v44 = vmax.f32 %v1066_v25, 0.0  ;;  %v1571_v60 = vmax.f32 %v1267_v17, 0.0  ;;  %v1572_v62 = vmax.f32 %v1269_v59, 0.0  ;;  %v1275_v24 = vadd.f32 %v1274_v22, %v6806_v46  ;;  %v1276_v25 = vpop.f32.mrb[70].mxu1  ;;  %3399 = vmatprep.subr.bf16.mxu1 %v5883_v61  ;;  %v5886_v61 = vld [vmem:[#allocation2 + $0x94] ss:$8 sps:$4 sm:$0xff]  }
 0x1d2   : > { %v1849_v49 = vpack.c.bf16 %v1689_v63, %v1685_v32  ;;  %v1575_v32 = vmax.f32 %v1273_v21, 0.0  ;;  %v1277_v63 = vadd.f32 %v1276_v25, %v6801_v10  ;;  %v1278_v34 = vpop.f32.mrb[71].mxu1 }
 0x1d3   : > { %v1850_v12 = vpack.c.bf16 %v1690_v44, %v1686_v40  ;;  %v6923_v18 = vpack.c.bf16 %v1571_v60, %v1567_v55  ;;  %v6925_v20 = vpack.c.bf16 %v1572_v62, %v1568_v58  ;;  %v1279_v40 = vadd.f32 %v1278_v34, %v6806_v46 }
 0x1d4   : > { %v1579_v44 = vmax.f32 %v1277_v63, 0.0  ;;  %3400 = vmatpush1.bf16.msra.mxu1 %v5881_v1  ;;  %v5884_v1 = vld [vmem:[#allocation2 + $0x90] ss:$8 sps:$4 sm:$0xff]  }
 0x1d5   : > { %2543 = vmatprep.mubr.bf16.mxu0 %v1850_v12  ;;  %v1580_v48 = vmax.f32 %v1279_v40, 0.0  ;;  %3401 = vmatprep.subr.bf16.mxu1 %v5886_v61  ;;  %v5889_v61 = vld [vmem:[#allocation2 + $0xa4] ss:$8 sps:$4 sm:$0xff]  }
 0x1d6   : > { %2544 = vmatmul.mubr.bf16.gmra.mrb[188].mxu0 %v1849_v49  ;;  %v6933_v45 = vpack.c.bf16 %v1579_v44, %v1575_v32  ;;  %v1282_v49 = vpop.f32.mrb[72].mxu1 }
 0x1d7   : > { %2553 = vmatprep.mubr.bf16.mxu0 %v6677_v33  ;;  %v1576_v33 = vmax.f32 %v1275_v24, 0.0  ;;  %v1283_v52 = vadd.f32 %v1282_v49, %v6801_v10  ;;  %v1284_v12 = vpop.f32.mrb[73].mxu1 }
 0x1d8   : > { %v1285_v55 = vadd.f32 %v1284_v12, %v6806_v46  ;;  %v1286_v17 = vpop.f32.mrb[74].mxu1  ;;  %3402 = vmatpush1.bf16.msra.mxu1 %v5884_v1  ;;  %v5887_v1 = vld [vmem:[#allocation2 + $0xa0] ss:$8 sps:$4 sm:$0xff]  }
 0x1d9   : > { %v6935_v16 = vpack.c.bf16 %v1580_v48, %v1576_v33  ;;  %v1583_v5 = vmax.f32 %v1283_v52, 0.0  ;;  %v1287_v58 = vadd.f32 %v1286_v17, %v6801_v10  ;;  %v1288_v59 = vpop.f32.mrb[75].mxu1  ;;  %3403 = vmatprep.subr.bf16.mxu1 %v5889_v61  ;;  %v5892_v61 = vld [vmem:[#allocation2 + $0xb4] ss:$8 sps:$4 sm:$0xff]  }
 0x1da   : > { %v1584_v60 = vmax.f32 %v1285_v55, 0.0  ;;  %v1292_v21 = vpop.f32.mrb[76].mxu1 }
 0x1db   : > { %v1587_v62 = vmax.f32 %v1287_v58, 0.0  ;;  %v1293_v24 = vadd.f32 %v1292_v21, %v6801_v10  ;;  %v1294_v25 = vpop.f32.mrb[77].mxu1 }
 0x1dc   : > { %v1295_v32 = vadd.f32 %v1294_v25, %v6806_v46  ;;  %v1296_v63 = vpop.f32.mrb[78].mxu1  ;;  %3404 = vmatpush1.bf16.msra.mxu1 %v5887_v1  ;;  %v5890_v1 = vld [vmem:[#allocation2 + $0xb0] ss:$8 sps:$4 sm:$0xff]  }
 0x1dd   : > { %v6943_v9 = vpack.c.bf16 %v1587_v62, %v1583_v5  ;;  %v1591_v34 = vmax.f32 %v1293_v24, 0.0  ;;  %v1298_v33 = vpop.f32.mrb[79].mxu1  ;;  %3405 = vmatprep.subr.bf16.mxu1 %v5892_v61  ;;  %v5895_v61 = vld [vmem:[#allocation2 + $0xc4] ss:$8 sps:$4 sm:$0xff]  }
 0x1de   : > { %2554 = vmatmul.mubr.bf16.gmra.mrb[192].mxu0 %v6674_v29  ;;  %v1289_v29 = vadd.f32 %v1288_v59, %v6806_v46  ;;  %v1299_v40 = vadd.f32 %v1298_v33, %v6806_v46  ;;  %v1302_v52 = vpop.f32.mrb[80].mxu1 }
 0x1df   : > { %2563 = vmatprep.mubr.bf16.mxu0 %v6686_v2  ;;  %v1303_v55 = vadd.f32 %v1302_v52, %v6801_v10  ;;  %v1304_v17 = vpop.f32.mrb[81].mxu1 }
 0x1e0   : > { %v1588_v2 = vmax.f32 %v1289_v29, 0.0  ;;  %v1596_v48 = vmax.f32 %v1299_v40, 0.0  ;;  %v1305_v5 = vadd.f32 %v1304_v17, %v6806_v46  ;;  %v1306_v58 = vpop.f32.mrb[82].mxu1  ;;  %3406 = vmatpush1.bf16.msra.mxu1 %v5890_v1  ;;  %v5893_v1 = vld [vmem:[#allocation2 + $0xc0] ss:$8 sps:$4 sm:$0xff]  }
 0x1e1   : > { %v1599_v59 = vmax.f32 %v1303_v55, 0.0  ;;  %v1308_v29 = vpop.f32.mrb[83].mxu1  ;;  %3407 = vmatprep.subr.bf16.mxu1 %v5895_v61  ;;  %v5898_v61 = vld [vmem:[#allocation2 + $0xd4] ss:$8 sps:$4 sm:$0xff]  }
 0x1e2   : > { %v6945_v22 = vpack.c.bf16 %v1588_v2, %v1584_v60  ;;  %v1307_v60 = vadd.f32 %v1306_v58, %v6801_v10  ;;  %v1600_v62 = vmax.f32 %v1305_v5, 0.0  ;;  %v1312_v24 = vpop.f32.mrb[84].mxu1 }
 0x1e4   : > { %v1603_v2 = vmax.f32 %v1307_v60, 0.0  ;;  %3408 = vmatpush1.bf16.msra.mxu1 %v5893_v1  ;;  %v5896_v1 = vld [vmem:[#allocation2 + $0xd0] ss:$8 sps:$4 sm:$0xff]  }
 0x1e5   : > { %3409 = vmatprep.subr.bf16.mxu1 %v5898_v61  ;;  %v5901_v61 = vld [vmem:[#allocation2 + $0xe4] ss:$8 sps:$4 sm:$0xff]  }
 0x1e6   : > { %2564 = vmatmul.mubr.bf16.gmra.mrb[196].mxu0 %v6691_v53  ;;  %v1297_v53 = vadd.f32 %v1296_v63, %v6801_v10  ;;  %v6963_v21 = vpack.c.bf16 %v1603_v2, %v1599_v59  ;;  %v1314_v63 = vpop.f32.mrb[85].mxu1 }
 0x1e7   : > { %2573 = vmatprep.mubr.bf16.mxu0 %v6701_v27  ;;  %v1592_v27 = vmax.f32 %v1295_v32, 0.0  ;;  %v1313_v32 = vadd.f32 %v1312_v24, %v6801_v10 }
 0x1e8   : > { %v1595_v44 = vmax.f32 %v1297_v53, 0.0  ;;  %v1316_v53 = vpop.f32.mrb[86].mxu1  ;;  %3410 = vmatpush1.bf16.msra.mxu1 %v5896_v1  ;;  %v5899_v1 = vld [vmem:[#allocation2 + $0xe0] ss:$8 sps:$4 sm:$0xff]  }
 0x1e9   : > { %v6955_v12 = vpack.c.bf16 %v1596_v48, %v1592_v27  ;;  %v1607_v33 = vmax.f32 %v1313_v32, 0.0  ;;  %v1318_v27 = vpop.f32.mrb[87].mxu1  ;;  %3411 = vmatprep.subr.bf16.mxu1 %v5901_v61  ;;  %v5904_v61 = vld [vmem:[#allocation2 + $0xf4] ss:$8 sps:$4 sm:$0xff]  }
 0x1ea   : > { %v6953_v49 = vpack.c.bf16 %v1595_v44, %v1591_v34  ;;  %v1315_v34 = vadd.f32 %v1314_v63, %v6806_v46  ;;  %v1319_v40 = vadd.f32 %v1318_v27, %v6806_v46  ;;  %v1322_v55 = vpop.f32.mrb[88].mxu1 }
 0x1eb   : > { %v1323_v5 = vadd.f32 %v1322_v55, %v6801_v10  ;;  %v1324_v58 = vpop.f32.mrb[89].mxu1 }
 0x1ec   : > { %v1612_v48 = vmax.f32 %v1319_v40, 0.0  ;;  %v1325_v59 = vadd.f32 %v1324_v58, %v6806_v46  ;;  %v1326_v60 = vpop.f32.mrb[90].mxu1  ;;  %3412 = vmatpush1.bf16.msra.mxu1 %v5899_v1  ;;  %v5902_v1 = vld [vmem:[#allocation2 + $0xf0] ss:$8 sps:$4 sm:$0xff]  }
 0x1ed   : > { %3413 = vmatprep.subr.bf16.mxu1 %v5904_v61 }
 0x1ee   : > { %2574 = vmatmul.mubr.bf16.gmra.mrb[200].mxu0 %v6711_v31  ;;  %v1309_v31 = vadd.f32 %v1308_v29, %v6806_v46  ;;  %v1615_v29 = vmax.f32 %v1323_v5, 0.0  ;;  %v1616_v2 = vmax.f32 %v1325_v59, 0.0 }
 0x1ef   : > { %2583 = vmatprep.mubr.bf16.mxu0 %v6726_v7 }
 0x1f0   : > { %v1604_v7 = vmax.f32 %v1309_v31, 0.0  ;;  %v1328_v31 = vpop.f32.mrb[91].mxu1  ;;  %3414 = vmatpush1.bf16.msra.mxu1 %v5902_v1 }
 0x1f1   : > { %v1332_v32 = vpop.f32.mrb[92].mxu1  ;;  %4063 = vmatprep.subr.bf16.mxu1 %v6032_v0 }
 0x1f2   : > { %v6965_v25 = vpack.c.bf16 %v1604_v7, %v1600_v62  ;;  %v1327_v62 = vadd.f32 %v1326_v60, %v6801_v10 }
 0x1f4   : > { %v1619_v7 = vmax.f32 %v1327_v62, 0.0 }
 0x1f6   : > { %2584 = vmatmul.mubr.bf16.gmra.mrb[204].mxu0 %v6724_v56  ;;  %v1317_v56 = vadd.f32 %v1316_v53, %v6801_v10  ;;  %v6983_v24 = vpack.c.bf16 %v1619_v7, %v1615_v29  ;;  %v1334_v53 = vpop.f32.mrb[93].mxu1 }
 0x1f7   : > { %2593 = vmatprep.mubr.bf16.mxu0 %v6741_v41  ;;  %v1608_v41 = vmax.f32 %v1315_v34, 0.0  ;;  %v1333_v34 = vadd.f32 %v1332_v32, %v6801_v10 }
 0x1f8   : > { %v1611_v44 = vmax.f32 %v1317_v56, 0.0  ;;  %v1336_v56 = vpop.f32.mrb[94].mxu1 }
 0x1f9   : > { %v6975_v17 = vpack.c.bf16 %v1612_v48, %v1608_v41  ;;  %v1623_v27 = vmax.f32 %v1333_v34, 0.0  ;;  %v1338_v41 = vpop.f32.mrb[95].mxu1 }
 0x1fa   : > { %v6973_v52 = vpack.c.bf16 %v1611_v44, %v1607_v33  ;;  %v1335_v33 = vadd.f32 %v1334_v53, %v6806_v46  ;;  %v1339_v40 = vadd.f32 %v1338_v41, %v6806_v46  ;;  %v1342_v5 = vpop.f32.mrb[96].mxu1 }
 0x1fb   : > { %v1343_v59 = vadd.f32 %v1342_v5, %v6801_v10  ;;  %v1344_v60 = vpop.f32.mrb[97].mxu1 }
 0x1fc   : > { %v1628_v48 = vmax.f32 %v1339_v40, 0.0  ;;  %v1345_v29 = vadd.f32 %v1344_v60, %v6806_v46  ;;  %v1346_v62 = vpop.f32.mrb[98].mxu1 }
 0x1fe   : > { %2594 = vmatmul.mubr.bf16.gmra.mrb[208].mxu0 %v6739_v38  ;;  %v1329_v38 = vadd.f32 %v1328_v31, %v6806_v46  ;;  %v1631_v31 = vmax.f32 %v1343_v59, 0.0  ;;  %v1632_v7 = vmax.f32 %v1345_v29, 0.0 }
 0x1ff   : > { %2603 = vmatprep.mubr.bf16.mxu0 %v6762_v23 }
 0x200   : > { %v1620_v23 = vmax.f32 %v1329_v38, 0.0  ;;  %v1348_v38 = vpop.f32.mrb[99].mxu1 }
 0x201   : > { %v1352_v34 = vpop.f32.mrb[100].mxu1 }
 0x202   : > { %v6985_v63 = vpack.c.bf16 %v1620_v23, %v1616_v2  ;;  %v1347_v2 = vadd.f32 %v1346_v62, %v6801_v10 }
 0x204   : > { %v1635_v23 = vmax.f32 %v1347_v2, 0.0 }
 0x206   : > { %2604 = vmatmul.mubr.bf16.gmra.mrb[212].mxu0 %v6760_v19  ;;  %v1337_v19 = vadd.f32 %v1336_v56, %v6801_v10  ;;  %v7003_v32 = vpack.c.bf16 %v1635_v23, %v1631_v31  ;;  %v1354_v56 = vpop.f32.mrb[101].mxu1 }
 0x207   : > { %2613 = vmatprep.mubr.bf16.mxu0 %v6777_v54  ;;  %v1624_v54 = vmax.f32 %v1335_v33, 0.0  ;;  %v1353_v33 = vadd.f32 %v1352_v34, %v6801_v10 }
 0x208   : > { %v1627_v44 = vmax.f32 %v1337_v19, 0.0  ;;  %v1356_v19 = vpop.f32.mrb[102].mxu1 }
 0x209   : > { %v6995_v58 = vpack.c.bf16 %v1628_v48, %v1624_v54  ;;  %v1639_v41 = vmax.f32 %v1353_v33, 0.0  ;;  %v1358_v54 = vpop.f32.mrb[103].mxu1 }
 0x20a   : > { %v6993_v55 = vpack.c.bf16 %v1627_v44, %v1623_v27  ;;  %v1355_v27 = vadd.f32 %v1354_v56, %v6806_v46  ;;  %v1359_v40 = vadd.f32 %v1358_v54, %v6806_v46  ;;  %v1362_v59 = vpop.f32.mrb[104].mxu1 }
 0x20b   : > { %v1363_v29 = vadd.f32 %v1362_v59, %v6801_v10  ;;  %v1364_v62 = vpop.f32.mrb[105].mxu1 }
 0x20c   : > { %v1644_v48 = vmax.f32 %v1359_v40, 0.0  ;;  %v1365_v31 = vadd.f32 %v1364_v62, %v6806_v46  ;;  %v1366_v2 = vpop.f32.mrb[106].mxu1 }
 0x20e   : > { %2614 = vmatmul.mubr.bf16.gmra.mrb[216].mxu0 %v6775_v51  ;;  %v1349_v51 = vadd.f32 %v1348_v38, %v6806_v46  ;;  %v1647_v38 = vmax.f32 %v1363_v29, 0.0  ;;  %v1648_v23 = vmax.f32 %v1365_v31, 0.0 }
 0x20f   : > { %2623 = vmatprep.mubr.bf16.mxu0 %v6803_v43 }
 0x210   : > { %v1636_v43 = vmax.f32 %v1349_v51, 0.0  ;;  %v1368_v51 = vpop.f32.mrb[107].mxu1 }
 0x211   : > { %v1372_v56 = vpop.f32.mrb[108].mxu1 }
 0x212   : > { %v7005_v53 = vpack.c.bf16 %v1636_v43, %v1632_v7  ;;  %v1367_v7 = vadd.f32 %v1366_v2, %v6801_v10 }
 0x214   : > { %v1651_v43 = vmax.f32 %v1367_v7, 0.0 }
 0x216   : > { %2624 = vmatmul.mubr.bf16.gmra.mrb[220].mxu0 %v6798_v39  ;;  %v1357_v39 = vadd.f32 %v1356_v19, %v6801_v10  ;;  %v7023_v34 = vpack.c.bf16 %v1651_v43, %v1647_v38  ;;  %v1374_v19 = vpop.f32.mrb[109].mxu1 }
 0x217   : > { %2666 = vmatprep.mubr.bf16.mxu0 %v6821_v6  ;;  %v1640_v6 = vmax.f32 %v1355_v27, 0.0  ;;  %v1373_v27 = vadd.f32 %v1372_v56, %v6801_v10 }
 0x218   : > { %v1643_v44 = vmax.f32 %v1357_v39, 0.0  ;;  %v1376_v39 = vpop.f32.mrb[110].mxu1 }
 0x219   : > { %v7015_v60 = vpack.c.bf16 %v1644_v48, %v1640_v6  ;;  %v1655_v54 = vmax.f32 %v1373_v27, 0.0  ;;  %v1378_v6 = vpop.f32.mrb[111].mxu1 }
 0x21a   : > { %v7013_v5 = vpack.c.bf16 %v1643_v44, %v1639_v41  ;;  %v1375_v41 = vadd.f32 %v1374_v19, %v6806_v46  ;;  %v1379_v40 = vadd.f32 %v1378_v6, %v6806_v46  ;;  %v1382_v29 = vpop.f32.mrb[112].mxu1 }
 0x21b   : > { %v1383_v31 = vadd.f32 %v1382_v29, %v6801_v10  ;;  %v1384_v2 = vpop.f32.mrb[113].mxu1 }
 0x21c   : > { %v1660_v48 = vmax.f32 %v1379_v40, 0.0  ;;  %v1385_v38 = vadd.f32 %v1384_v2, %v6806_v46  ;;  %v1386_v7 = vpop.f32.mrb[114].mxu1 }
 0x21e   : > { %2667 = vmatmul.mubr.bf16.vlgmr.msra.gmra.mrb[96].mxu0 %v6818_v3  ;;  %v1369_v3 = vadd.f32 %v1368_v51, %v6806_v46  ;;  %v1663_v51 = vmax.f32 %v1383_v31, 0.0 }
 0x21f   : > { %2676 = vmatprep.mubr.bf16.mxu0 %v6836_v11 }
 0x220   : > { %v1652_v11 = vmax.f32 %v1369_v3, 0.0  ;;  %v1388_v3 = vpop.f32.mrb[115].mxu1 }
 0x221   : > { %v1389_v43 = vadd.f32 %v1388_v3, %v6806_v46  ;;  %v1392_v27 = vpop.f32.mrb[116].mxu1 }
 0x222   : > { %v7025_v33 = vpack.c.bf16 %v1652_v11, %v1648_v23  ;;  %v1387_v23 = vadd.f32 %v1386_v7, %v6801_v10 }
 0x223   : > { %v1668_v11 = vmax.f32 %v1389_v43, 0.0 }
 0x226   : > { %2677 = vmatmul.mubr.bf16.gmra.mrb[100].mxu0 %v6834_v14  ;;  %v1377_v14 = vadd.f32 %v1376_v39, %v6801_v10  ;;  %v1394_v39 = vpop.f32.mrb[117].mxu1 }
 0x227   : > { %2686 = vmatprep.mubr.bf16.mxu0 %v6851_v57  ;;  %v1656_v57 = vmax.f32 %v1375_v41, 0.0  ;;  %v1393_v41 = vadd.f32 %v1392_v27, %v6801_v10 }
 0x228   : > { %v1659_v44 = vmax.f32 %v1377_v14, 0.0  ;;  %v1396_v14 = vpop.f32.mrb[118].mxu1 }
 0x229   : > { %v7035_v62 = vpack.c.bf16 %v1660_v48, %v1656_v57  ;;  %v1397_v6 = vadd.f32 %v1396_v14, %v6801_v10 }
 0x22a   : > { %v7033_v59 = vpack.c.bf16 %v1659_v44, %v1655_v54  ;;  %v1395_v54 = vadd.f32 %v1394_v39, %v6806_v46 }
 0x22b   : > { %v1675_v44 = vmax.f32 %v1397_v6, 0.0 }
 0x22c   : > { %v1672_v57 = vmax.f32 %v1395_v54, 0.0 }
 0x22e   : > { %2687 = vmatmul.mubr.bf16.gmra.mrb[104].mxu0 %v6849_v50  ;;  %v1664_v50 = vmax.f32 %v1385_v38, 0.0 }
 0x22f   : > { %2696 = vmatprep.mubr.bf16.mxu0 %v6866_v47  ;;  %v1667_v47 = vmax.f32 %v1387_v23, 0.0 }
 0x230   : > { %v7045_v19 = vpack.c.bf16 %v1668_v11, %v1664_v50 }
 0x231   : > { %v7043_v56 = vpack.c.bf16 %v1667_v47, %v1663_v51 }
 0x236   : > { %2697 = vmatmul.mubr.bf16.gmra.mrb[108].mxu0 %v6864_v4  ;;  %v1671_v4 = vmax.f32 %v1393_v41, 0.0 }
 0x237   : > { %2706 = vmatprep.mubr.bf16.mxu0 %v6880_v42  ;;  %v1398_v42 = vpop.f32.mrb[119].mxu1 }
 0x238   : > { %v1399_v40 = vadd.f32 %v1398_v42, %v6806_v46  ;;  %v7053_v29 = vpack.c.bf16 %v1675_v44, %v1671_v4  ;;  %v1402_v31 = vpop.f32.mrb[120].mxu1 }
 0x239   : > { %v1403_v38 = vadd.f32 %v1402_v31, %v6801_v10  ;;  %v1404_v7 = vpop.f32.mrb[121].mxu1 }
 0x23a   : > { %v1676_v48 = vmax.f32 %v1399_v40, 0.0  ;;  %v1405_v51 = vadd.f32 %v1404_v7, %v6806_v46  ;;  %v1406_v23 = vpop.f32.mrb[122].mxu1 }
 0x23b   : > { %v1679_v3 = vmax.f32 %v1403_v38, 0.0  ;;  %v1407_v50 = vadd.f32 %v1406_v23, %v6801_v10  ;;  %v1408_v43 = vpop.f32.mrb[123].mxu1 }
 0x23c   : > { %v7055_v2 = vpack.c.bf16 %v1676_v48, %v1672_v57  ;;  %v1409_v47 = vadd.f32 %v1408_v43, %v6806_v46  ;;  %v1412_v41 = vpop.f32.mrb[124].mxu1 }
 0x23d   : > { %v1413_v54 = vadd.f32 %v1412_v41, %v6801_v10  ;;  %v1414_v14 = vpop.f32.mrb[125].mxu1 }
 0x23e   : > { %2707 = vmatmul.mubr.bf16.gmra.mrb[112].mxu0 %v6878_v35  ;;  %v1680_v35 = vmax.f32 %v1405_v51, 0.0  ;;  %v1684_v11 = vmax.f32 %v1409_v47, 0.0  ;;  %v1415_v4 = vadd.f32 %v1414_v14, %v6806_v46  ;;  %v1416_v6 = vpop.f32.mrb[126].mxu1 }
 0x23f   : > { %2716 = vmatprep.mubr.bf16.mxu0 %v6892_v8  ;;  %v1683_v8 = vmax.f32 %v1407_v50, 0.0  ;;  %v1417_v42 = vadd.f32 %v1416_v6, %v6801_v10 }
 0x240   : > { %v7065_v39 = vpack.c.bf16 %v1684_v11, %v1680_v35  ;;  %v1688_v57 = vmax.f32 %v1415_v4, 0.0 }
 0x241   : > { %v7063_v27 = vpack.c.bf16 %v1683_v8, %v1679_v3  ;;  %v1691_v44 = vmax.f32 %v1417_v42, 0.0 }
 0x246   : > { %2717 = vmatmul.mubr.bf16.gmra.mrb[116].mxu0 %v6890_v30  ;;  %v1687_v30 = vmax.f32 %v1413_v54, 0.0 }
 0x247   : > { %2726 = vmatprep.mubr.bf16.mxu0 %v6904_v36  ;;  %v1418_v36 = vpop.f32.mrb[127].mxu1 }
 0x248   : > { %v1419_v40 = vadd.f32 %v1418_v36, %v6806_v46  ;;  %v7073_v31 = vpack.c.bf16 %v1691_v44, %v1687_v30  ;;  %v1422_v38 = vpop.f32.mrb[128].mxu1 }
 0x249   : > { %v1423_v51 = vadd.f32 %v1422_v38, %v6801_v10  ;;  %v1424_v23 = vpop.f32.mrb[129].mxu1 }
 0x24a   : > { %v1692_v48 = vmax.f32 %v1419_v40, 0.0  ;;  %v1425_v3 = vadd.f32 %v1424_v23, %v6806_v46  ;;  %v1426_v50 = vpop.f32.mrb[130].mxu1 }
 0x24b   : > { %v1695_v43 = vmax.f32 %v1423_v51, 0.0  ;;  %v1427_v35 = vadd.f32 %v1426_v50, %v6801_v10  ;;  %v1428_v47 = vpop.f32.mrb[131].mxu1 }
 0x24c   : > { %v7075_v7 = vpack.c.bf16 %v1692_v48, %v1688_v57  ;;  %v1429_v8 = vadd.f32 %v1428_v47, %v6806_v46 }
 0x24e   : > { %2727 = vmatmul.mubr.bf16.gmra.mrb[120].mxu0 %v6902_v28  ;;  %v1696_v28 = vmax.f32 %v1425_v3, 0.0  ;;  %v1700_v11 = vmax.f32 %v1429_v8, 0.0 }
 0x24f   : > { %2736 = vmatprep.mubr.bf16.mxu0 %v6916_v37  ;;  %v1699_v37 = vmax.f32 %v1427_v35, 0.0 }
 0x250   : > { %v7085_v14 = vpack.c.bf16 %v1700_v11, %v1696_v28 }
 0x251   : > { %v7083_v41 = vpack.c.bf16 %v1699_v37, %v1695_v43 }
 0x252   : > { %v1432_v54 = vpop.f32.mrb[132].mxu1 }
 0x253   : > { %v1433_v4 = vadd.f32 %v1432_v54, %v6801_v10  ;;  %v1434_v6 = vpop.f32.mrb[133].mxu1 }
 0x254   : > { %v1435_v30 = vadd.f32 %v1434_v6, %v6806_v46  ;;  %v1436_v42 = vpop.f32.mrb[134].mxu1 }
 0x255   : > { %v1437_v36 = vadd.f32 %v1436_v42, %v6801_v10 }
 0x256   : > { %2737 = vmatmul.mubr.bf16.gmra.mrb[124].mxu0 %v6914_v26  ;;  %v1703_v26 = vmax.f32 %v1433_v4, 0.0  ;;  %v1704_v57 = vmax.f32 %v1435_v30, 0.0 }
 0x257   : > { %2746 = vmatprep.mubr.bf16.mxu0 %v6925_v20  ;;  %v1438_v20 = vpop.f32.mrb[135].mxu1  ;;  %v1707_v44 = vmax.f32 %v1437_v36, 0.0 }
 0x258   : > { %v1439_v40 = vadd.f32 %v1438_v20, %v6806_v46 }
 0x259   : > { %v7093_v38 = vpack.c.bf16 %v1707_v44, %v1703_v26 }
 0x25a   : > { %v1708_v48 = vmax.f32 %v1439_v40, 0.0  ;;  %v1442_v51 = vpop.f32.mrb[136].mxu1 }
 0x25b   : > { %v1443_v3 = vadd.f32 %v1442_v51, %v6801_v10  ;;  %v1444_v50 = vpop.f32.mrb[137].mxu1 }
 0x25c   : > { %v7095_v23 = vpack.c.bf16 %v1708_v48, %v1704_v57  ;;  %v1445_v43 = vadd.f32 %v1444_v50, %v6806_v46  ;;  %v1446_v35 = vpop.f32.mrb[138].mxu1 }
 0x25d   : > { %v1711_v47 = vmax.f32 %v1443_v3, 0.0  ;;  %v1447_v28 = vadd.f32 %v1446_v35, %v6801_v10  ;;  %v1448_v8 = vpop.f32.mrb[139].mxu1 }
 0x25e   : > { %2747 = vmatmul.mubr.bf16.gmra.mrb[128].mxu0 %v6923_v18  ;;  %v1712_v18 = vmax.f32 %v1445_v43, 0.0  ;;  %v1449_v37 = vadd.f32 %v1448_v8, %v6806_v46 }
 0x25f   : > { %2756 = vmatprep.mubr.bf16.mxu0 %v6935_v16  ;;  %v1715_v16 = vmax.f32 %v1447_v28, 0.0 }
 0x260   : > { %v1716_v11 = vmax.f32 %v1449_v37, 0.0 }
 0x261   : > { %v7103_v54 = vpack.c.bf16 %v1715_v16, %v1711_v47 }
 0x262   : > { %v1452_v4 = vpop.f32.mrb[140].mxu1  ;;  %v7105_v6 = vpack.c.bf16 %v1716_v11, %v1712_v18 }
 0x263   : > { %v1453_v30 = vadd.f32 %v1452_v4, %v6801_v10  ;;  %v1454_v42 = vpop.f32.mrb[141].mxu1 }
 0x264   : > { %v1455_v26 = vadd.f32 %v1454_v42, %v6806_v46  ;;  %v1456_v36 = vpop.f32.mrb[142].mxu1 }
 0x265   : > { %v1458_v20 = vpop.f32.mrb[143].mxu1 }
 0x266   : > { %2757 = vmatmul.mubr.bf16.gmra.mrb[132].mxu0 %v6933_v45  ;;  %v1719_v45 = vmax.f32 %v1453_v30, 0.0  ;;  %v1720_v57 = vmax.f32 %v1455_v26, 0.0  ;;  %v1459_v40 = vadd.f32 %v1458_v20, %v6806_v46 }
 0x267   : > { %2766 = vmatprep.mubr.bf16.mxu0 %v6945_v22  ;;  %v1457_v22 = vadd.f32 %v1456_v36, %v6801_v10 }
 0x268   : > { %v1724_v48 = vmax.f32 %v1459_v40, 0.0 }
 0x269   : > { %v1723_v44 = vmax.f32 %v1457_v22, 0.0 }
 0x26a   : > { %v1462_v3 = vpop.f32.mrb[144].mxu1  ;;  %v7116_v50 = vpack.c.bf16 %v1724_v48, %v1720_v57 }
 0x26b   : > { %v7114_v51 = vpack.c.bf16 %v1723_v44, %v1719_v45  ;;  %v1463_v43 = vadd.f32 %v1462_v3, %v6801_v10  ;;  %v1464_v35 = vpop.f32.mrb[145].mxu1 }
 0x26c   : > { %v1465_v47 = vadd.f32 %v1464_v35, %v6806_v46  ;;  %v1466_v28 = vpop.f32.mrb[146].mxu1 }
 0x26d   : > { %v1727_v8 = vmax.f32 %v1463_v43, 0.0  ;;  %v1467_v18 = vadd.f32 %v1466_v28, %v6801_v10  ;;  %v1468_v37 = vpop.f32.mrb[147].mxu1 }
 0x26e   : > { %2767 = vmatmul.mubr.bf16.gmra.mrb[136].mxu0 %v6943_v9  ;;  %v1728_v9 = vmax.f32 %v1465_v47, 0.0  ;;  %v1469_v16 = vadd.f32 %v1468_v37, %v6806_v46 }
 0x26f   : > { %2776 = vmatprep.mubr.bf16.mxu0 %v6955_v12  ;;  %v1731_v12 = vmax.f32 %v1467_v18, 0.0 }
 0x270   : > { %v1732_v11 = vmax.f32 %v1469_v16, 0.0 }
 0x271   : > { %v7124_v1 = vpack.c.bf16 %v1731_v12, %v1727_v8 }
 0x272   : > { %v1472_v61 = vpop.f32.mrb[148].mxu1  ;;  %v7126_v4 = vpack.c.bf16 %v1732_v11, %v1728_v9 }
 0x273   : > { %v1473_v30 = vadd.f32 %v1472_v61, %v6801_v10  ;;  %v1474_v42 = vpop.f32.mrb[149].mxu1 }
 0x274   : > { %v1475_v26 = vadd.f32 %v1474_v42, %v6806_v46  ;;  %v1476_v36 = vpop.f32.mrb[150].mxu1 }
 0x275   : > { %v1735_v45 = vmax.f32 %v1473_v30, 0.0  ;;  %v1477_v22 = vadd.f32 %v1476_v36, %v6801_v10  ;;  %v1478_v20 = vpop.f32.mrb[151].mxu1 }
 0x276   : > { %2777 = vmatmul.mubr.bf16.gmra.mrb[140].mxu0 %v6953_v49  ;;  %v1736_v49 = vmax.f32 %v1475_v26, 0.0  ;;  %v1479_v57 = vadd.f32 %v1478_v20, %v6806_v46 }
 0x277   : > { %2786 = vmatprep.mubr.bf16.mxu0 %v6965_v25  ;;  %v1739_v25 = vmax.f32 %v1477_v22, 0.0 }
 0x278   : > { %v1740_v40 = vmax.f32 %v1479_v57, 0.0 }
 0x279   : > { %v7134_v44 = vpack.c.bf16 %v1739_v25, %v1735_v45 }
 0x27a   : > { %v7136_v3 = vpack.c.bf16 %v1740_v40, %v1736_v49 }
 0x27b   : > { %v1482_v48 = vpop.f32.mrb[152].mxu1 }
 0x27c   : > { %v1483_v43 = vadd.f32 %v1482_v48, %v6801_v10  ;;  %v1484_v35 = vpop.f32.mrb[153].mxu1 }
 0x27d   : > { %v1485_v47 = vadd.f32 %v1484_v35, %v6806_v46  ;;  %v1486_v28 = vpop.f32.mrb[154].mxu1 }
 0x27e   : > { %2787 = vmatmul.mubr.bf16.gmra.mrb[144].mxu0 %v6963_v21  ;;  %v1743_v8 = vmax.f32 %v1483_v43, 0.0  ;;  %v1487_v18 = vadd.f32 %v1486_v28, %v6801_v10  ;;  %v1488_v37 = vpop.f32.mrb[155].mxu1  ;;  %v5907_v28 = vld [vmem:[%s7967_s7 + $0x10] sm:$0xff]  }
 0x27f   : > { %2796 = vmatprep.mubr.bf16.mxu0 %v6975_v17  ;;  %v1744_v21 = vmax.f32 %v1485_v47, 0.0  ;;  %v1489_v9 = vadd.f32 %v1488_v37, %v6806_v46 }
 0x280   : > { %v1747_v17 = vmax.f32 %v1487_v18, 0.0 }
 0x281   : > { %v1748_v16 = vmax.f32 %v1489_v9, 0.0 }
 0x282   : > { %v7144_v12 = vpack.c.bf16 %v1747_v17, %v1743_v8  ;;  %v5908_v17 = vld [vmem:[%s7967_s7 + $0x18] sm:$0xff]  }
 0x283   : > { %v1492_v11 = vpop.f32.mrb[156].mxu1  ;;  %v7146_v61 = vpack.c.bf16 %v1748_v16, %v1744_v21 }
 0x284   : > { %v1493_v30 = vadd.f32 %v1492_v11, %v6801_v10  ;;  %v1494_v42 = vpop.f32.mrb[157].mxu1 }
 0x285   : > { %v1495_v26 = vadd.f32 %v1494_v42, %v6806_v46  ;;  %v1496_v36 = vpop.f32.mrb[158].mxu1 }
 0x286   : > { %2797 = vmatmul.mubr.bf16.gmra.mrb[148].mxu0 %v6973_v52  ;;  %v1751_v45 = vmax.f32 %v1493_v30, 0.0  ;;  %v1497_v22 = vadd.f32 %v1496_v36, %v6801_v10  ;;  %v1498_v20 = vpop.f32.mrb[159].mxu1  ;;  %v1949_v10 = vld [vmem:[%s7964_s4] sm:$0x3] }
 0x287   : > { %2806 = vmatprep.mubr.bf16.mxu0 %v6985_v63  ;;  %v1752_v52 = vmax.f32 %v1495_v26, 0.0  ;;  %v1499_v49 = vadd.f32 %v1498_v20, %v6806_v46  ;;  %v7185_v46 = vrot.slane %v1949_v10, %v6510_v13 }
 0x288   : > { %v1755_v63 = vmax.f32 %v1497_v22, 0.0  ;;  %v5909_v22 = vld [vmem:[%s7967_s7 + $0x20] sm:$0xff]  }
 0x289   : > { %v1756_v57 = vmax.f32 %v1499_v49, 0.0 }
 0x28a   : > { %v7154_v25 = vpack.c.bf16 %v1755_v63, %v1751_v45 }
 0x28b   : > { %v7156_v40 = vpack.c.bf16 %v1756_v57, %v1752_v52 }
 0x28e   : > { %2807 = vmatmul.mubr.bf16.gmra.mrb[152].mxu0 %v6983_v24  ;;  %v7188_v24 = vrot.slane %v1949_v10, %v6518_v15  ;;  %v5910_v10 = vld [vmem:[%s7967_s7 + $0x28] sm:$0xff]  }
 0x28f   : > { %2816 = vmatprep.mubr.bf16.mxu0 %v6995_v58 }
 0x296   : > { %2817 = vmatmul.mubr.bf16.gmra.mrb[156].mxu0 %v6993_v55 }
 0x297   : > { %2826 = vmatprep.mubr.bf16.mxu0 %v7005_v53 }
 0x29e   : > { %2827 = vmatmul.mubr.bf16.gmra.mrb[160].mxu0 %v7003_v32 }
 0x29f   : > { %2836 = vmatprep.mubr.bf16.mxu0 %v7015_v60 }
 0x2a6   : > { %2837 = vmatmul.mubr.bf16.gmra.mrb[164].mxu0 %v7013_v5 }
 0x2a7   : > { %2846 = vmatprep.mubr.bf16.mxu0 %v7025_v33 }
 0x2ae   : > { %2847 = vmatmul.mubr.bf16.gmra.mrb[168].mxu0 %v7023_v34 }
 0x2af   : > { %2856 = vmatprep.mubr.bf16.mxu0 %v7035_v62 }
 0x2b6   : > { %2857 = vmatmul.mubr.bf16.gmra.mrb[172].mxu0 %v7033_v59 }
 0x2b7   : > { %2866 = vmatprep.mubr.bf16.mxu0 %v7045_v19 }
 0x2be   : > { %2867 = vmatmul.mubr.bf16.gmra.mrb[176].mxu0 %v7043_v56 }
 0x2bf   : > { %2876 = vmatprep.mubr.bf16.mxu0 %v7055_v2 }
 0x2c6   : > { %2877 = vmatmul.mubr.bf16.gmra.mrb[180].mxu0 %v7053_v29 }
 0x2c7   : > { %2886 = vmatprep.mubr.bf16.mxu0 %v7065_v39  ;;  %v5905_v39 = vld [vmem:[%s7967_s7] sm:$0xff]  }
 0x2ce   : > { %2887 = vmatmul.mubr.bf16.gmra.mrb[184].mxu0 %v7063_v27 }
 0x2cf   : > { %2896 = vmatprep.mubr.bf16.mxu0 %v7075_v7 }
 0x2d6   : > { %2897 = vmatmul.mubr.bf16.gmra.mrb[188].mxu0 %v7073_v31 }
 0x2d7   : > { %2906 = vmatprep.mubr.bf16.mxu0 %v7085_v14 }
 0x2de   : > { %2907 = vmatmul.mubr.bf16.gmra.mrb[192].mxu0 %v7083_v41 }
 0x2df   : > { %2916 = vmatprep.mubr.bf16.mxu0 %v7095_v23 }
 0x2e6   : > { %2917 = vmatmul.mubr.bf16.gmra.mrb[196].mxu0 %v7093_v38 }
 0x2e7   : > { %2926 = vmatprep.mubr.bf16.mxu0 %v7105_v6  ;;  %v5906_v6 = vld [vmem:[%s7967_s7 + $0x8] sm:$0xff]  }
 0x2ee   : > { %2927 = vmatmul.mubr.bf16.gmra.mrb[200].mxu0 %v7103_v54 }
 0x2ef   : > { %2936 = vmatprep.mubr.bf16.mxu0 %v7116_v50 }
 0x2f1   : > { %v2668_v55 = vpop.f32.mrb[96].mxu0 }
 0x2f2   : > { %v5406_v58 = vadd.f32 %v2668_v55, %v7185_v46  ;;  %v2670_v32 = vpop.f32.mrb[97].mxu0 }
 0x2f3   : > { %v5407_v53 = vadd.f32 %v2670_v32, %v7188_v24  ;;  %v2672_v5 = vpop.f32.mrb[98].mxu0 }
 0x2f4   : > { %v5408_v60 = vadd.f32 %v2672_v5, %v7185_v46  ;;  %v2674_v34 = vpop.f32.mrb[99].mxu0  ;;  %v2987_v59 = vmax.f32 %v5406_v58, 0.0 }
 0x2f5   : > { %v5409_v33 = vadd.f32 %v2674_v34, %v7188_v24  ;;  %v2988_v56 = vmax.f32 %v5407_v53, 0.0 }
 0x2f6   : > { %v2989_v62 = vmax.f32 %v5408_v60, 0.0  ;;  %2937 = vmatmul.mubr.bf16.gmra.mrb[204].mxu0 %v7114_v51 }
 0x2f7   : > { %v2990_v19 = vmax.f32 %v5409_v33, 0.0  ;;  %2946 = vmatprep.mubr.bf16.mxu0 %v7126_v4  ;;  %v5911_v33 = vld [vmem:[%s7967_s7 + $0x30] sm:$0xff]  }
 0x2f8   : > { %v3115_v29 = vpack.c.bf16 %v2989_v62, %v2987_v59 }
 0x2f9   : > { %v3116_v2 = vpack.c.bf16 %v2990_v19, %v2988_v56  ;;  %v2678_v27 = vpop.f32.mrb[100].mxu0 }
 0x2fa   : > { %v5410_v31 = vadd.f32 %v2678_v27, %v7185_v46  ;;  %v2680_v7 = vpop.f32.mrb[101].mxu0 }
 0x2fb   : > { %v5411_v41 = vadd.f32 %v2680_v7, %v7188_v24  ;;  %v2682_v14 = vpop.f32.mrb[102].mxu0  ;;  %3415 = vmatprep.mubr.bf16.mxu1 %v3116_v2  ;;  %v5912_v2 = vld [vmem:[%s7967_s7 + $0x38] sm:$0xff]  }
 0x2fc   : > { %v5412_v38 = vadd.f32 %v2682_v14, %v7185_v46  ;;  %v2684_v23 = vpop.f32.mrb[103].mxu0  ;;  %3416 = vmatmul.mubr.bf16.vlgmr.msra.gmra.mrb[160].mxu1 %v3115_v29  ;;  %v2991_v51 = vmax.f32 %v5410_v31, 0.0 }
 0x2fd   : > { %v5413_v54 = vadd.f32 %v2684_v23, %v7188_v24  ;;  %4064 = vmatpush1.bf16.msra.mxu1 %v5905_v39  ;;  %v2992_v4 = vmax.f32 %v5411_v41, 0.0  ;;  %v5913_v23 = vld [vmem:[%s7967_s7 + $0x40] sm:$0xff]  }
 0x2fe   : > { %v2993_v50 = vmax.f32 %v5412_v38, 0.0  ;;  %2947 = vmatmul.mubr.bf16.gmra.mrb[208].mxu0 %v7124_v1  ;;  %4065 = vmatprep.subr.bf16.mxu1 %v6032_v0 }
 0x2ff   : > { %v2994_v48 = vmax.f32 %v5413_v54, 0.0  ;;  %2956 = vmatprep.mubr.bf16.mxu0 %v7136_v3 }
 0x300   : > { %v3117_v43 = vpack.c.bf16 %v2993_v50, %v2991_v51 }
 0x301   : > { %v3118_v35 = vpack.c.bf16 %v2994_v48, %v2992_v4  ;;  %v2688_v47 = vpop.f32.mrb[104].mxu0  ;;  %4066 = vmatpush1.bf16.msra.mxu1 %v5906_v6 }
 0x302   : > { %v5414_v8 = vadd.f32 %v2688_v47, %v7185_v46  ;;  %v2690_v18 = vpop.f32.mrb[105].mxu0  ;;  %4067 = vmatprep.subr.bf16.mxu1 %v6032_v0 }
 0x303   : > { %v5415_v1 = vadd.f32 %v2690_v18, %v7188_v24  ;;  %v2692_v37 = vpop.f32.mrb[106].mxu0  ;;  %3425 = vmatprep.mubr.bf16.mxu1 %v3118_v35 }
 0x304   : > { %v5416_v21 = vadd.f32 %v2692_v37, %v7185_v46  ;;  %v2694_v3 = vpop.f32.mrb[107].mxu0  ;;  %3426 = vmatmul.mubr.bf16.gmra.mrb[164].mxu1 %v3117_v43  ;;  %v2995_v16 = vmax.f32 %v5414_v8, 0.0  ;;  %v5914_v43 = vld [vmem:[%s7967_s7 + $0x48] sm:$0xff]  }
 0x305   : > { %v5417_v9 = vadd.f32 %v2694_v3, %v7188_v24  ;;  %4068 = vmatpush1.bf16.msra.mxu1 %v5907_v28  ;;  %v2996_v30 = vmax.f32 %v5415_v1, 0.0 }
 0x306   : > { %v2997_v11 = vmax.f32 %v5416_v21, 0.0  ;;  %2957 = vmatmul.mubr.bf16.gmra.mrb[212].mxu0 %v7134_v44  ;;  %4069 = vmatprep.subr.bf16.mxu1 %v6032_v0  ;;  %v5915_v21 = vld [vmem:[%s7967_s7 + $0x50] sm:$0xff]  }
 0x307   : > { %v2998_v42 = vmax.f32 %v5417_v9, 0.0  ;;  %2966 = vmatprep.mubr.bf16.mxu0 %v7146_v61 }
 0x308   : > { %v3119_v26 = vpack.c.bf16 %v2997_v11, %v2995_v16 }
 0x309   : > { %v3120_v36 = vpack.c.bf16 %v2998_v42, %v2996_v30  ;;  %v2698_v45 = vpop.f32.mrb[108].mxu0  ;;  %4070 = vmatpush1.bf16.msra.mxu1 %v5908_v17 }
 0x30a   : > { %v5418_v20 = vadd.f32 %v2698_v45, %v7185_v46  ;;  %v2700_v52 = vpop.f32.mrb[109].mxu0  ;;  %4071 = vmatprep.subr.bf16.mxu1 %v6032_v0 }
 0x30b   : > { %v5419_v44 = vadd.f32 %v2700_v52, %v7188_v24  ;;  %v2702_v49 = vpop.f32.mrb[110].mxu0  ;;  %3435 = vmatprep.mubr.bf16.mxu1 %v3120_v36 }
 0x30c   : > { %v5420_v63 = vadd.f32 %v2702_v49, %v7185_v46  ;;  %v2704_v61 = vpop.f32.mrb[111].mxu0  ;;  %3436 = vmatmul.mubr.bf16.gmra.mrb[168].mxu1 %v3119_v26  ;;  %v2999_v55 = vmax.f32 %v5418_v20, 0.0 }
 0x30d   : > { %v5421_v57 = vadd.f32 %v2704_v61, %v7188_v24  ;;  %4072 = vmatpush1.bf16.msra.mxu1 %v5909_v22  ;;  %v3000_v32 = vmax.f32 %v5419_v44, 0.0 }
 0x30e   : > { %v3001_v58 = vmax.f32 %v5420_v63, 0.0  ;;  %2967 = vmatmul.mubr.bf16.gmra.mrb[216].mxu0 %v7144_v12  ;;  %4073 = vmatprep.subr.bf16.mxu1 %v6032_v0 }
 0x30f   : > { %v3002_v53 = vmax.f32 %v5421_v57, 0.0  ;;  %2976 = vmatprep.mubr.bf16.mxu0 %v7156_v40 }
 0x310   : > { %v3121_v5 = vpack.c.bf16 %v3001_v58, %v2999_v55 }
 0x311   : > { %v3122_v60 = vpack.c.bf16 %v3002_v53, %v3000_v32  ;;  %v2708_v34 = vpop.f32.mrb[112].mxu0  ;;  %4074 = vmatpush1.bf16.msra.mxu1 %v5910_v10 }
 0x312   : > { %v5422_v59 = vadd.f32 %v2708_v34, %v7185_v46  ;;  %v2710_v62 = vpop.f32.mrb[113].mxu0  ;;  %4075 = vmatprep.subr.bf16.mxu1 %v6032_v0 }
 0x313   : > { %v5423_v12 = vadd.f32 %v2710_v62, %v7188_v24  ;;  %v2712_v56 = vpop.f32.mrb[114].mxu0  ;;  %3445 = vmatprep.mubr.bf16.mxu1 %v3122_v60  ;;  %v5916_v62 = vld [vmem:[%s7967_s7 + $0x58] sm:$0xff]  }
 0x314   : > { %v5424_v19 = vadd.f32 %v2712_v56, %v7185_v46  ;;  %v2714_v40 = vpop.f32.mrb[115].mxu0  ;;  %3446 = vmatmul.mubr.bf16.gmra.mrb[172].mxu1 %v3121_v5  ;;  %v3003_v27 = vmax.f32 %v5422_v59, 0.0 }
 0x315   : > { %v5425_v29 = vadd.f32 %v2714_v40, %v7188_v24  ;;  %4076 = vmatpush1.bf16.msra.mxu1 %v5911_v33  ;;  %v3004_v31 = vmax.f32 %v5423_v12, 0.0 }
 0x316   : > { %v3005_v39 = vmax.f32 %v5424_v19, 0.0  ;;  %2977 = vmatmul.mubr.bf16.gmra.mrb[220].mxu0 %v7154_v25  ;;  %4077 = vmatprep.subr.bf16.mxu1 %v6032_v0 }
 0x317   : > { %v3006_v7 = vmax.f32 %v5425_v29, 0.0 }
 0x318   : > { %v3123_v41 = vpack.c.bf16 %v3005_v39, %v3003_v27 }
 0x319   : > { %v3124_v14 = vpack.c.bf16 %v3006_v7, %v3004_v31  ;;  %v2718_v38 = vpop.f32.mrb[116].mxu0  ;;  %4078 = vmatpush1.bf16.msra.mxu1 %v5912_v2 }
 0x31a   : > { %v5426_v54 = vadd.f32 %v2718_v38, %v7185_v46  ;;  %v2720_v6 = vpop.f32.mrb[117].mxu0  ;;  %4079 = vmatprep.subr.bf16.mxu1 %v6032_v0 }
 0x31b   : > { %v5427_v51 = vadd.f32 %v2720_v6, %v7188_v24  ;;  %v2722_v25 = vpop.f32.mrb[118].mxu0  ;;  %3455 = vmatprep.mubr.bf16.mxu1 %v3124_v14 }
 0x31c   : > { %v5428_v50 = vadd.f32 %v2722_v25, %v7185_v46  ;;  %v2724_v4 = vpop.f32.mrb[119].mxu0  ;;  %3456 = vmatmul.mubr.bf16.gmra.mrb[176].mxu1 %v3123_v41  ;;  %v3007_v35 = vmax.f32 %v5426_v54, 0.0 }
 0x31d   : > { %v5429_v48 = vadd.f32 %v2724_v4, %v7188_v24  ;;  %4080 = vmatpush1.bf16.msra.mxu1 %v5913_v23  ;;  %v3008_v28 = vmax.f32 %v5427_v51, 0.0 }
 0x31e   : > { %v3009_v47 = vmax.f32 %v5428_v50, 0.0  ;;  %4081 = vmatprep.subr.bf16.mxu1 %v6032_v0 }
 0x31f   : > { %v3010_v8 = vmax.f32 %v5429_v48, 0.0 }
 0x320   : > { %v3125_v18 = vpack.c.bf16 %v3009_v47, %v3007_v35 }
 0x321   : > { %v3126_v1 = vpack.c.bf16 %v3010_v8, %v3008_v28  ;;  %v2728_v37 = vpop.f32.mrb[120].mxu0  ;;  %4082 = vmatpush1.bf16.msra.mxu1 %v5914_v43 }
 0x322   : > { %v5430_v3 = vadd.f32 %v2728_v37, %v7185_v46  ;;  %v2730_v9 = vpop.f32.mrb[121].mxu0  ;;  %4083 = vmatprep.subr.bf16.mxu1 %v6032_v0  ;;  %v5917_v37 = vld [vmem:[%s7967_s7 + $0x60] sm:$0xff]  }
 0x323   : > { %v5431_v17 = vadd.f32 %v2730_v9, %v7188_v24  ;;  %v2732_v16 = vpop.f32.mrb[122].mxu0  ;;  %3465 = vmatprep.mubr.bf16.mxu1 %v3126_v1 }
 0x324   : > { %v5432_v11 = vadd.f32 %v2732_v16, %v7185_v46  ;;  %v2734_v30 = vpop.f32.mrb[123].mxu0  ;;  %3466 = vmatmul.mubr.bf16.gmra.mrb[180].mxu1 %v3125_v18  ;;  %v3011_v26 = vmax.f32 %v5430_v3, 0.0 }
 0x325   : > { %v5433_v42 = vadd.f32 %v2734_v30, %v7188_v24  ;;  %4084 = vmatpush1.bf16.msra.mxu1 %v5915_v21  ;;  %v3012_v45 = vmax.f32 %v5431_v17, 0.0 }
 0x326   : > { %v3013_v36 = vmax.f32 %v5432_v11, 0.0  ;;  %4085 = vmatprep.subr.bf16.mxu1 %v6032_v0 }
 0x327   : > { %v3014_v22 = vmax.f32 %v5433_v42, 0.0 }
 0x328   : > { %v3127_v20 = vpack.c.bf16 %v3013_v36, %v3011_v26 }
 0x329   : > { %v3128_v52 = vpack.c.bf16 %v3014_v22, %v3012_v45  ;;  %v2738_v44 = vpop.f32.mrb[124].mxu0  ;;  %4086 = vmatpush1.bf16.msra.mxu1 %v5916_v62 }
 0x32a   : > { %v5434_v49 = vadd.f32 %v2738_v44, %v7185_v46  ;;  %v2740_v63 = vpop.f32.mrb[125].mxu0  ;;  %4087 = vmatprep.subr.bf16.mxu1 %v6032_v0 }
 0x32b   : > { %v5435_v61 = vadd.f32 %v2740_v63, %v7188_v24  ;;  %v2742_v57 = vpop.f32.mrb[126].mxu0  ;;  %3475 = vmatprep.mubr.bf16.mxu1 %v3128_v52 }
 0x32c   : > { %v5436_v10 = vadd.f32 %v2742_v57, %v7185_v46  ;;  %v2744_v55 = vpop.f32.mrb[127].mxu0  ;;  %3476 = vmatmul.mubr.bf16.gmra.mrb[184].mxu1 %v3127_v20  ;;  %v3015_v32 = vmax.f32 %v5434_v49, 0.0 }
 0x32d   : > { %v5437_v58 = vadd.f32 %v2744_v55, %v7188_v24  ;;  %v3016_v5 = vmax.f32 %v5435_v61, 0.0  ;;  %4088 = vmatpush1.bf16.msra.mxu1 %v5917_v37 }
 0x32e   : > { %v3017_v53 = vmax.f32 %v5436_v10, 0.0  ;;  %4089 = vmatprep.subr.bf16.mxu1 %v6032_v0 }
 0x32f   : > { %v3018_v60 = vmax.f32 %v5437_v58, 0.0 }
 0x330   : > { %v3129_v34 = vpack.c.bf16 %v3017_v53, %v3015_v32 }
 0x331   : > { %v3130_v33 = vpack.c.bf16 %v3018_v60, %v3016_v5  ;;  %v2748_v59 = vpop.f32.mrb[128].mxu0 }
 0x332   : > { %v5438_v12 = vadd.f32 %v2748_v59, %v7185_v46  ;;  %v2750_v56 = vpop.f32.mrb[129].mxu0  ;;  %v5918_v59 = vld [vmem:[%s7967_s7 + $0x68] sm:$0xff]  }
 0x333   : > { %v5439_v19 = vadd.f32 %v2750_v56, %v7188_v24  ;;  %v2752_v40 = vpop.f32.mrb[130].mxu0  ;;  %3485 = vmatprep.mubr.bf16.mxu1 %v3130_v33  ;;  %4090 = vmatpush1.bf16.msra.mxu1 %v5918_v59 }
 0x334   : > { %v5440_v29 = vadd.f32 %v2752_v40, %v7185_v46  ;;  %v2754_v2 = vpop.f32.mrb[131].mxu0  ;;  %3486 = vmatmul.mubr.bf16.gmra.mrb[188].mxu1 %v3129_v34  ;;  %v3019_v39 = vmax.f32 %v5438_v12, 0.0  ;;  %4091 = vmatprep.subr.bf16.mxu1 %v6032_v0 }
 0x335   : > { %v5441_v27 = vadd.f32 %v2754_v2, %v7188_v24  ;;  %v3020_v7 = vmax.f32 %v5439_v19, 0.0 }
 0x336   : > { %v3021_v31 = vmax.f32 %v5440_v29, 0.0 }
 0x337   : > { %v3022_v41 = vmax.f32 %v5441_v27, 0.0 }
 0x338   : > { %v3131_v14 = vpack.c.bf16 %v3021_v31, %v3019_v39 }
 0x339   : > { %v3132_v38 = vpack.c.bf16 %v3022_v41, %v3020_v7  ;;  %v2758_v23 = vpop.f32.mrb[132].mxu0 }
 0x33a   : > { %v5442_v54 = vadd.f32 %v2758_v23, %v7185_v46  ;;  %v2760_v6 = vpop.f32.mrb[133].mxu0 }
 0x33b   : > { %v5443_v51 = vadd.f32 %v2760_v6, %v7188_v24  ;;  %v2762_v25 = vpop.f32.mrb[134].mxu0  ;;  %3495 = vmatprep.mubr.bf16.mxu1 %v3132_v38 }
 0x33c   : > { %v5444_v50 = vadd.f32 %v2762_v25, %v7185_v46  ;;  %v2764_v4 = vpop.f32.mrb[135].mxu0  ;;  %3496 = vmatmul.mubr.bf16.gmra.mrb[192].mxu1 %v3131_v14  ;;  %v3023_v43 = vmax.f32 %v5442_v54, 0.0 }
 0x33d   : > { %v5445_v48 = vadd.f32 %v2764_v4, %v7188_v24  ;;  %v3024_v47 = vmax.f32 %v5443_v51, 0.0 }
 0x33e   : > { %v3025_v35 = vmax.f32 %v5444_v50, 0.0 }
 0x33f   : > { %v3026_v28 = vmax.f32 %v5445_v48, 0.0 }
 0x340   : > { %v3133_v8 = vpack.c.bf16 %v3025_v35, %v3023_v43 }
 0x341   : > { %v3134_v18 = vpack.c.bf16 %v3026_v28, %v3024_v47  ;;  %v2768_v1 = vpop.f32.mrb[136].mxu0 }
 0x342   : > { %v5446_v21 = vadd.f32 %v2768_v1, %v7185_v46  ;;  %v2770_v3 = vpop.f32.mrb[137].mxu0  ;;  %v5919_v1 = vld [vmem:[%s7967_s7 + $0x70] sm:$0xff]  }
 0x343   : > { %v5447_v9 = vadd.f32 %v2770_v3, %v7188_v24  ;;  %v2772_v17 = vpop.f32.mrb[138].mxu0  ;;  %3505 = vmatprep.mubr.bf16.mxu1 %v3134_v18  ;;  %4092 = vmatpush1.bf16.msra.mxu1 %v5919_v1 }
 0x344   : > { %v5448_v16 = vadd.f32 %v2772_v17, %v7185_v46  ;;  %v2774_v11 = vpop.f32.mrb[139].mxu0  ;;  %3506 = vmatmul.mubr.bf16.gmra.mrb[196].mxu1 %v3133_v8  ;;  %v3027_v42 = vmax.f32 %v5446_v21, 0.0  ;;  %4093 = vmatprep.subr.bf16.mxu1 %v6032_v0 }
 0x345   : > { %v5449_v30 = vadd.f32 %v2774_v11, %v7188_v24  ;;  %v3028_v36 = vmax.f32 %v5447_v9, 0.0 }
 0x346   : > { %v3029_v26 = vmax.f32 %v5448_v16, 0.0 }
 0x347   : > { %v3030_v45 = vmax.f32 %v5449_v30, 0.0 }
 0x348   : > { %v3135_v22 = vpack.c.bf16 %v3029_v26, %v3027_v42 }
 0x349   : > { %v3136_v20 = vpack.c.bf16 %v3030_v45, %v3028_v36  ;;  %v2778_v52 = vpop.f32.mrb[140].mxu0 }
 0x34a   : > { %v5450_v44 = vadd.f32 %v2778_v52, %v7185_v46  ;;  %v2780_v49 = vpop.f32.mrb[141].mxu0 }
 0x34b   : > { %v5451_v63 = vadd.f32 %v2780_v49, %v7188_v24  ;;  %v2782_v61 = vpop.f32.mrb[142].mxu0  ;;  %3515 = vmatprep.mubr.bf16.mxu1 %v3136_v20 }
 0x34c   : > { %v5452_v57 = vadd.f32 %v2782_v61, %v7185_v46  ;;  %v2784_v10 = vpop.f32.mrb[143].mxu0  ;;  %3516 = vmatmul.mubr.bf16.gmra.mrb[200].mxu1 %v3135_v22  ;;  %v3031_v58 = vmax.f32 %v5450_v44, 0.0 }
 0x34d   : > { %v5453_v55 = vadd.f32 %v2784_v10, %v7188_v24  ;;  %v3032_v53 = vmax.f32 %v5451_v63, 0.0 }
 0x34e   : > { %v3033_v32 = vmax.f32 %v5452_v57, 0.0 }
 0x34f   : > { %v3034_v5 = vmax.f32 %v5453_v55, 0.0 }
 0x350   : > { %v3137_v60 = vpack.c.bf16 %v3033_v32, %v3031_v58 }
 0x351   : > { %v3138_v34 = vpack.c.bf16 %v3034_v5, %v3032_v53  ;;  %v2788_v33 = vpop.f32.mrb[144].mxu0 }
 0x352   : > { %v5454_v62 = vadd.f32 %v2788_v33, %v7185_v46  ;;  %v2790_v12 = vpop.f32.mrb[145].mxu0 }
 0x353   : > { %v5455_v56 = vadd.f32 %v2790_v12, %v7188_v24  ;;  %v2792_v19 = vpop.f32.mrb[146].mxu0  ;;  %3525 = vmatprep.mubr.bf16.mxu1 %v3138_v34  ;;  %v5920_v34 = vld [vmem:[%s7967_s7 + $0x78] sm:$0xff]  }
 0x354   : > { %v5456_v40 = vadd.f32 %v2792_v19, %v7185_v46  ;;  %v2794_v29 = vpop.f32.mrb[147].mxu0  ;;  %3526 = vmatmul.mubr.bf16.gmra.mrb[204].mxu1 %v3137_v60  ;;  %v3035_v27 = vmax.f32 %v5454_v62, 0.0 }
 0x355   : > { %v5457_v2 = vadd.f32 %v2794_v29, %v7188_v24  ;;  %v3036_v31 = vmax.f32 %v5455_v56, 0.0  ;;  %4094 = vmatpush1.bf16.msra.mxu1 %v5920_v34 }
 0x356   : > { %v3037_v39 = vmax.f32 %v5456_v40, 0.0 }
 0x357   : > { %v3038_v7 = vmax.f32 %v5457_v2, 0.0 }
 0x358   : > { %v3139_v41 = vpack.c.bf16 %v3037_v39, %v3035_v27 }
 0x359   : > { %v3140_v14 = vpack.c.bf16 %v3038_v7, %v3036_v31  ;;  %v2798_v38 = vpop.f32.mrb[148].mxu0 }
 0x35a   : > { %v5458_v23 = vadd.f32 %v2798_v38, %v7185_v46  ;;  %v2800_v54 = vpop.f32.mrb[149].mxu0 }
 0x35b   : > { %v5459_v6 = vadd.f32 %v2800_v54, %v7188_v24  ;;  %v2802_v51 = vpop.f32.mrb[150].mxu0  ;;  %3535 = vmatprep.mubr.bf16.mxu1 %v3140_v14 }
 0x35c   : > { %v5460_v25 = vadd.f32 %v2802_v51, %v7185_v46  ;;  %v2804_v50 = vpop.f32.mrb[151].mxu0  ;;  %3536 = vmatmul.mubr.bf16.gmra.mrb[208].mxu1 %v3139_v41  ;;  %v3039_v48 = vmax.f32 %v5458_v23, 0.0 }
 0x35d   : > { %v5461_v4 = vadd.f32 %v2804_v50, %v7188_v24  ;;  %v3040_v35 = vmax.f32 %v5459_v6, 0.0 }
 0x35e   : > { %v3041_v43 = vmax.f32 %v5460_v25, 0.0 }
 0x35f   : > { %v3042_v47 = vmax.f32 %v5461_v4, 0.0 }
 0x360   : > { %v3141_v28 = vpack.c.bf16 %v3041_v43, %v3039_v48 }
 0x361   : > { %v3142_v8 = vpack.c.bf16 %v3042_v47, %v3040_v35  ;;  %v2808_v18 = vpop.f32.mrb[152].mxu0 }
 0x362   : > { %v5462_v37 = vadd.f32 %v2808_v18, %v7185_v46  ;;  %v2810_v21 = vpop.f32.mrb[153].mxu0 }
 0x363   : > { %v5463_v3 = vadd.f32 %v2810_v21, %v7188_v24  ;;  %v2812_v9 = vpop.f32.mrb[154].mxu0  ;;  %3545 = vmatprep.mubr.bf16.mxu1 %v3142_v8 }
 0x364   : > { %v5464_v17 = vadd.f32 %v2812_v9, %v7185_v46  ;;  %v2814_v16 = vpop.f32.mrb[155].mxu0  ;;  %3546 = vmatmul.mubr.bf16.gmra.mrb[212].mxu1 %v3141_v28  ;;  %v3043_v30 = vmax.f32 %v5462_v37, 0.0 }
 0x365   : > { %v5465_v11 = vadd.f32 %v2814_v16, %v7188_v24  ;;  %v3044_v26 = vmax.f32 %v5463_v3, 0.0 }
 0x366   : > { %v3045_v42 = vmax.f32 %v5464_v17, 0.0 }
 0x367   : > { %v3046_v36 = vmax.f32 %v5465_v11, 0.0 }
 0x368   : > { %v3143_v45 = vpack.c.bf16 %v3045_v42, %v3043_v30 }
 0x369   : > { %v3144_v22 = vpack.c.bf16 %v3046_v36, %v3044_v26  ;;  %v2818_v20 = vpop.f32.mrb[156].mxu0 }
 0x36a   : > { %v5466_v52 = vadd.f32 %v2818_v20, %v7185_v46  ;;  %v2820_v44 = vpop.f32.mrb[157].mxu0 }
 0x36b   : > { %v5467_v49 = vadd.f32 %v2820_v44, %v7188_v24  ;;  %v2822_v63 = vpop.f32.mrb[158].mxu0  ;;  %3555 = vmatprep.mubr.bf16.mxu1 %v3144_v22 }
 0x36c   : > { %v5468_v61 = vadd.f32 %v2822_v63, %v7185_v46  ;;  %v2824_v57 = vpop.f32.mrb[159].mxu0  ;;  %3556 = vmatmul.mubr.bf16.gmra.mrb[216].mxu1 %v3143_v45  ;;  %v3047_v10 = vmax.f32 %v5466_v52, 0.0 }
 0x36d   : > { %v5469_v0 = vadd.f32 %v2824_v57, %v7188_v24  ;;  %v3048_v58 = vmax.f32 %v5467_v49, 0.0 }
 0x36e   : > { %v3049_v55 = vmax.f32 %v5468_v61, 0.0 }
 0x36f   : > { %v3050_v32 = vmax.f32 %v5469_v0, 0.0 }
 0x370   : > { %v3145_v53 = vpack.c.bf16 %v3049_v55, %v3047_v10 }
 0x371   : > { %v3146_v5 = vpack.c.bf16 %v3050_v32, %v3048_v58  ;;  %v2828_v60 = vpop.f32.mrb[160].mxu0 }
 0x372   : > { %v5470_v33 = vadd.f32 %v2828_v60, %v7185_v46  ;;  %v2830_v59 = vpop.f32.mrb[161].mxu0 }
 0x373   : > { %v5471_v62 = vadd.f32 %v2830_v59, %v7188_v24  ;;  %v2832_v12 = vpop.f32.mrb[162].mxu0  ;;  %3565 = vmatprep.mubr.bf16.mxu1 %v3146_v5 }
 0x374   : > { %v5472_v56 = vadd.f32 %v2832_v12, %v7185_v46  ;;  %v2834_v19 = vpop.f32.mrb[163].mxu0  ;;  %3566 = vmatmul.mubr.bf16.gmra.mrb[220].mxu1 %v3145_v53  ;;  %v3051_v29 = vmax.f32 %v5470_v33, 0.0 }
 0x375   : > { %v5473_v40 = vadd.f32 %v2834_v19, %v7188_v24  ;;  %v3052_v27 = vmax.f32 %v5471_v62, 0.0 }
 0x376   : > { %v3053_v2 = vmax.f32 %v5472_v56, 0.0 }
 0x377   : > { %v3054_v39 = vmax.f32 %v5473_v40, 0.0 }
 0x378   : > { %v3147_v31 = vpack.c.bf16 %v3053_v2, %v3051_v29 }
 0x379   : > { %v3148_v7 = vpack.c.bf16 %v3054_v39, %v3052_v27  ;;  %v2838_v41 = vpop.f32.mrb[164].mxu0 }
 0x37a   : > { %v5474_v14 = vadd.f32 %v2838_v41, %v7185_v46  ;;  %v2840_v38 = vpop.f32.mrb[165].mxu0 }
 0x37b   : > { %v5475_v23 = vadd.f32 %v2840_v38, %v7188_v24  ;;  %v2842_v54 = vpop.f32.mrb[166].mxu0  ;;  %3575 = vmatprep.mubr.bf16.mxu1 %v3148_v7 }
 0x37c   : > { %v5476_v6 = vadd.f32 %v2842_v54, %v7185_v46  ;;  %v2844_v51 = vpop.f32.mrb[167].mxu0  ;;  %3576 = vmatmul.mubr.bf16.gmra.mrb[224].mxu1 %v3147_v31  ;;  %v3055_v50 = vmax.f32 %v5474_v14, 0.0 }
 0x37d   : > { %v5477_v25 = vadd.f32 %v2844_v51, %v7188_v24  ;;  %v3056_v48 = vmax.f32 %v5475_v23, 0.0 }
 0x37e   : > { %v3057_v4 = vmax.f32 %v5476_v6, 0.0 }
 0x37f   : > { %v3058_v43 = vmax.f32 %v5477_v25, 0.0 }
 0x380   : > { %v3149_v35 = vpack.c.bf16 %v3057_v4, %v3055_v50 }
 0x381   : > { %v3150_v47 = vpack.c.bf16 %v3058_v43, %v3056_v48  ;;  %v2848_v28 = vpop.f32.mrb[168].mxu0 }
 0x382   : > { %v5478_v8 = vadd.f32 %v2848_v28, %v7185_v46  ;;  %v2850_v18 = vpop.f32.mrb[169].mxu0 }
 0x383   : > { %v5479_v1 = vadd.f32 %v2850_v18, %v7188_v24  ;;  %v2852_v37 = vpop.f32.mrb[170].mxu0  ;;  %3585 = vmatprep.mubr.bf16.mxu1 %v3150_v47 }
 0x384   : > { %v5480_v21 = vadd.f32 %v2852_v37, %v7185_v46  ;;  %v2854_v3 = vpop.f32.mrb[171].mxu0  ;;  %3586 = vmatmul.mubr.bf16.gmra.mrb[228].mxu1 %v3149_v35  ;;  %v3059_v17 = vmax.f32 %v5478_v8, 0.0 }
 0x385   : > { %v5481_v9 = vadd.f32 %v2854_v3, %v7188_v24  ;;  %v3060_v11 = vmax.f32 %v5479_v1, 0.0 }
 0x386   : > { %v3061_v16 = vmax.f32 %v5480_v21, 0.0 }
 0x387   : > { %v3062_v30 = vmax.f32 %v5481_v9, 0.0 }
 0x388   : > { %v3151_v42 = vpack.c.bf16 %v3061_v16, %v3059_v17 }
 0x389   : > { %v3152_v26 = vpack.c.bf16 %v3062_v30, %v3060_v11  ;;  %v2858_v36 = vpop.f32.mrb[172].mxu0 }
 0x38a   : > { %v5482_v45 = vadd.f32 %v2858_v36, %v7185_v46  ;;  %v2860_v22 = vpop.f32.mrb[173].mxu0 }
 0x38b   : > { %v5483_v20 = vadd.f32 %v2860_v22, %v7188_v24  ;;  %v2862_v52 = vpop.f32.mrb[174].mxu0  ;;  %3595 = vmatprep.mubr.bf16.mxu1 %v3152_v26 }
 0x38c   : > { %v5484_v44 = vadd.f32 %v2862_v52, %v7185_v46  ;;  %v2864_v49 = vpop.f32.mrb[175].mxu0  ;;  %3596 = vmatmul.mubr.bf16.gmra.mrb[232].mxu1 %v3151_v42  ;;  %v3063_v61 = vmax.f32 %v5482_v45, 0.0 }
 0x38d   : > { %v5485_v63 = vadd.f32 %v2864_v49, %v7188_v24  ;;  %v3064_v0 = vmax.f32 %v5483_v20, 0.0 }
 0x38e   : > { %v3065_v57 = vmax.f32 %v5484_v44, 0.0 }
 0x38f   : > { %v3066_v10 = vmax.f32 %v5485_v63, 0.0 }
 0x390   : > { %v3153_v55 = vpack.c.bf16 %v3065_v57, %v3063_v61 }
 0x391   : > { %v3154_v58 = vpack.c.bf16 %v3066_v10, %v3064_v0  ;;  %v2868_v32 = vpop.f32.mrb[176].mxu0 }
 0x392   : > { %v5486_v53 = vadd.f32 %v2868_v32, %v7185_v46  ;;  %v2870_v5 = vpop.f32.mrb[177].mxu0 }
 0x393   : > { %v5487_v60 = vadd.f32 %v2870_v5, %v7188_v24  ;;  %v2872_v34 = vpop.f32.mrb[178].mxu0  ;;  %3605 = vmatprep.mubr.bf16.mxu1 %v3154_v58 }
 0x394   : > { %v5488_v33 = vadd.f32 %v2872_v34, %v7185_v46  ;;  %v2874_v59 = vpop.f32.mrb[179].mxu0  ;;  %3606 = vmatmul.mubr.bf16.gmra.mrb[236].mxu1 %v3153_v55  ;;  %v3067_v12 = vmax.f32 %v5486_v53, 0.0 }
 0x395   : > { %v5489_v62 = vadd.f32 %v2874_v59, %v7188_v24  ;;  %v3068_v19 = vmax.f32 %v5487_v60, 0.0 }
 0x396   : > { %v3069_v56 = vmax.f32 %v5488_v33, 0.0 }
 0x397   : > { %v3070_v40 = vmax.f32 %v5489_v62, 0.0 }
 0x398   : > { %v3155_v29 = vpack.c.bf16 %v3069_v56, %v3067_v12 }
 0x399   : > { %v3156_v2 = vpack.c.bf16 %v3070_v40, %v3068_v19  ;;  %v2878_v27 = vpop.f32.mrb[180].mxu0 }
 0x39a   : > { %v5490_v39 = vadd.f32 %v2878_v27, %v7185_v46  ;;  %v2880_v31 = vpop.f32.mrb[181].mxu0 }
 0x39b   : > { %v5491_v7 = vadd.f32 %v2880_v31, %v7188_v24  ;;  %v2882_v41 = vpop.f32.mrb[182].mxu0  ;;  %3615 = vmatprep.mubr.bf16.mxu1 %v3156_v2 }
 0x39c   : > { %v5492_v14 = vadd.f32 %v2882_v41, %v7185_v46  ;;  %v2884_v38 = vpop.f32.mrb[183].mxu0  ;;  %3616 = vmatmul.mubr.bf16.gmra.mrb[240].mxu1 %v3155_v29  ;;  %v3071_v54 = vmax.f32 %v5490_v39, 0.0 }
 0x39d   : > { %v5493_v23 = vadd.f32 %v2884_v38, %v7188_v24  ;;  %v3072_v51 = vmax.f32 %v5491_v7, 0.0 }
 0x39e   : > { %v3073_v6 = vmax.f32 %v5492_v14, 0.0 }
 0x39f   : > { %v3074_v25 = vmax.f32 %v5493_v23, 0.0 }
 0x3a0   : > { %v3157_v50 = vpack.c.bf16 %v3073_v6, %v3071_v54 }
 0x3a1   : > { %v3158_v4 = vpack.c.bf16 %v3074_v25, %v3072_v51  ;;  %v2888_v48 = vpop.f32.mrb[184].mxu0 }
 0x3a2   : > { %v5494_v43 = vadd.f32 %v2888_v48, %v7185_v46  ;;  %v2890_v35 = vpop.f32.mrb[185].mxu0 }
 0x3a3   : > { %v5495_v47 = vadd.f32 %v2890_v35, %v7188_v24  ;;  %v2892_v28 = vpop.f32.mrb[186].mxu0  ;;  %3625 = vmatprep.mubr.bf16.mxu1 %v3158_v4 }
 0x3a4   : > { %v5496_v8 = vadd.f32 %v2892_v28, %v7185_v46  ;;  %v2894_v18 = vpop.f32.mrb[187].mxu0  ;;  %3626 = vmatmul.mubr.bf16.gmra.mrb[244].mxu1 %v3157_v50  ;;  %v3075_v37 = vmax.f32 %v5494_v43, 0.0 }
 0x3a5   : > { %v5497_v1 = vadd.f32 %v2894_v18, %v7188_v24  ;;  %v3076_v3 = vmax.f32 %v5495_v47, 0.0 }
 0x3a6   : > { %v3077_v21 = vmax.f32 %v5496_v8, 0.0 }
 0x3a7   : > { %v3078_v9 = vmax.f32 %v5497_v1, 0.0 }
 0x3a8   : > { %v3159_v17 = vpack.c.bf16 %v3077_v21, %v3075_v37 }
 0x3a9   : > { %v3160_v16 = vpack.c.bf16 %v3078_v9, %v3076_v3  ;;  %v2898_v11 = vpop.f32.mrb[188].mxu0  ;;  %v3211_v9 = vld [vmem:[%s7966_s6] sm:$0x3] }
 0x3aa   : > { %v5498_v30 = vadd.f32 %v2898_v11, %v7185_v46  ;;  %v2900_v42 = vpop.f32.mrb[189].mxu0 }
 0x3ab   : > { %v5499_v26 = vadd.f32 %v2900_v42, %v7188_v24  ;;  %v2902_v36 = vpop.f32.mrb[190].mxu0  ;;  %3635 = vmatprep.mubr.bf16.mxu1 %v3160_v16 }
 0x3ac   : > { %v5500_v45 = vadd.f32 %v2902_v36, %v7185_v46  ;;  %v2904_v22 = vpop.f32.mrb[191].mxu0  ;;  %3636 = vmatmul.mubr.bf16.gmra.mrb[248].mxu1 %v3159_v17  ;;  %v3079_v52 = vmax.f32 %v5498_v30, 0.0  ;;  %v7378_v36 = vrot.slane %v3211_v9, %v6510_v13 }
 0x3ad   : > { %v5501_v20 = vadd.f32 %v2904_v22, %v7188_v24  ;;  %v3080_v49 = vmax.f32 %v5499_v26, 0.0  ;;  %v7382_v22 = vrot.slane %v3211_v9, %v6518_v15 }
 0x3ae   : > { %v3081_v44 = vmax.f32 %v5500_v45, 0.0 }
 0x3af   : > { %v3082_v63 = vmax.f32 %v5501_v20, 0.0 }
 0x3b0   : > { %v3161_v61 = vpack.c.bf16 %v3081_v44, %v3079_v52 }
 0x3b1   : > { %v3162_v57 = vpack.c.bf16 %v3082_v63, %v3080_v49  ;;  %v2908_v0 = vpop.f32.mrb[192].mxu0 }
 0x3b2   : > { %v5502_v10 = vadd.f32 %v2908_v0, %v7185_v46  ;;  %v2910_v55 = vpop.f32.mrb[193].mxu0 }
 0x3b3   : > { %v5503_v58 = vadd.f32 %v2910_v55, %v7188_v24  ;;  %v2912_v32 = vpop.f32.mrb[194].mxu0  ;;  %3645 = vmatprep.mubr.bf16.mxu1 %v3162_v57 }
 0x3b4   : > { %v5504_v53 = vadd.f32 %v2912_v32, %v7185_v46  ;;  %v2914_v5 = vpop.f32.mrb[195].mxu0  ;;  %3646 = vmatmul.mubr.bf16.gmra.mrb[252].mxu1 %v3161_v61  ;;  %v3083_v34 = vmax.f32 %v5502_v10, 0.0 }
 0x3b5   : > { %v5505_v60 = vadd.f32 %v2914_v5, %v7188_v24  ;;  %v3084_v59 = vmax.f32 %v5503_v58, 0.0 }
 0x3b6   : > { %v3085_v33 = vmax.f32 %v5504_v53, 0.0 }
 0x3b7   : > { %v3086_v62 = vmax.f32 %v5505_v60, 0.0 }
 0x3b8   : > { %v3163_v12 = vpack.c.bf16 %v3085_v33, %v3083_v34 }
 0x3b9   : > { %v3164_v56 = vpack.c.bf16 %v3086_v62, %v3084_v59  ;;  %v2918_v19 = vpop.f32.mrb[196].mxu0 }
 0x3ba   : > { %v5506_v40 = vadd.f32 %v2918_v19, %v7185_v46  ;;  %v2920_v29 = vpop.f32.mrb[197].mxu0 }
 0x3bb   : > { %v5507_v2 = vadd.f32 %v2920_v29, %v7188_v24  ;;  %v2922_v27 = vpop.f32.mrb[198].mxu0  ;;  %3655 = vmatprep.mubr.bf16.mxu1 %v3164_v56 }
 0x3bc   : > { %v5508_v39 = vadd.f32 %v2922_v27, %v7185_v46  ;;  %v2924_v31 = vpop.f32.mrb[199].mxu0  ;;  %3656 = vmatmul.mubr.bf16.gmra.mrb[0].mxu1 %v3163_v12  ;;  %v3087_v41 = vmax.f32 %v5506_v40, 0.0 }
 0x3bd   : > { %v5509_v7 = vadd.f32 %v2924_v31, %v7188_v24  ;;  %v3088_v38 = vmax.f32 %v5507_v2, 0.0 }
 0x3be   : > { %v3089_v14 = vmax.f32 %v5508_v39, 0.0 }
 0x3bf   : > { %v3090_v23 = vmax.f32 %v5509_v7, 0.0 }
 0x3c0   : > { %v3165_v54 = vpack.c.bf16 %v3089_v14, %v3087_v41 }
 0x3c1   : > { %v3166_v6 = vpack.c.bf16 %v3090_v23, %v3088_v38  ;;  %v2928_v51 = vpop.f32.mrb[200].mxu0 }
 0x3c2   : > { %v5510_v25 = vadd.f32 %v2928_v51, %v7185_v46  ;;  %v2930_v50 = vpop.f32.mrb[201].mxu0 }
 0x3c3   : > { %v5511_v4 = vadd.f32 %v2930_v50, %v7188_v24  ;;  %v2932_v48 = vpop.f32.mrb[202].mxu0  ;;  %3665 = vmatprep.mubr.bf16.mxu1 %v3166_v6 }
 0x3c4   : > { %v5512_v43 = vadd.f32 %v2932_v48, %v7185_v46  ;;  %v2934_v35 = vpop.f32.mrb[203].mxu0  ;;  %3666 = vmatmul.mubr.bf16.gmra.mrb[4].mxu1 %v3165_v54  ;;  %v3091_v28 = vmax.f32 %v5510_v25, 0.0 }
 0x3c5   : > { %v5513_v47 = vadd.f32 %v2934_v35, %v7188_v24  ;;  %v3092_v18 = vmax.f32 %v5511_v4, 0.0 }
 0x3c6   : > { %v3093_v8 = vmax.f32 %v5512_v43, 0.0 }
 0x3c7   : > { %v3094_v1 = vmax.f32 %v5513_v47, 0.0  ;;  %v5921_v47 = vld [vmem:[%s7969_s9] sm:$0xff]  }
 0x3c8   : > { %v3167_v37 = vpack.c.bf16 %v3093_v8, %v3091_v28  ;;  %5330 = vmatprep.subr.bf16.mxu0 %v5921_v47 }
 0x3c9   : > { %v3168_v21 = vpack.c.bf16 %v3094_v1, %v3092_v18  ;;  %v2938_v3 = vpop.f32.mrb[204].mxu0  ;;  %5331 = vmatpush3.bf16.msra.mxu0 %v5921_v47 }
 0x3ca   : > { %v5514_v17 = vadd.f32 %v2938_v3, %v7185_v46  ;;  %v2940_v16 = vpop.f32.mrb[205].mxu0 }
 0x3cb   : > { %v5515_v11 = vadd.f32 %v2940_v16, %v7188_v24  ;;  %v2942_v30 = vpop.f32.mrb[206].mxu0  ;;  %3675 = vmatprep.mubr.bf16.mxu1 %v3168_v21 }
 0x3cc   : > { %v5516_v42 = vadd.f32 %v2942_v30, %v7185_v46  ;;  %v2944_v26 = vpop.f32.mrb[207].mxu0  ;;  %3676 = vmatmul.mubr.bf16.gmra.mrb[8].mxu1 %v3167_v37  ;;  %v3095_v20 = vmax.f32 %v5514_v17, 0.0 }
 0x3cd   : > { %v5517_v45 = vadd.f32 %v2944_v26, %v7188_v24  ;;  %v3096_v44 = vmax.f32 %v5515_v11, 0.0 }
 0x3ce   : > { %v3097_v52 = vmax.f32 %v5516_v42, 0.0 }
 0x3cf   : > { %v3098_v49 = vmax.f32 %v5517_v45, 0.0  ;;  %v3417_v63 = vpop.f32.mrb[160].mxu1 }
 0x3d0   : > { %v3169_v61 = vpack.c.bf16 %v3097_v52, %v3095_v20  ;;  %v3418_v57 = vadd.f32 %v3417_v63, %v7378_v36  ;;  %v3419_v0 = vpop.f32.mrb[161].mxu1 }
 0x3d1   : > { %v3170_v10 = vpack.c.bf16 %v3098_v49, %v3096_v44  ;;  %v3420_v55 = vadd.f32 %v3419_v0, %v7382_v22  ;;  %v2948_v58 = vpop.f32.mrb[208].mxu0  ;;  %v3421_v13 = vpop.f32.mrb[162].mxu1 }
 0x3d2   : > { %v5518_v32 = vadd.f32 %v2948_v58, %v7185_v46  ;;  %v3422_v53 = vadd.f32 %v3421_v13, %v7378_v36  ;;  %v2950_v15 = vpop.f32.mrb[209].mxu0  ;;  %v3423_v5 = vpop.f32.mrb[163].mxu1  ;;  %v3736_v59 = vmax.f32 %v3418_v57, 0.0 }
 0x3d3   : > { %v5519_v60 = vadd.f32 %v2950_v15, %v7188_v24  ;;  %v3424_v34 = vadd.f32 %v3423_v5, %v7382_v22  ;;  %v2952_v33 = vpop.f32.mrb[210].mxu0  ;;  %3685 = vmatprep.mubr.bf16.mxu1 %v3170_v10  ;;  %v3737_v19 = vmax.f32 %v3420_v55, 0.0 }
 0x3d4   : > { %v3738_v62 = vmax.f32 %v3422_v53, 0.0  ;;  %v5520_v12 = vadd.f32 %v2952_v33, %v7185_v46  ;;  %v2954_v56 = vpop.f32.mrb[211].mxu0  ;;  %3686 = vmatmul.mubr.bf16.gmra.mrb[12].mxu1 %v3169_v61  ;;  %v3099_v2 = vmax.f32 %v5518_v32, 0.0 }
 0x3d5   : > { %v3739_v40 = vmax.f32 %v3424_v34, 0.0  ;;  %v5521_v29 = vadd.f32 %v2954_v56, %v7188_v24  ;;  %v3100_v31 = vmax.f32 %v5519_v60, 0.0 }
 0x3d6   : > { %v7392_v27 = vpack.c.bf16 %v3738_v62, %v3736_v59  ;;  %v3101_v39 = vmax.f32 %v5520_v12, 0.0 }
 0x3d7   : > { %v7394_v7 = vpack.c.bf16 %v3739_v40, %v3737_v19  ;;  %v3102_v41 = vmax.f32 %v5521_v29, 0.0  ;;  %v3427_v14 = vpop.f32.mrb[164].mxu1 }
 0x3d8   : > { %v3171_v38 = vpack.c.bf16 %v3101_v39, %v3099_v2  ;;  %v3428_v23 = vadd.f32 %v3427_v14, %v7378_v36  ;;  %v3429_v54 = vpop.f32.mrb[165].mxu1 }
 0x3d9   : > { %v3172_v6 = vpack.c.bf16 %v3102_v41, %v3100_v31  ;;  %v3430_v51 = vadd.f32 %v3429_v54, %v7382_v22  ;;  %v2958_v25 = vpop.f32.mrb[212].mxu0  ;;  %v3431_v50 = vpop.f32.mrb[166].mxu1 }
 0x3da   : > { %v5522_v4 = vadd.f32 %v2958_v25, %v7185_v46  ;;  %v3432_v48 = vadd.f32 %v3431_v50, %v7378_v36  ;;  %v2960_v43 = vpop.f32.mrb[213].mxu0  ;;  %v3433_v35 = vpop.f32.mrb[167].mxu1  ;;  %v3740_v1 = vmax.f32 %v3428_v23, 0.0 }
 0x3db   : > { %v5523_v28 = vadd.f32 %v2960_v43, %v7188_v24  ;;  %v3434_v8 = vadd.f32 %v3433_v35, %v7382_v22  ;;  %v2962_v18 = vpop.f32.mrb[214].mxu0  ;;  %3695 = vmatprep.mubr.bf16.mxu1 %v3172_v6  ;;  %v3741_v9 = vmax.f32 %v3430_v51, 0.0 }
 0x3dc   : > { %v3742_v37 = vmax.f32 %v3432_v48, 0.0  ;;  %v5524_v21 = vadd.f32 %v2962_v18, %v7185_v46  ;;  %v2964_v3 = vpop.f32.mrb[215].mxu0  ;;  %3696 = vmatmul.mubr.bf16.gmra.mrb[16].mxu1 %v3171_v38  ;;  %v3103_v11 = vmax.f32 %v5522_v4, 0.0 }
 0x3dd   : > { %v3743_v17 = vmax.f32 %v3434_v8, 0.0  ;;  %v5525_v16 = vadd.f32 %v2964_v3, %v7188_v24  ;;  %v3104_v26 = vmax.f32 %v5523_v28, 0.0 }
 0x3de   : > { %v7407_v30 = vpack.c.bf16 %v3742_v37, %v3740_v1  ;;  %v3105_v42 = vmax.f32 %v5524_v21, 0.0 }
 0x3df   : > { %v7409_v45 = vpack.c.bf16 %v3743_v17, %v3741_v9  ;;  %v3106_v20 = vmax.f32 %v5525_v16, 0.0  ;;  %v3437_v52 = vpop.f32.mrb[168].mxu1 }
 0x3e0   : > { %v3173_v44 = vpack.c.bf16 %v3105_v42, %v3103_v11  ;;  %v3438_v49 = vadd.f32 %v3437_v52, %v7378_v36  ;;  %v3439_v63 = vpop.f32.mrb[169].mxu1 }
 0x3e1   : > { %v3174_v61 = vpack.c.bf16 %v3106_v20, %v3104_v26  ;;  %v3440_v57 = vadd.f32 %v3439_v63, %v7382_v22  ;;  %v2968_v0 = vpop.f32.mrb[216].mxu0  ;;  %v3441_v10 = vpop.f32.mrb[170].mxu1 }
 0x3e2   : > { %v5526_v55 = vadd.f32 %v2968_v0, %v7185_v46  ;;  %v3442_v58 = vadd.f32 %v3441_v10, %v7378_v36  ;;  %v2970_v13 = vpop.f32.mrb[217].mxu0  ;;  %v3443_v32 = vpop.f32.mrb[171].mxu1  ;;  %v3744_v60 = vmax.f32 %v3438_v49, 0.0 }
 0x3e3   : > { %v5527_v53 = vadd.f32 %v2970_v13, %v7188_v24  ;;  %v3444_v15 = vadd.f32 %v3443_v32, %v7382_v22  ;;  %v2972_v5 = vpop.f32.mrb[218].mxu0  ;;  %3705 = vmatprep.mubr.bf16.mxu1 %v3174_v61  ;;  %v3745_v62 = vmax.f32 %v3440_v57, 0.0 }
 0x3e4   : > { %v3746_v34 = vmax.f32 %v3442_v58, 0.0  ;;  %v5528_v33 = vadd.f32 %v2972_v5, %v7185_v46  ;;  %v2974_v59 = vpop.f32.mrb[219].mxu0  ;;  %3706 = vmatmul.mubr.bf16.gmra.mrb[20].mxu1 %v3173_v44  ;;  %v3107_v19 = vmax.f32 %v5526_v55, 0.0 }
 0x3e5   : > { %v3747_v12 = vmax.f32 %v3444_v15, 0.0  ;;  %v5529_v56 = vadd.f32 %v2974_v59, %v7188_v24  ;;  %v3108_v2 = vmax.f32 %v5527_v53, 0.0 }
 0x3e6   : > { %v7419_v40 = vpack.c.bf16 %v3746_v34, %v3744_v60  ;;  %v3109_v29 = vmax.f32 %v5528_v33, 0.0 }
 0x3e7   : > { %v7421_v39 = vpack.c.bf16 %v3747_v12, %v3745_v62  ;;  %v3110_v31 = vmax.f32 %v5529_v56, 0.0  ;;  %v3447_v41 = vpop.f32.mrb[172].mxu1 }
 0x3e8   : > { %v3175_v14 = vpack.c.bf16 %v3109_v29, %v3107_v19  ;;  %v3448_v38 = vadd.f32 %v3447_v41, %v7378_v36  ;;  %v3449_v23 = vpop.f32.mrb[173].mxu1 }
 0x3e9   : > { %v3176_v54 = vpack.c.bf16 %v3110_v31, %v3108_v2  ;;  %v3450_v6 = vadd.f32 %v3449_v23, %v7382_v22  ;;  %v2978_v51 = vpop.f32.mrb[220].mxu0  ;;  %v3451_v25 = vpop.f32.mrb[174].mxu1 }
 0x3ea   : > { %v5530_v50 = vadd.f32 %v2978_v51, %v7185_v46  ;;  %v3452_v4 = vadd.f32 %v3451_v25, %v7378_v36  ;;  %v2980_v48 = vpop.f32.mrb[221].mxu0  ;;  %v3453_v43 = vpop.f32.mrb[175].mxu1  ;;  %v3748_v8 = vmax.f32 %v3448_v38, 0.0 }
 0x3eb   : > { %v5531_v35 = vadd.f32 %v2980_v48, %v7188_v24  ;;  %v3454_v47 = vadd.f32 %v3453_v43, %v7382_v22  ;;  %v2982_v28 = vpop.f32.mrb[222].mxu0  ;;  %3715 = vmatprep.mubr.bf16.mxu1 %v3176_v54  ;;  %v3749_v21 = vmax.f32 %v3450_v6, 0.0 }
 0x3ec   : > { %v3750_v18 = vmax.f32 %v3452_v4, 0.0  ;;  %v5532_v1 = vadd.f32 %v2982_v28, %v7185_v46  ;;  %v2984_v37 = vpop.f32.mrb[223].mxu0  ;;  %3716 = vmatmul.mubr.bf16.gmra.mrb[24].mxu1 %v3175_v14  ;;  %v3111_v17 = vmax.f32 %v5530_v50, 0.0 }
 0x3ed   : > { %v3751_v3 = vmax.f32 %v3454_v47, 0.0  ;;  %v5533_v9 = vadd.f32 %v2984_v37, %v7188_v24  ;;  %v3112_v42 = vmax.f32 %v5531_v35, 0.0 }
 0x3ee   : > { %v7431_v16 = vpack.c.bf16 %v3750_v18, %v3748_v8  ;;  %v3113_v11 = vmax.f32 %v5532_v1, 0.0 }
 0x3ef   : > { %v7433_v26 = vpack.c.bf16 %v3751_v3, %v3749_v21  ;;  %v3114_v20 = vmax.f32 %v5533_v9, 0.0  ;;  %v3457_v52 = vpop.f32.mrb[176].mxu1 }
 0x3f0   : > { %v3177_v44 = vpack.c.bf16 %v3113_v11, %v3111_v17  ;;  %v3458_v49 = vadd.f32 %v3457_v52, %v7378_v36  ;;  %v3459_v63 = vpop.f32.mrb[177].mxu1 }
 0x3f1   : > { %v3178_v46 = vpack.c.bf16 %v3114_v20, %v3112_v42  ;;  %v3460_v61 = vadd.f32 %v3459_v63, %v7382_v22  ;;  %v3461_v57 = vpop.f32.mrb[178].mxu1 }
 0x3f2   : > { %v3462_v0 = vadd.f32 %v3461_v57, %v7378_v36  ;;  %v3463_v24 = vpop.f32.mrb[179].mxu1  ;;  %v3752_v55 = vmax.f32 %v3458_v49, 0.0 }
 0x3f3   : > { %v3464_v10 = vadd.f32 %v3463_v24, %v7382_v22  ;;  %3725 = vmatprep.mubr.bf16.mxu1 %v3178_v46  ;;  %v3753_v13 = vmax.f32 %v3460_v61, 0.0 }
 0x3f4   : > { %v3754_v58 = vmax.f32 %v3462_v0, 0.0  ;;  %3726 = vmatmul.mubr.bf16.gmra.mrb[28].mxu1 %v3177_v44 }
 0x3f5   : > { %v3755_v32 = vmax.f32 %v3464_v10, 0.0  ;;  %4095 = vmatprep.mubr.bf16.mxu1 %v7394_v7 }
 0x3f6   : > { %v7440_v53 = vpack.c.bf16 %v3754_v58, %v3752_v55 }
 0x3f7   : > { %v3873_v15 = vpack.c.bf16 %v3755_v32, %v3753_v13  ;;  %v3467_v5 = vpop.f32.mrb[180].mxu1 }
 0x3f8   : > { %v3468_v60 = vadd.f32 %v3467_v5, %v7378_v36  ;;  %v3469_v34 = vpop.f32.mrb[181].mxu1 }
 0x3f9   : > { %v3470_v33 = vadd.f32 %v3469_v34, %v7382_v22  ;;  %v3471_v59 = vpop.f32.mrb[182].mxu1 }
 0x3fa   : > { %v3472_v62 = vadd.f32 %v3471_v59, %v7378_v36  ;;  %v3473_v12 = vpop.f32.mrb[183].mxu1  ;;  %v3756_v19 = vmax.f32 %v3468_v60, 0.0 }
 0x3fb   : > { %v3474_v56 = vadd.f32 %v3473_v12, %v7382_v22  ;;  %v3757_v7 = vmax.f32 %v3470_v33, 0.0 }
 0x3fc   : > { %v3758_v29 = vmax.f32 %v3472_v62, 0.0  ;;  %4096 = vmatmul.mubr.bf16.vlgmr.msra.gmra.mrb[32].mxu1 %v7392_v27 }
 0x3fd   : > { %v3759_v2 = vmax.f32 %v3474_v56, 0.0  ;;  %4103 = vmatprep.mubr.bf16.mxu1 %v7409_v45 }
 0x3fe   : > { %v7448_v31 = vpack.c.bf16 %v3758_v29, %v3756_v19 }
 0x3ff   : > { %v7450_v41 = vpack.c.bf16 %v3759_v2, %v3757_v7  ;;  %v3477_v14 = vpop.f32.mrb[184].mxu1 }
 0x400   : > { %v3478_v38 = vadd.f32 %v3477_v14, %v7378_v36  ;;  %v3479_v23 = vpop.f32.mrb[185].mxu1 }
 0x401   : > { %v3480_v54 = vadd.f32 %v3479_v23, %v7382_v22  ;;  %v3481_v6 = vpop.f32.mrb[186].mxu1 }
 0x402   : > { %v3482_v51 = vadd.f32 %v3481_v6, %v7378_v36  ;;  %v3483_v25 = vpop.f32.mrb[187].mxu1  ;;  %v3760_v50 = vmax.f32 %v3478_v38, 0.0 }
 0x403   : > { %v3484_v27 = vadd.f32 %v3483_v25, %v7382_v22  ;;  %v3761_v45 = vmax.f32 %v3480_v54, 0.0 }
 0x404   : > { %v3762_v4 = vmax.f32 %v3482_v51, 0.0  ;;  %4104 = vmatmul.mubr.bf16.gmra.mrb[36].mxu1 %v7407_v30 }
 0x405   : > { %v3763_v48 = vmax.f32 %v3484_v27, 0.0  ;;  %4111 = vmatprep.mubr.bf16.mxu1 %v7421_v39 }
 0x406   : > { %v7458_v43 = vpack.c.bf16 %v3762_v4, %v3760_v50 }
 0x407   : > { %v7460_v35 = vpack.c.bf16 %v3763_v48, %v3761_v45  ;;  %v3487_v47 = vpop.f32.mrb[188].mxu1 }
 0x408   : > { %v3488_v28 = vadd.f32 %v3487_v47, %v7378_v36  ;;  %v3489_v8 = vpop.f32.mrb[189].mxu1 }
 0x409   : > { %v3490_v18 = vadd.f32 %v3489_v8, %v7382_v22  ;;  %v3491_v1 = vpop.f32.mrb[190].mxu1 }
 0x40a   : > { %v3492_v37 = vadd.f32 %v3491_v1, %v7378_v36  ;;  %v3493_v21 = vpop.f32.mrb[191].mxu1  ;;  %v3764_v3 = vmax.f32 %v3488_v28, 0.0 }
 0x40b   : > { %v3494_v30 = vadd.f32 %v3493_v21, %v7382_v22  ;;  %v3765_v39 = vmax.f32 %v3490_v18, 0.0 }
 0x40c   : > { %v3766_v9 = vmax.f32 %v3492_v37, 0.0  ;;  %4112 = vmatmul.mubr.bf16.gmra.mrb[40].mxu1 %v7419_v40 }
 0x40d   : > { %v3767_v17 = vmax.f32 %v3494_v30, 0.0  ;;  %4119 = vmatprep.mubr.bf16.mxu1 %v7433_v26 }
 0x40e   : > { %v7468_v11 = vpack.c.bf16 %v3766_v9, %v3764_v3 }
 0x40f   : > { %v7470_v42 = vpack.c.bf16 %v3767_v17, %v3765_v39  ;;  %v3497_v20 = vpop.f32.mrb[192].mxu1 }
 0x410   : > { %v3498_v52 = vadd.f32 %v3497_v20, %v7378_v36  ;;  %v3499_v44 = vpop.f32.mrb[193].mxu1 }
 0x411   : > { %v3500_v49 = vadd.f32 %v3499_v44, %v7382_v22  ;;  %v3501_v63 = vpop.f32.mrb[194].mxu1 }
 0x412   : > { %v3502_v46 = vadd.f32 %v3501_v63, %v7378_v36  ;;  %v3503_v61 = vpop.f32.mrb[195].mxu1  ;;  %v3768_v57 = vmax.f32 %v3498_v52, 0.0 }
 0x413   : > { %v3504_v40 = vadd.f32 %v3503_v61, %v7382_v22  ;;  %v3769_v26 = vmax.f32 %v3500_v49, 0.0 }
 0x414   : > { %v3770_v0 = vmax.f32 %v3502_v46, 0.0  ;;  %4120 = vmatmul.mubr.bf16.gmra.mrb[44].mxu1 %v7431_v16  ;;  %v5922_v16 = vld [vmem:[%s7969_s9 + $0x8] sm:$0xff]  }
 0x415   : > { %v3771_v24 = vmax.f32 %v3504_v40, 0.0  ;;  %4127 = vmatprep.mubr.bf16.mxu1 %v3873_v15  ;;  %5332 = vmatprep.subr.bf16.mxu0 %v5922_v16 }
 0x416   : > { %v7477_v10 = vpack.c.bf16 %v3770_v0, %v3768_v57  ;;  %5333 = vmatpush3.bf16.msra.mxu0 %v5922_v16 }
 0x417   : > { %v7479_v55 = vpack.c.bf16 %v3771_v24, %v3769_v26  ;;  %v3507_v58 = vpop.f32.mrb[196].mxu1 }
 0x418   : > { %v3508_v13 = vadd.f32 %v3507_v58, %v7378_v36  ;;  %v3509_v32 = vpop.f32.mrb[197].mxu1 }
 0x419   : > { %v3510_v5 = vadd.f32 %v3509_v32, %v7382_v22  ;;  %v3511_v60 = vpop.f32.mrb[198].mxu1 }
 0x41a   : > { %v3512_v34 = vadd.f32 %v3511_v60, %v7378_v36  ;;  %v3513_v33 = vpop.f32.mrb[199].mxu1  ;;  %v3772_v59 = vmax.f32 %v3508_v13, 0.0 }
 0x41b   : > { %v3514_v15 = vadd.f32 %v3513_v33, %v7382_v22  ;;  %v3773_v12 = vmax.f32 %v3510_v5, 0.0 }
 0x41c   : > { %v3774_v62 = vmax.f32 %v3512_v34, 0.0  ;;  %4128 = vmatmul.mubr.bf16.gmra.mrb[48].mxu1 %v7440_v53 }
 0x41d   : > { %v3775_v56 = vmax.f32 %v3514_v15, 0.0  ;;  %4135 = vmatprep.mubr.bf16.mxu1 %v7450_v41 }
 0x41e   : > { %v7490_v19 = vpack.c.bf16 %v3774_v62, %v3772_v59 }
 0x41f   : > { %v3883_v29 = vpack.c.bf16 %v3775_v56, %v3773_v12  ;;  %v3517_v7 = vpop.f32.mrb[200].mxu1 }
 0x420   : > { %v3518_v2 = vadd.f32 %v3517_v7, %v7378_v36  ;;  %v3519_v14 = vpop.f32.mrb[201].mxu1 }
 0x421   : > { %v3520_v38 = vadd.f32 %v3519_v14, %v7382_v22  ;;  %v3521_v23 = vpop.f32.mrb[202].mxu1 }
 0x422   : > { %v3522_v54 = vadd.f32 %v3521_v23, %v7378_v36  ;;  %v3523_v6 = vpop.f32.mrb[203].mxu1  ;;  %v3776_v51 = vmax.f32 %v3518_v2, 0.0 }
 0x423   : > { %v3524_v53 = vadd.f32 %v3523_v6, %v7382_v22  ;;  %v3777_v41 = vmax.f32 %v3520_v38, 0.0 }
 0x424   : > { %v3778_v25 = vmax.f32 %v3522_v54, 0.0  ;;  %4136 = vmatmul.mubr.bf16.gmra.mrb[52].mxu1 %v7448_v31 }
 0x425   : > { %v3779_v27 = vmax.f32 %v3524_v53, 0.0  ;;  %4143 = vmatprep.mubr.bf16.mxu1 %v7460_v35 }
 0x426   : > { %v7498_v50 = vpack.c.bf16 %v3778_v25, %v3776_v51 }
 0x427   : > { %v3885_v4 = vpack.c.bf16 %v3779_v27, %v3777_v41  ;;  %v3527_v45 = vpop.f32.mrb[204].mxu1 }
 0x428   : > { %v3528_v48 = vadd.f32 %v3527_v45, %v7378_v36  ;;  %v3529_v47 = vpop.f32.mrb[205].mxu1 }
 0x429   : > { %v3530_v28 = vadd.f32 %v3529_v47, %v7382_v22  ;;  %v3531_v8 = vpop.f32.mrb[206].mxu1 }
 0x42a   : > { %v3532_v18 = vadd.f32 %v3531_v8, %v7378_v36  ;;  %v3533_v1 = vpop.f32.mrb[207].mxu1  ;;  %v3780_v31 = vmax.f32 %v3528_v48, 0.0 }
 0x42b   : > { %v3534_v37 = vadd.f32 %v3533_v1, %v7382_v22  ;;  %v3781_v35 = vmax.f32 %v3530_v28, 0.0 }
 0x42c   : > { %v3782_v21 = vmax.f32 %v3532_v18, 0.0  ;;  %4144 = vmatmul.mubr.bf16.gmra.mrb[56].mxu1 %v7458_v43 }
 0x42d   : > { %v3783_v30 = vmax.f32 %v3534_v37, 0.0  ;;  %4151 = vmatprep.mubr.bf16.mxu1 %v7470_v42 }
 0x42e   : > { %v7506_v3 = vpack.c.bf16 %v3782_v21, %v3780_v31 }
 0x42f   : > { %v3887_v9 = vpack.c.bf16 %v3783_v30, %v3781_v35  ;;  %v3537_v39 = vpop.f32.mrb[208].mxu1 }
 0x430   : > { %v3538_v17 = vadd.f32 %v3537_v39, %v7378_v36  ;;  %v3539_v20 = vpop.f32.mrb[209].mxu1 }
 0x431   : > { %v3540_v52 = vadd.f32 %v3539_v20, %v7382_v22  ;;  %v3541_v44 = vpop.f32.mrb[210].mxu1 }
 0x432   : > { %v3542_v49 = vadd.f32 %v3541_v44, %v7378_v36  ;;  %v3543_v63 = vpop.f32.mrb[211].mxu1  ;;  %v3784_v43 = vmax.f32 %v3538_v17, 0.0 }
 0x433   : > { %v3544_v46 = vadd.f32 %v3543_v63, %v7382_v22  ;;  %v3785_v42 = vmax.f32 %v3540_v52, 0.0 }
 0x434   : > { %v3786_v61 = vmax.f32 %v3542_v49, 0.0  ;;  %4152 = vmatmul.mubr.bf16.gmra.mrb[60].mxu1 %v7468_v11 }
 0x435   : > { %v3787_v40 = vmax.f32 %v3544_v46, 0.0  ;;  %4159 = vmatprep.mubr.bf16.mxu1 %v7479_v55 }
 0x436   : > { %v7514_v57 = vpack.c.bf16 %v3786_v61, %v3784_v43  ;;  %v5923_v43 = vld [vmem:[%s7969_s9 + $0x10] sm:$0xff]  }
 0x437   : > { %v3889_v0 = vpack.c.bf16 %v3787_v40, %v3785_v42  ;;  %v3547_v26 = vpop.f32.mrb[212].mxu1  ;;  %5334 = vmatprep.subr.bf16.mxu0 %v5923_v43 }
 0x438   : > { %v3548_v24 = vadd.f32 %v3547_v26, %v7378_v36  ;;  %v3549_v58 = vpop.f32.mrb[213].mxu1  ;;  %5335 = vmatpush3.bf16.msra.mxu0 %v5923_v43 }
 0x439   : > { %v3550_v13 = vadd.f32 %v3549_v58, %v7382_v22  ;;  %v3551_v32 = vpop.f32.mrb[214].mxu1 }
 0x43a   : > { %v3552_v5 = vadd.f32 %v3551_v32, %v7378_v36  ;;  %v3553_v60 = vpop.f32.mrb[215].mxu1  ;;  %v3788_v11 = vmax.f32 %v3548_v24, 0.0 }
 0x43b   : > { %v3554_v34 = vadd.f32 %v3553_v60, %v7382_v22  ;;  %v3789_v55 = vmax.f32 %v3550_v13, 0.0  ;;  %v5924_v13 = vld [vmem:[%s7969_s9 + $0x18] sm:$0xff]  }
 0x43c   : > { %v3790_v33 = vmax.f32 %v3552_v5, 0.0  ;;  %4160 = vmatmul.mubr.bf16.gmra.mrb[64].mxu1 %v7477_v10  ;;  %5336 = vmatprep.subr.bf16.mxu0 %v5924_v13 }
 0x43d   : > { %v3791_v16 = vmax.f32 %v3554_v34, 0.0  ;;  %4167 = vmatprep.mubr.bf16.mxu1 %v3883_v29  ;;  %5337 = vmatpush3.bf16.msra.mxu0 %v5924_v13 }
 0x43e   : > { %v7521_v15 = vpack.c.bf16 %v3790_v33, %v3788_v11 }
 0x43f   : > { %v7523_v59 = vpack.c.bf16 %v3791_v16, %v3789_v55  ;;  %v3557_v62 = vpop.f32.mrb[216].mxu1 }
 0x440   : > { %v3558_v12 = vadd.f32 %v3557_v62, %v7378_v36  ;;  %v3559_v56 = vpop.f32.mrb[217].mxu1 }
 0x441   : > { %v3560_v7 = vadd.f32 %v3559_v56, %v7382_v22  ;;  %v3561_v2 = vpop.f32.mrb[218].mxu1 }
 0x442   : > { %v3562_v14 = vadd.f32 %v3561_v2, %v7378_v36  ;;  %v3563_v38 = vpop.f32.mrb[219].mxu1  ;;  %v3792_v10 = vmax.f32 %v3558_v12, 0.0 }
 0x443   : > { %v3564_v23 = vadd.f32 %v3563_v38, %v7382_v22  ;;  %v3793_v29 = vmax.f32 %v3560_v7, 0.0 }
 0x444   : > { %v3794_v54 = vmax.f32 %v3562_v14, 0.0  ;;  %4168 = vmatmul.mubr.bf16.gmra.mrb[68].mxu1 %v7490_v19 }
 0x445   : > { %v3795_v6 = vmax.f32 %v3564_v23, 0.0  ;;  %4175 = vmatprep.mubr.bf16.mxu1 %v3885_v4 }
 0x446   : > { %v7530_v53 = vpack.c.bf16 %v3794_v54, %v3792_v10 }
 0x447   : > { %v7532_v51 = vpack.c.bf16 %v3795_v6, %v3793_v29  ;;  %v3567_v25 = vpop.f32.mrb[220].mxu1 }
 0x448   : > { %v3568_v41 = vadd.f32 %v3567_v25, %v7378_v36  ;;  %v3569_v27 = vpop.f32.mrb[221].mxu1 }
 0x449   : > { %v3570_v45 = vadd.f32 %v3569_v27, %v7382_v22  ;;  %v3571_v48 = vpop.f32.mrb[222].mxu1 }
 0x44a   : > { %v3572_v47 = vadd.f32 %v3571_v48, %v7378_v36  ;;  %v3573_v28 = vpop.f32.mrb[223].mxu1  ;;  %v3796_v19 = vmax.f32 %v3568_v41, 0.0 }
 0x44b   : > { %v3574_v8 = vadd.f32 %v3573_v28, %v7382_v22  ;;  %v3797_v4 = vmax.f32 %v3570_v45, 0.0 }
 0x44c   : > { %v3798_v18 = vmax.f32 %v3572_v47, 0.0  ;;  %4176 = vmatmul.mubr.bf16.gmra.mrb[72].mxu1 %v7498_v50 }
 0x44d   : > { %v3799_v1 = vmax.f32 %v3574_v8, 0.0  ;;  %4183 = vmatprep.mubr.bf16.mxu1 %v3887_v9 }
 0x44e   : > { %v7539_v37 = vpack.c.bf16 %v3798_v18, %v3796_v19 }
 0x44f   : > { %v7541_v31 = vpack.c.bf16 %v3799_v1, %v3797_v4  ;;  %v3577_v21 = vpop.f32.mrb[224].mxu1 }
 0x450   : > { %v3578_v35 = vadd.f32 %v3577_v21, %v7378_v36  ;;  %v3579_v30 = vpop.f32.mrb[225].mxu1 }
 0x451   : > { %v3580_v39 = vadd.f32 %v3579_v30, %v7382_v22  ;;  %v3581_v17 = vpop.f32.mrb[226].mxu1 }
 0x452   : > { %v3582_v20 = vadd.f32 %v3581_v17, %v7378_v36  ;;  %v3583_v52 = vpop.f32.mrb[227].mxu1  ;;  %v3800_v50 = vmax.f32 %v3578_v35, 0.0 }
 0x453   : > { %v3584_v44 = vadd.f32 %v3583_v52, %v7382_v22  ;;  %v3801_v9 = vmax.f32 %v3580_v39, 0.0 }
 0x454   : > { %v3802_v49 = vmax.f32 %v3582_v20, 0.0  ;;  %4184 = vmatmul.mubr.bf16.gmra.mrb[76].mxu1 %v7506_v3 }
 0x455   : > { %v3803_v63 = vmax.f32 %v3584_v44, 0.0  ;;  %4191 = vmatprep.mubr.bf16.mxu1 %v3889_v0 }
 0x456   : > { %v7548_v46 = vpack.c.bf16 %v3802_v49, %v3800_v50 }
 0x457   : > { %v7553_v61 = vpack.c.bf16 %v3803_v63, %v3801_v9  ;;  %v3587_v42 = vpop.f32.mrb[228].mxu1 }
 0x458   : > { %v3588_v40 = vadd.f32 %v3587_v42, %v7378_v36  ;;  %v3589_v26 = vpop.f32.mrb[229].mxu1 }
 0x459   : > { %v3590_v24 = vadd.f32 %v3589_v26, %v7382_v22  ;;  %v3591_v58 = vpop.f32.mrb[230].mxu1 }
 0x45a   : > { %v3592_v3 = vadd.f32 %v3591_v58, %v7378_v36  ;;  %v3593_v0 = vpop.f32.mrb[231].mxu1  ;;  %v3804_v5 = vmax.f32 %v3588_v40, 0.0 }
 0x45b   : > { %v3594_v32 = vadd.f32 %v3593_v0, %v7382_v22  ;;  %v3805_v34 = vmax.f32 %v3590_v24, 0.0 }
 0x45c   : > { %v3806_v60 = vmax.f32 %v3592_v3, 0.0  ;;  %4192 = vmatmul.mubr.bf16.gmra.mrb[80].mxu1 %v7514_v57 }
 0x45d   : > { %v3807_v11 = vmax.f32 %v3594_v32, 0.0  ;;  %4199 = vmatprep.mubr.bf16.mxu1 %v7523_v59 }
 0x45e   : > { %v7564_v33 = vpack.c.bf16 %v3806_v60, %v3804_v5 }
 0x45f   : > { %v3899_v55 = vpack.c.bf16 %v3807_v11, %v3805_v34  ;;  %v3597_v16 = vpop.f32.mrb[232].mxu1 }
 0x460   : > { %v3598_v62 = vadd.f32 %v3597_v16, %v7378_v36  ;;  %v3599_v12 = vpop.f32.mrb[233].mxu1 }
 0x461   : > { %v3600_v56 = vadd.f32 %v3599_v12, %v7382_v22  ;;  %v3601_v7 = vpop.f32.mrb[234].mxu1 }
 0x462   : > { %v3602_v2 = vadd.f32 %v3601_v7, %v7378_v36  ;;  %v3603_v14 = vpop.f32.mrb[235].mxu1  ;;  %v3808_v38 = vmax.f32 %v3598_v62, 0.0 }
 0x463   : > { %v3604_v57 = vadd.f32 %v3603_v14, %v7382_v22  ;;  %v3809_v59 = vmax.f32 %v3600_v56, 0.0 }
 0x464   : > { %v3810_v23 = vmax.f32 %v3602_v2, 0.0  ;;  %4200 = vmatmul.mubr.bf16.gmra.mrb[84].mxu1 %v7521_v15 }
 0x465   : > { %v3811_v10 = vmax.f32 %v3604_v57, 0.0  ;;  %4207 = vmatprep.mubr.bf16.mxu1 %v7532_v51 }
 0x466   : > { %v7572_v54 = vpack.c.bf16 %v3810_v23, %v3808_v38 }
 0x467   : > { %v3901_v29 = vpack.c.bf16 %v3811_v10, %v3809_v59  ;;  %v3607_v6 = vpop.f32.mrb[236].mxu1 }
 0x468   : > { %v3608_v25 = vadd.f32 %v3607_v6, %v7378_v36  ;;  %v3609_v41 = vpop.f32.mrb[237].mxu1 }
 0x469   : > { %v3610_v27 = vadd.f32 %v3609_v41, %v7382_v22  ;;  %v3611_v45 = vpop.f32.mrb[238].mxu1 }
 0x46a   : > { %v3612_v48 = vadd.f32 %v3611_v45, %v7378_v36  ;;  %v3613_v47 = vpop.f32.mrb[239].mxu1  ;;  %v3812_v15 = vmax.f32 %v3608_v25, 0.0 }
 0x46b   : > { %v3614_v28 = vadd.f32 %v3613_v47, %v7382_v22  ;;  %v3813_v51 = vmax.f32 %v3610_v27, 0.0 }
 0x46c   : > { %v3814_v8 = vmax.f32 %v3612_v48, 0.0  ;;  %4208 = vmatmul.mubr.bf16.gmra.mrb[88].mxu1 %v7530_v53 }
 0x46d   : > { %v3815_v19 = vmax.f32 %v3614_v28, 0.0  ;;  %4215 = vmatprep.mubr.bf16.mxu1 %v7541_v31 }
 0x46e   : > { %v7580_v18 = vpack.c.bf16 %v3814_v8, %v3812_v15 }
 0x46f   : > { %v3903_v4 = vpack.c.bf16 %v3815_v19, %v3813_v51  ;;  %v3617_v1 = vpop.f32.mrb[240].mxu1 }
 0x470   : > { %v3618_v21 = vadd.f32 %v3617_v1, %v7378_v36  ;;  %v3619_v35 = vpop.f32.mrb[241].mxu1 }
 0x471   : > { %v3620_v30 = vadd.f32 %v3619_v35, %v7382_v22  ;;  %v3621_v39 = vpop.f32.mrb[242].mxu1 }
 0x472   : > { %v3622_v17 = vadd.f32 %v3621_v39, %v7378_v36  ;;  %v3623_v20 = vpop.f32.mrb[243].mxu1  ;;  %v3816_v53 = vmax.f32 %v3618_v21, 0.0 }
 0x473   : > { %v3624_v52 = vadd.f32 %v3623_v20, %v7382_v22  ;;  %v3817_v31 = vmax.f32 %v3620_v30, 0.0 }
 0x474   : > { %v3818_v44 = vmax.f32 %v3622_v17, 0.0  ;;  %4216 = vmatmul.mubr.bf16.gmra.mrb[92].mxu1 %v7539_v37 }
 0x475   : > { %v3819_v50 = vmax.f32 %v3624_v52, 0.0  ;;  %4223 = vmatprep.mubr.bf16.mxu1 %v7553_v61 }
 0x476   : > { %v7588_v49 = vpack.c.bf16 %v3818_v44, %v3816_v53 }
 0x477   : > { %v3905_v9 = vpack.c.bf16 %v3819_v50, %v3817_v31  ;;  %v3627_v63 = vpop.f32.mrb[244].mxu1 }
 0x478   : > { %v3628_v43 = vadd.f32 %v3627_v63, %v7378_v36  ;;  %v3629_v42 = vpop.f32.mrb[245].mxu1 }
 0x479   : > { %v3630_v40 = vadd.f32 %v3629_v42, %v7382_v22  ;;  %v3631_v26 = vpop.f32.mrb[246].mxu1 }
 0x47a   : > { %v3632_v24 = vadd.f32 %v3631_v26, %v7378_v36  ;;  %v3633_v58 = vpop.f32.mrb[247].mxu1  ;;  %v3820_v37 = vmax.f32 %v3628_v43, 0.0 }
 0x47b   : > { %v3634_v3 = vadd.f32 %v3633_v58, %v7382_v22  ;;  %v3821_v61 = vmax.f32 %v3630_v40, 0.0 }
 0x47c   : > { %v3822_v0 = vmax.f32 %v3632_v24, 0.0  ;;  %4224 = vmatmul.mubr.bf16.gmra.mrb[96].mxu1 %v7548_v46 }
 0x47d   : > { %v3823_v13 = vmax.f32 %v3634_v3, 0.0  ;;  %4231 = vmatprep.mubr.bf16.mxu1 %v3899_v55 }
 0x47e   : > { %v7595_v32 = vpack.c.bf16 %v3822_v0, %v3820_v37 }
 0x47f   : > { %v3907_v5 = vpack.c.bf16 %v3823_v13, %v3821_v61  ;;  %v3637_v60 = vpop.f32.mrb[248].mxu1 }
 0x480   : > { %v3638_v34 = vadd.f32 %v3637_v60, %v7378_v36  ;;  %v3639_v11 = vpop.f32.mrb[249].mxu1 }
 0x481   : > { %v3640_v16 = vadd.f32 %v3639_v11, %v7382_v22  ;;  %v3641_v62 = vpop.f32.mrb[250].mxu1 }
 0x482   : > { %v3642_v12 = vadd.f32 %v3641_v62, %v7378_v36  ;;  %v3643_v56 = vpop.f32.mrb[251].mxu1  ;;  %v3824_v2 = vmax.f32 %v3638_v34, 0.0 }
 0x483   : > { %v3644_v7 = vadd.f32 %v3643_v56, %v7382_v22  ;;  %v3825_v55 = vmax.f32 %v3640_v16, 0.0 }
 0x484   : > { %v3826_v46 = vmax.f32 %v3642_v12, 0.0  ;;  %4232 = vmatmul.mubr.bf16.gmra.mrb[100].mxu1 %v7564_v33 }
 0x485   : > { %v3827_v14 = vmax.f32 %v3644_v7, 0.0  ;;  %4239 = vmatprep.mubr.bf16.mxu1 %v3901_v29 }
 0x486   : > { %v7602_v57 = vpack.c.bf16 %v3826_v46, %v3824_v2 }
 0x487   : > { %v3909_v38 = vpack.c.bf16 %v3827_v14, %v3825_v55  ;;  %v3647_v23 = vpop.f32.mrb[252].mxu1 }
 0x488   : > { %v3648_v59 = vadd.f32 %v3647_v23, %v7378_v36  ;;  %v3649_v10 = vpop.f32.mrb[253].mxu1 }
 0x489   : > { %v3650_v6 = vadd.f32 %v3649_v10, %v7382_v22  ;;  %v3651_v25 = vpop.f32.mrb[254].mxu1 }
 0x48a   : > { %v3652_v41 = vadd.f32 %v3651_v25, %v7378_v36  ;;  %v3653_v27 = vpop.f32.mrb[255].mxu1  ;;  %v3828_v48 = vmax.f32 %v3648_v59, 0.0 }
 0x48b   : > { %v3654_v45 = vadd.f32 %v3653_v27, %v7382_v22  ;;  %v3829_v29 = vmax.f32 %v3650_v6, 0.0 }
 0x48c   : > { %v3830_v33 = vmax.f32 %v3652_v41, 0.0  ;;  %4240 = vmatmul.mubr.bf16.gmra.mrb[104].mxu1 %v7572_v54 }
 0x48d   : > { %v3831_v47 = vmax.f32 %v3654_v45, 0.0  ;;  %4247 = vmatprep.mubr.bf16.mxu1 %v3903_v4 }
 0x48e   : > { %v7609_v28 = vpack.c.bf16 %v3830_v33, %v3828_v48 }
 0x48f   : > { %v3911_v15 = vpack.c.bf16 %v3831_v47, %v3829_v29  ;;  %v3657_v8 = vpop.f32.mrb[0].mxu1 }
 0x490   : > { %v3658_v51 = vadd.f32 %v3657_v8, %v7378_v36  ;;  %v3659_v19 = vpop.f32.mrb[1].mxu1 }
 0x491   : > { %v3660_v1 = vadd.f32 %v3659_v19, %v7382_v22  ;;  %v3661_v21 = vpop.f32.mrb[2].mxu1 }
 0x492   : > { %v3662_v35 = vadd.f32 %v3661_v21, %v7378_v36  ;;  %v3663_v30 = vpop.f32.mrb[3].mxu1  ;;  %v3832_v17 = vmax.f32 %v3658_v51, 0.0 }
 0x493   : > { %v3664_v39 = vadd.f32 %v3663_v30, %v7382_v22  ;;  %v3833_v4 = vmax.f32 %v3660_v1, 0.0 }
 0x494   : > { %v3834_v54 = vmax.f32 %v3662_v35, 0.0  ;;  %4248 = vmatmul.mubr.bf16.gmra.mrb[108].mxu1 %v7580_v18 }
 0x495   : > { %v3835_v20 = vmax.f32 %v3664_v39, 0.0  ;;  %4255 = vmatprep.mubr.bf16.mxu1 %v3905_v9 }
 0x496   : > { %v7616_v52 = vpack.c.bf16 %v3834_v54, %v3832_v17 }
 0x497   : > { %v3913_v53 = vpack.c.bf16 %v3835_v20, %v3833_v4  ;;  %v3667_v44 = vpop.f32.mrb[4].mxu1 }
 0x498   : > { %v3668_v31 = vadd.f32 %v3667_v44, %v7378_v36  ;;  %v3669_v50 = vpop.f32.mrb[5].mxu1 }
 0x499   : > { %v3670_v63 = vadd.f32 %v3669_v50, %v7382_v22  ;;  %v3671_v43 = vpop.f32.mrb[6].mxu1 }
 0x49a   : > { %v3672_v42 = vadd.f32 %v3671_v43, %v7378_v36  ;;  %v3673_v40 = vpop.f32.mrb[7].mxu1  ;;  %v3836_v24 = vmax.f32 %v3668_v31, 0.0 }
 0x49b   : > { %v3674_v26 = vadd.f32 %v3673_v40, %v7382_v22  ;;  %v3837_v9 = vmax.f32 %v3670_v63, 0.0 }
 0x49c   : > { %v3838_v18 = vmax.f32 %v3672_v42, 0.0  ;;  %4256 = vmatmul.mubr.bf16.gmra.mrb[112].mxu1 %v7588_v49 }
 0x49d   : > { %v3839_v58 = vmax.f32 %v3674_v26, 0.0  ;;  %4263 = vmatprep.mubr.bf16.mxu1 %v3907_v5 }
 0x49e   : > { %v7623_v3 = vpack.c.bf16 %v3838_v18, %v3836_v24 }
 0x49f   : > { %v3915_v37 = vpack.c.bf16 %v3839_v58, %v3837_v9  ;;  %v3677_v0 = vpop.f32.mrb[8].mxu1 }
 0x4a0   : > { %v3678_v61 = vadd.f32 %v3677_v0, %v7378_v36  ;;  %v3679_v13 = vpop.f32.mrb[9].mxu1 }
 0x4a1   : > { %v3680_v60 = vadd.f32 %v3679_v13, %v7382_v22  ;;  %v3681_v34 = vpop.f32.mrb[10].mxu1 }
 0x4a2   : > { %v3682_v11 = vadd.f32 %v3681_v34, %v7378_v36  ;;  %v3683_v16 = vpop.f32.mrb[11].mxu1  ;;  %v3840_v12 = vmax.f32 %v3678_v61, 0.0 }
 0x4a3   : > { %v3684_v62 = vadd.f32 %v3683_v16, %v7382_v22  ;;  %v3841_v5 = vmax.f32 %v3680_v60, 0.0 }
 0x4a4   : > { %v3842_v49 = vmax.f32 %v3682_v11, 0.0  ;;  %4264 = vmatmul.mubr.bf16.gmra.mrb[116].mxu1 %v7595_v32 }
 0x4a5   : > { %v3843_v56 = vmax.f32 %v3684_v62, 0.0  ;;  %4271 = vmatprep.mubr.bf16.mxu1 %v3909_v38 }
 0x4a6   : > { %v7630_v7 = vpack.c.bf16 %v3842_v49, %v3840_v12 }
 0x4a7   : > { %v3917_v2 = vpack.c.bf16 %v3843_v56, %v3841_v5  ;;  %v3687_v46 = vpop.f32.mrb[12].mxu1 }
 0x4a8   : > { %v3688_v55 = vadd.f32 %v3687_v46, %v7378_v36  ;;  %v3689_v14 = vpop.f32.mrb[13].mxu1 }
 0x4a9   : > { %v3690_v23 = vadd.f32 %v3689_v14, %v7382_v22  ;;  %v3691_v59 = vpop.f32.mrb[14].mxu1 }
 0x4aa   : > { %v3692_v10 = vadd.f32 %v3691_v59, %v7378_v36  ;;  %v3693_v6 = vpop.f32.mrb[15].mxu1  ;;  %v3844_v41 = vmax.f32 %v3688_v55, 0.0 }
 0x4ab   : > { %v3694_v25 = vadd.f32 %v3693_v6, %v7382_v22  ;;  %v3845_v38 = vmax.f32 %v3690_v23, 0.0 }
 0x4ac   : > { %v3846_v32 = vmax.f32 %v3692_v10, 0.0  ;;  %4272 = vmatmul.mubr.bf16.gmra.mrb[120].mxu1 %v7602_v57 }
 0x4ad   : > { %v3847_v27 = vmax.f32 %v3694_v25, 0.0  ;;  %4279 = vmatprep.mubr.bf16.mxu1 %v3911_v15  ;;  %v7668_v25 = vld [vmem:[%s7968_s8] ss:$0 sm:$0xff] }
 0x4ae   : > { %v7637_v45 = vpack.c.bf16 %v3846_v32, %v3844_v41 }
 0x4af   : > { %v3919_v48 = vpack.c.bf16 %v3847_v27, %v3845_v38  ;;  %v3697_v33 = vpop.f32.mrb[16].mxu1 }
 0x4b0   : > { %v3698_v29 = vadd.f32 %v3697_v33, %v7378_v36  ;;  %v3699_v47 = vpop.f32.mrb[17].mxu1 }
 0x4b1   : > { %v3700_v8 = vadd.f32 %v3699_v47, %v7382_v22  ;;  %v3701_v51 = vpop.f32.mrb[18].mxu1 }
 0x4b2   : > { %v3702_v19 = vadd.f32 %v3701_v51, %v7378_v36  ;;  %v3703_v1 = vpop.f32.mrb[19].mxu1  ;;  %v3848_v35 = vmax.f32 %v3698_v29, 0.0 }
 0x4b3   : > { %v3704_v21 = vadd.f32 %v3703_v1, %v7382_v22  ;;  %v3849_v15 = vmax.f32 %v3700_v8, 0.0 }
 0x4b4   : > { %v3850_v57 = vmax.f32 %v3702_v19, 0.0  ;;  %4280 = vmatmul.mubr.bf16.gmra.mrb[124].mxu1 %v7609_v28 }
 0x4b5   : > { %v3851_v30 = vmax.f32 %v3704_v21, 0.0  ;;  %4287 = vmatprep.mubr.bf16.mxu1 %v3913_v53 }
 0x4b6   : > { %v7644_v39 = vpack.c.bf16 %v3850_v57, %v3848_v35 }
 0x4b7   : > { %v3921_v17 = vpack.c.bf16 %v3851_v30, %v3849_v15  ;;  %v3707_v54 = vpop.f32.mrb[20].mxu1 }
 0x4b8   : > { %v3708_v4 = vadd.f32 %v3707_v54, %v7378_v36  ;;  %v3709_v20 = vpop.f32.mrb[21].mxu1 }
 0x4b9   : > { %v3710_v44 = vadd.f32 %v3709_v20, %v7382_v22  ;;  %v3711_v31 = vpop.f32.mrb[22].mxu1 }
 0x4ba   : > { %v3712_v50 = vadd.f32 %v3711_v31, %v7378_v36  ;;  %v3713_v63 = vpop.f32.mrb[23].mxu1  ;;  %v3852_v42 = vmax.f32 %v3708_v4, 0.0 }
 0x4bb   : > { %v3714_v43 = vadd.f32 %v3713_v63, %v7382_v22  ;;  %v3853_v53 = vmax.f32 %v3710_v44, 0.0 }
 0x4bc   : > { %v3854_v28 = vmax.f32 %v3712_v50, 0.0  ;;  %4288 = vmatmul.mubr.bf16.gmra.mrb[128].mxu1 %v7616_v52 }
 0x4bd   : > { %v3855_v40 = vmax.f32 %v3714_v43, 0.0  ;;  %4295 = vmatprep.mubr.bf16.mxu1 %v3915_v37 }
 0x4be   : > { %v7651_v26 = vpack.c.bf16 %v3854_v28, %v3852_v42 }
 0x4bf   : > { %v3923_v24 = vpack.c.bf16 %v3855_v40, %v3853_v53  ;;  %v3717_v18 = vpop.f32.mrb[24].mxu1 }
 0x4c0   : > { %v3718_v9 = vadd.f32 %v3717_v18, %v7378_v36  ;;  %v3719_v58 = vpop.f32.mrb[25].mxu1 }
 0x4c1   : > { %v3720_v0 = vadd.f32 %v3719_v58, %v7382_v22  ;;  %v3721_v61 = vpop.f32.mrb[26].mxu1 }
 0x4c2   : > { %v3722_v13 = vadd.f32 %v3721_v61, %v7378_v36  ;;  %v3723_v60 = vpop.f32.mrb[27].mxu1  ;;  %v3856_v11 = vmax.f32 %v3718_v9, 0.0 }
 0x4c3   : > { %v3724_v34 = vadd.f32 %v3723_v60, %v7382_v22  ;;  %v3857_v37 = vmax.f32 %v3720_v0, 0.0 }
 0x4c4   : > { %v3858_v52 = vmax.f32 %v3722_v13, 0.0  ;;  %4296 = vmatmul.mubr.bf16.gmra.mrb[132].mxu1 %v7623_v3 }
 0x4c5   : > { %v3859_v16 = vmax.f32 %v3724_v34, 0.0  ;;  %4303 = vmatprep.mubr.bf16.mxu1 %v3917_v2 }
 0x4c6   : > { %v7658_v62 = vpack.c.bf16 %v3858_v52, %v3856_v11 }
 0x4c7   : > { %v3925_v12 = vpack.c.bf16 %v3859_v16, %v3857_v37  ;;  %v3727_v49 = vpop.f32.mrb[28].mxu1 }
 0x4c8   : > { %v3728_v5 = vadd.f32 %v3727_v49, %v7378_v36  ;;  %v3729_v56 = vpop.f32.mrb[29].mxu1 }
 0x4c9   : > { %v3730_v46 = vadd.f32 %v3729_v56, %v7382_v22  ;;  %v3731_v55 = vpop.f32.mrb[30].mxu1 }
 0x4ca   : > { %v3732_v14 = vadd.f32 %v3731_v55, %v7378_v36  ;;  %v3733_v23 = vpop.f32.mrb[31].mxu1  ;;  %v3860_v10 = vmax.f32 %v3728_v5, 0.0 }
 0x4cb   : > { %v3734_v59 = vadd.f32 %v3733_v23, %v7382_v22  ;;  %v3861_v2 = vmax.f32 %v3730_v46, 0.0 }
 0x4cc   : > { %v3862_v3 = vmax.f32 %v3732_v14, 0.0  ;;  %4304 = vmatmul.mubr.bf16.gmra.mrb[136].mxu1 %v7630_v7 }
 0x4cd   : > { %v3863_v6 = vmax.f32 %v3734_v59, 0.0  ;;  %4311 = vmatprep.mubr.bf16.mxu1 %v3919_v48 }
 0x4ce   : > { %v3926_v41 = vpack.c.bf16 %v3862_v3, %v3860_v10 }
 0x4cf   : > { %v3927_v32 = vpack.c.bf16 %v3863_v6, %v3861_v2  ;;  %v4097_v38 = vpop.f32.mrb[32].mxu1 }
 0x4d0   : > { %v4098_v36 = vadd.f32 %v7668_v25, %v4097_v38  ;;  %v4099_v27 = vpop.f32.mrb[33].mxu1 }
 0x4d1   : > { %v4100_v33 = vpop.f32.mrb[34].mxu1 }
 0x4d2   : > { %v4101_v22 = vadd.f32 %v7668_v25, %v4100_v33  ;;  %v4102_v29 = vpop.f32.mrb[35].mxu1  ;;  %v4352_v47 = vmax.f32 %v4098_v36, 0.0 }
 0x4d4   : > { %v4353_v7 = vmax.f32 %v4101_v22, 0.0  ;;  %4312 = vmatmul.mubr.bf16.gmra.mrb[140].mxu1 %v7637_v45 }
 0x4d5   : > { %4319 = vmatprep.mubr.bf16.mxu1 %v3921_v17 }
 0x4d6   : > { %v4416_v48 = vpack.c.bf16 %v4353_v7, %v4352_v47 }
 0x4d7   : > { %v4105_v8 = vpop.f32.mrb[36].mxu1 }
 0x4d8   : > { %v4106_v51 = vadd.f32 %v7668_v25, %v4105_v8  ;;  %v4107_v19 = vpop.f32.mrb[37].mxu1  ;;  %5338 = vmatprep.mubr.msk.bf16.mxu0 %vm4487_vm1, %v4416_v48 }
 0x4d9   : > { %v4108_v1 = vpop.f32.mrb[38].mxu1 }
 0x4da   : > { %v4109_v21 = vadd.f32 %v7668_v25, %v4108_v1  ;;  %v4110_v35 = vpop.f32.mrb[39].mxu1  ;;  %v4354_v57 = vmax.f32 %v4106_v51, 0.0 }
 0x4dc   : > { %v4355_v15 = vmax.f32 %v4109_v21, 0.0  ;;  %4320 = vmatmul.mubr.bf16.gmra.mrb[144].mxu1 %v7644_v39 }
 0x4dd   : > { %4327 = vmatprep.mubr.bf16.mxu1 %v3923_v24 }
 0x4de   : > { %v4417_v30 = vpack.c.bf16 %v4355_v15, %v4354_v57 }
 0x4df   : > { %v4113_v45 = vpop.f32.mrb[40].mxu1 }
 0x4e0   : > { %v4114_v17 = vadd.f32 %v7668_v25, %v4113_v45  ;;  %v4115_v54 = vpop.f32.mrb[41].mxu1  ;;  %5339 = vmatmul.mubr.msk.bf16.vlgmr.msra.gmra.mrb[224].mxu0 %vm4487_vm1, %v4417_v30 }
 0x4e1   : > { %v4116_v4 = vpop.f32.mrb[42].mxu1 }
 0x4e2   : > { %v4117_v20 = vadd.f32 %v7668_v25, %v4116_v4  ;;  %v4118_v44 = vpop.f32.mrb[43].mxu1  ;;  %v4356_v31 = vmax.f32 %v4114_v17, 0.0 }
 0x4e4   : > { %v4357_v50 = vmax.f32 %v4117_v20, 0.0  ;;  %4328 = vmatmul.mubr.bf16.gmra.mrb[148].mxu1 %v7651_v26 }
 0x4e5   : > { %4335 = vmatprep.mubr.bf16.mxu1 %v3925_v12 }
 0x4e6   : > { %v4418_v63 = vpack.c.bf16 %v4357_v50, %v4356_v31 }
 0x4e7   : > { %v4121_v43 = vpop.f32.mrb[44].mxu1 }
 0x4e8   : > { %v4122_v39 = vadd.f32 %v7668_v25, %v4121_v43  ;;  %v4123_v42 = vpop.f32.mrb[45].mxu1  ;;  %5342 = vmatprep.mubr.msk.bf16.mxu0 %vm4487_vm1, %v4418_v63 }
 0x4e9   : > { %v4124_v28 = vpop.f32.mrb[46].mxu1 }
 0x4ea   : > { %v4125_v53 = vadd.f32 %v7668_v25, %v4124_v28  ;;  %v4126_v40 = vpop.f32.mrb[47].mxu1  ;;  %v4358_v24 = vmax.f32 %v4122_v39, 0.0 }
 0x4ec   : > { %v4359_v18 = vmax.f32 %v4125_v53, 0.0  ;;  %4336 = vmatmul.mubr.bf16.gmra.mrb[152].mxu1 %v7658_v62 }
 0x4ed   : > { %4343 = vmatprep.mubr.bf16.mxu1 %v3927_v32 }
 0x4ee   : > { %v4419_v9 = vpack.c.bf16 %v4359_v18, %v4358_v24 }
 0x4ef   : > { %v4129_v58 = vpop.f32.mrb[48].mxu1 }
 0x4f0   : > { %v4130_v26 = vadd.f32 %v7668_v25, %v4129_v58  ;;  %v4131_v0 = vpop.f32.mrb[49].mxu1  ;;  %5343 = vmatmul.mubr.msk.bf16.gmra.mrb[228].mxu0 %vm4487_vm1, %v4419_v9 }
 0x4f1   : > { %v4132_v61 = vpop.f32.mrb[50].mxu1 }
 0x4f2   : > { %v4133_v13 = vadd.f32 %v7668_v25, %v4132_v61  ;;  %v4134_v60 = vpop.f32.mrb[51].mxu1  ;;  %v4360_v34 = vmax.f32 %v4130_v26, 0.0 }
 0x4f4   : > { %v4361_v11 = vmax.f32 %v4133_v13, 0.0  ;;  %4344 = vmatmul.mubr.bf16.gmra.mrb[156].mxu1 %v3926_v41 }
 0x4f6   : > { %v4420_v52 = vpack.c.bf16 %v4361_v11, %v4360_v34 }
 0x4f7   : > { %v4137_v37 = vpop.f32.mrb[52].mxu1 }
 0x4f8   : > { %v4138_v16 = vadd.f32 %v7668_v25, %v4137_v37  ;;  %v4139_v62 = vpop.f32.mrb[53].mxu1  ;;  %5346 = vmatprep.mubr.msk.bf16.mxu0 %vm4487_vm1, %v4420_v52 }
 0x4f9   : > { %v4140_v12 = vpop.f32.mrb[54].mxu1 }
 0x4fa   : > { %v4141_v49 = vadd.f32 %v7668_v25, %v4140_v12  ;;  %v4142_v5 = vpop.f32.mrb[55].mxu1  ;;  %v4362_v56 = vmax.f32 %v4138_v16, 0.0 }
 0x4fc   : > { %v4363_v46 = vmax.f32 %v4141_v49, 0.0 }
 0x4fe   : > { %v4421_v55 = vpack.c.bf16 %v4363_v46, %v4362_v56 }
 0x4ff   : > { %v4145_v14 = vpop.f32.mrb[56].mxu1 }
 0x500   : > { %v4146_v23 = vadd.f32 %v7668_v25, %v4145_v14  ;;  %v4147_v59 = vpop.f32.mrb[57].mxu1  ;;  %5347 = vmatmul.mubr.msk.bf16.gmra.mrb[232].mxu0 %vm4487_vm1, %v4421_v55 }
 0x501   : > { %v4148_v10 = vpop.f32.mrb[58].mxu1 }
 0x502   : > { %v4149_v3 = vadd.f32 %v7668_v25, %v4148_v10  ;;  %v4150_v2 = vpop.f32.mrb[59].mxu1  ;;  %v4364_v6 = vmax.f32 %v4146_v23, 0.0 }
 0x504   : > { %v4365_v41 = vmax.f32 %v4149_v3, 0.0 }
 0x506   : > { %v4422_v32 = vpack.c.bf16 %v4365_v41, %v4364_v6 }
 0x507   : > { %v4153_v38 = vpop.f32.mrb[60].mxu1 }
 0x508   : > { %v4154_v36 = vadd.f32 %v7668_v25, %v4153_v38  ;;  %v4155_v27 = vpop.f32.mrb[61].mxu1  ;;  %5350 = vmatprep.mubr.msk.bf16.mxu0 %vm4487_vm1, %v4422_v32 }
 0x509   : > { %v4156_v33 = vpop.f32.mrb[62].mxu1 }
 0x50a   : > { %v4157_v22 = vadd.f32 %v7668_v25, %v4156_v33  ;;  %v4158_v29 = vpop.f32.mrb[63].mxu1  ;;  %v4366_v47 = vmax.f32 %v4154_v36, 0.0 }
 0x50c   : > { %v4367_v7 = vmax.f32 %v4157_v22, 0.0 }
 0x50e   : > { %v4423_v48 = vpack.c.bf16 %v4367_v7, %v4366_v47 }
 0x50f   : > { %v4161_v8 = vpop.f32.mrb[64].mxu1 }
 0x510   : > { %v4162_v51 = vadd.f32 %v7668_v25, %v4161_v8  ;;  %v4163_v19 = vpop.f32.mrb[65].mxu1  ;;  %5351 = vmatmul.mubr.msk.bf16.gmra.mrb[236].mxu0 %vm4487_vm1, %v4423_v48 }
 0x511   : > { %v4164_v1 = vpop.f32.mrb[66].mxu1 }
 0x512   : > { %v4165_v21 = vadd.f32 %v7668_v25, %v4164_v1  ;;  %v4166_v35 = vpop.f32.mrb[67].mxu1  ;;  %v4368_v57 = vmax.f32 %v4162_v51, 0.0 }
 0x514   : > { %v4369_v15 = vmax.f32 %v4165_v21, 0.0 }
 0x516   : > { %v4424_v30 = vpack.c.bf16 %v4369_v15, %v4368_v57 }
 0x517   : > { %v4169_v45 = vpop.f32.mrb[68].mxu1 }
 0x518   : > { %v4170_v17 = vadd.f32 %v7668_v25, %v4169_v45  ;;  %v4171_v54 = vpop.f32.mrb[69].mxu1  ;;  %5354 = vmatprep.mubr.msk.bf16.mxu0 %vm4487_vm1, %v4424_v30 }
 0x519   : > { %v4172_v4 = vpop.f32.mrb[70].mxu1 }
 0x51a   : > { %v4173_v20 = vadd.f32 %v7668_v25, %v4172_v4  ;;  %v4174_v44 = vpop.f32.mrb[71].mxu1  ;;  %v4370_v31 = vmax.f32 %v4170_v17, 0.0 }
 0x51c   : > { %v4371_v50 = vmax.f32 %v4173_v20, 0.0 }
 0x51e   : > { %v4425_v63 = vpack.c.bf16 %v4371_v50, %v4370_v31 }
 0x51f   : > { %v4177_v43 = vpop.f32.mrb[72].mxu1 }
 0x520   : > { %v4178_v39 = vadd.f32 %v7668_v25, %v4177_v43  ;;  %v4179_v42 = vpop.f32.mrb[73].mxu1  ;;  %5355 = vmatmul.mubr.msk.bf16.gmra.mrb[240].mxu0 %vm4487_vm1, %v4425_v63 }
 0x521   : > { %v4180_v28 = vpop.f32.mrb[74].mxu1 }
 0x522   : > { %v4181_v53 = vadd.f32 %v7668_v25, %v4180_v28  ;;  %v4182_v40 = vpop.f32.mrb[75].mxu1  ;;  %v4372_v24 = vmax.f32 %v4178_v39, 0.0 }
 0x524   : > { %v4373_v18 = vmax.f32 %v4181_v53, 0.0 }
 0x526   : > { %v4426_v9 = vpack.c.bf16 %v4373_v18, %v4372_v24 }
 0x527   : > { %v4185_v58 = vpop.f32.mrb[76].mxu1 }
 0x528   : > { %v4186_v26 = vadd.f32 %v7668_v25, %v4185_v58  ;;  %v4187_v0 = vpop.f32.mrb[77].mxu1  ;;  %5358 = vmatprep.mubr.msk.bf16.mxu0 %vm4487_vm1, %v4426_v9 }
 0x529   : > { %v4188_v61 = vpop.f32.mrb[78].mxu1 }
 0x52a   : > { %v4189_v13 = vadd.f32 %v7668_v25, %v4188_v61  ;;  %v4190_v60 = vpop.f32.mrb[79].mxu1  ;;  %v4374_v34 = vmax.f32 %v4186_v26, 0.0 }
 0x52c   : > { %v4375_v11 = vmax.f32 %v4189_v13, 0.0 }
 0x52e   : > { %v4427_v52 = vpack.c.bf16 %v4375_v11, %v4374_v34 }
 0x52f   : > { %v4193_v37 = vpop.f32.mrb[80].mxu1 }
 0x530   : > { %v4194_v16 = vadd.f32 %v7668_v25, %v4193_v37  ;;  %v4195_v62 = vpop.f32.mrb[81].mxu1  ;;  %5359 = vmatmul.mubr.msk.bf16.gmra.mrb[244].mxu0 %vm4487_vm1, %v4427_v52 }
 0x531   : > { %v4196_v12 = vpop.f32.mrb[82].mxu1 }
 0x532   : > { %v4197_v49 = vadd.f32 %v7668_v25, %v4196_v12  ;;  %v4198_v5 = vpop.f32.mrb[83].mxu1  ;;  %v4376_v56 = vmax.f32 %v4194_v16, 0.0 }
 0x534   : > { %v4377_v46 = vmax.f32 %v4197_v49, 0.0 }
 0x536   : > { %v4428_v55 = vpack.c.bf16 %v4377_v46, %v4376_v56 }
 0x537   : > { %v4201_v14 = vpop.f32.mrb[84].mxu1 }
 0x538   : > { %v4202_v23 = vadd.f32 %v7668_v25, %v4201_v14  ;;  %v4203_v59 = vpop.f32.mrb[85].mxu1  ;;  %5362 = vmatprep.mubr.msk.bf16.mxu0 %vm4487_vm1, %v4428_v55 }
 0x539   : > { %v4204_v10 = vpop.f32.mrb[86].mxu1 }
 0x53a   : > { %v4205_v3 = vadd.f32 %v7668_v25, %v4204_v10  ;;  %v4206_v2 = vpop.f32.mrb[87].mxu1  ;;  %v4378_v6 = vmax.f32 %v4202_v23, 0.0 }
 0x53c   : > { %v4379_v41 = vmax.f32 %v4205_v3, 0.0 }
 0x53e   : > { %v4429_v32 = vpack.c.bf16 %v4379_v41, %v4378_v6 }
 0x53f   : > { %v4209_v38 = vpop.f32.mrb[88].mxu1 }
 0x540   : > { %v4210_v36 = vadd.f32 %v7668_v25, %v4209_v38  ;;  %v4211_v27 = vpop.f32.mrb[89].mxu1  ;;  %5363 = vmatmul.mubr.msk.bf16.gmra.mrb[248].mxu0 %vm4487_vm1, %v4429_v32 }
 0x541   : > { %v4212_v33 = vpop.f32.mrb[90].mxu1 }
 0x542   : > { %v4213_v22 = vadd.f32 %v7668_v25, %v4212_v33  ;;  %v4214_v29 = vpop.f32.mrb[91].mxu1  ;;  %v4380_v47 = vmax.f32 %v4210_v36, 0.0 }
 0x544   : > { %v4381_v7 = vmax.f32 %v4213_v22, 0.0 }
 0x546   : > { %v4430_v48 = vpack.c.bf16 %v4381_v7, %v4380_v47 }
 0x547   : > { %v4217_v8 = vpop.f32.mrb[92].mxu1 }
 0x548   : > { %v4218_v51 = vadd.f32 %v7668_v25, %v4217_v8  ;;  %v4219_v19 = vpop.f32.mrb[93].mxu1  ;;  %5366 = vmatprep.mubr.msk.bf16.mxu0 %vm4487_vm1, %v4430_v48 }
 0x549   : > { %v4220_v1 = vpop.f32.mrb[94].mxu1 }
 0x54a   : > { %v4221_v21 = vadd.f32 %v7668_v25, %v4220_v1  ;;  %v4222_v35 = vpop.f32.mrb[95].mxu1  ;;  %v4382_v57 = vmax.f32 %v4218_v51, 0.0 }
 0x54c   : > { %v4383_v15 = vmax.f32 %v4221_v21, 0.0 }
 0x54e   : > { %v4431_v30 = vpack.c.bf16 %v4383_v15, %v4382_v57 }
 0x54f   : > { %v4225_v45 = vpop.f32.mrb[96].mxu1 }
 0x550   : > { %v4226_v17 = vadd.f32 %v7668_v25, %v4225_v45  ;;  %v4227_v54 = vpop.f32.mrb[97].mxu1  ;;  %5367 = vmatmul.mubr.msk.bf16.gmra.mrb[252].mxu0 %vm4487_vm1, %v4431_v30 }
 0x551   : > { %v4228_v4 = vpop.f32.mrb[98].mxu1 }
 0x552   : > { %v4229_v20 = vadd.f32 %v7668_v25, %v4228_v4  ;;  %v4230_v44 = vpop.f32.mrb[99].mxu1  ;;  %v4384_v31 = vmax.f32 %v4226_v17, 0.0 }
 0x554   : > { %v4385_v50 = vmax.f32 %v4229_v20, 0.0 }
 0x556   : > { %v4432_v63 = vpack.c.bf16 %v4385_v50, %v4384_v31 }
 0x557   : > { %v4233_v43 = vpop.f32.mrb[100].mxu1 }
 0x558   : > { %v4234_v39 = vadd.f32 %v7668_v25, %v4233_v43  ;;  %v4235_v42 = vpop.f32.mrb[101].mxu1  ;;  %5370 = vmatprep.mubr.msk.bf16.mxu0 %vm4487_vm1, %v4432_v63 }
 0x559   : > { %v4236_v28 = vpop.f32.mrb[102].mxu1 }
 0x55a   : > { %v4237_v53 = vadd.f32 %v7668_v25, %v4236_v28  ;;  %v4238_v40 = vpop.f32.mrb[103].mxu1  ;;  %v4386_v24 = vmax.f32 %v4234_v39, 0.0 }
 0x55c   : > { %v4387_v18 = vmax.f32 %v4237_v53, 0.0 }
 0x55e   : > { %v4433_v9 = vpack.c.bf16 %v4387_v18, %v4386_v24 }
 0x55f   : > { %v4241_v58 = vpop.f32.mrb[104].mxu1 }
 0x560   : > { %v4242_v26 = vadd.f32 %v7668_v25, %v4241_v58  ;;  %v4243_v0 = vpop.f32.mrb[105].mxu1  ;;  %5371 = vmatmul.mubr.msk.bf16.gmra.mrb[0].mxu0 %vm4487_vm1, %v4433_v9 }
 0x561   : > { %v4244_v61 = vpop.f32.mrb[106].mxu1 }
 0x562   : > { %v4245_v13 = vadd.f32 %v7668_v25, %v4244_v61  ;;  %v4246_v60 = vpop.f32.mrb[107].mxu1  ;;  %v4388_v34 = vmax.f32 %v4242_v26, 0.0 }
 0x564   : > { %v4389_v11 = vmax.f32 %v4245_v13, 0.0 }
 0x566   : > { %v4434_v52 = vpack.c.bf16 %v4389_v11, %v4388_v34 }
 0x567   : > { %v4249_v37 = vpop.f32.mrb[108].mxu1 }
 0x568   : > { %v4250_v16 = vadd.f32 %v7668_v25, %v4249_v37  ;;  %v4251_v62 = vpop.f32.mrb[109].mxu1  ;;  %5374 = vmatprep.mubr.msk.bf16.mxu0 %vm4487_vm1, %v4434_v52 }
 0x569   : > { %v4252_v12 = vpop.f32.mrb[110].mxu1 }
 0x56a   : > { %v4253_v49 = vadd.f32 %v7668_v25, %v4252_v12  ;;  %v4254_v5 = vpop.f32.mrb[111].mxu1  ;;  %v4390_v56 = vmax.f32 %v4250_v16, 0.0 }
 0x56c   : > { %v4391_v46 = vmax.f32 %v4253_v49, 0.0 }
 0x56e   : > { %v4435_v55 = vpack.c.bf16 %v4391_v46, %v4390_v56 }
 0x56f   : > { %v4257_v14 = vpop.f32.mrb[112].mxu1 }
 0x570   : > { %v4258_v23 = vadd.f32 %v7668_v25, %v4257_v14  ;;  %v4259_v59 = vpop.f32.mrb[113].mxu1  ;;  %5375 = vmatmul.mubr.msk.bf16.gmra.mrb[4].mxu0 %vm4487_vm1, %v4435_v55 }
 0x571   : > { %v4260_v10 = vpop.f32.mrb[114].mxu1 }
 0x572   : > { %v4261_v3 = vadd.f32 %v7668_v25, %v4260_v10  ;;  %v4262_v2 = vpop.f32.mrb[115].mxu1  ;;  %v4392_v6 = vmax.f32 %v4258_v23, 0.0 }
 0x574   : > { %v4393_v41 = vmax.f32 %v4261_v3, 0.0 }
 0x576   : > { %v4436_v32 = vpack.c.bf16 %v4393_v41, %v4392_v6 }
 0x577   : > { %v4265_v38 = vpop.f32.mrb[116].mxu1 }
 0x578   : > { %v4266_v36 = vadd.f32 %v7668_v25, %v4265_v38  ;;  %v4267_v27 = vpop.f32.mrb[117].mxu1  ;;  %5378 = vmatprep.mubr.msk.bf16.mxu0 %vm4487_vm1, %v4436_v32 }
 0x579   : > { %v4268_v33 = vpop.f32.mrb[118].mxu1 }
 0x57a   : > { %v4269_v22 = vadd.f32 %v7668_v25, %v4268_v33  ;;  %v4270_v29 = vpop.f32.mrb[119].mxu1  ;;  %v4394_v47 = vmax.f32 %v4266_v36, 0.0 }
 0x57c   : > { %v4395_v7 = vmax.f32 %v4269_v22, 0.0  ;;  %v7765_v22 = vld [vmem:[%s7970_s10] ss:$0 sm:$0xff] }
 0x57e   : > { %v4437_v48 = vpack.c.bf16 %v4395_v7, %v4394_v47 }
 0x57f   : > { %v4273_v8 = vpop.f32.mrb[120].mxu1 }
 0x580   : > { %v4274_v51 = vadd.f32 %v7668_v25, %v4273_v8  ;;  %v4275_v19 = vpop.f32.mrb[121].mxu1  ;;  %5379 = vmatmul.mubr.msk.bf16.gmra.mrb[8].mxu0 %vm4487_vm1, %v4437_v48 }
 0x581   : > { %v4276_v1 = vpop.f32.mrb[122].mxu1 }
 0x582   : > { %v4277_v21 = vadd.f32 %v7668_v25, %v4276_v1  ;;  %v4278_v35 = vpop.f32.mrb[123].mxu1  ;;  %v4396_v57 = vmax.f32 %v4274_v51, 0.0 }
 0x584   : > { %v4397_v15 = vmax.f32 %v4277_v21, 0.0 }
 0x586   : > { %v4438_v30 = vpack.c.bf16 %v4397_v15, %v4396_v57 }
 0x587   : > { %v4281_v45 = vpop.f32.mrb[124].mxu1 }
 0x588   : > { %v4282_v17 = vadd.f32 %v7668_v25, %v4281_v45  ;;  %v4283_v54 = vpop.f32.mrb[125].mxu1  ;;  %5382 = vmatprep.mubr.msk.bf16.mxu0 %vm4487_vm1, %v4438_v30 }
 0x589   : > { %v4284_v4 = vpop.f32.mrb[126].mxu1 }
 0x58a   : > { %v4285_v20 = vadd.f32 %v7668_v25, %v4284_v4  ;;  %v4286_v44 = vpop.f32.mrb[127].mxu1  ;;  %v4398_v31 = vmax.f32 %v4282_v17, 0.0 }
 0x58c   : > { %v4399_v50 = vmax.f32 %v4285_v20, 0.0 }
 0x58e   : > { %v4439_v63 = vpack.c.bf16 %v4399_v50, %v4398_v31 }
 0x58f   : > { %v4289_v43 = vpop.f32.mrb[128].mxu1 }
 0x590   : > { %v4290_v39 = vadd.f32 %v7668_v25, %v4289_v43  ;;  %v4291_v42 = vpop.f32.mrb[129].mxu1  ;;  %5383 = vmatmul.mubr.msk.bf16.gmra.mrb[12].mxu0 %vm4487_vm1, %v4439_v63 }
 0x591   : > { %v4292_v28 = vpop.f32.mrb[130].mxu1 }
 0x592   : > { %v4293_v53 = vadd.f32 %v7668_v25, %v4292_v28  ;;  %v4294_v40 = vpop.f32.mrb[131].mxu1  ;;  %v4400_v24 = vmax.f32 %v4290_v39, 0.0 }
 0x594   : > { %v4401_v18 = vmax.f32 %v4293_v53, 0.0 }
 0x596   : > { %v4440_v9 = vpack.c.bf16 %v4401_v18, %v4400_v24 }
 0x597   : > { %v4297_v58 = vpop.f32.mrb[132].mxu1 }
 0x598   : > { %v4298_v26 = vadd.f32 %v7668_v25, %v4297_v58  ;;  %v4299_v0 = vpop.f32.mrb[133].mxu1  ;;  %5386 = vmatprep.mubr.msk.bf16.mxu0 %vm4487_vm1, %v4440_v9 }
 0x599   : > { %v4300_v61 = vpop.f32.mrb[134].mxu1 }
 0x59a   : > { %v4301_v13 = vadd.f32 %v7668_v25, %v4300_v61  ;;  %v4302_v60 = vpop.f32.mrb[135].mxu1  ;;  %v4402_v34 = vmax.f32 %v4298_v26, 0.0 }
 0x59c   : > { %v4403_v11 = vmax.f32 %v4301_v13, 0.0 }
 0x59e   : > { %v4441_v52 = vpack.c.bf16 %v4403_v11, %v4402_v34 }
 0x59f   : > { %v4305_v37 = vpop.f32.mrb[136].mxu1 }
 0x5a0   : > { %v4306_v16 = vadd.f32 %v7668_v25, %v4305_v37  ;;  %v4307_v62 = vpop.f32.mrb[137].mxu1  ;;  %5387 = vmatmul.mubr.msk.bf16.gmra.mrb[16].mxu0 %vm4487_vm1, %v4441_v52 }
 0x5a1   : > { %v4308_v12 = vpop.f32.mrb[138].mxu1 }
 0x5a2   : > { %v4309_v49 = vadd.f32 %v7668_v25, %v4308_v12  ;;  %v4310_v5 = vpop.f32.mrb[139].mxu1  ;;  %v4404_v56 = vmax.f32 %v4306_v16, 0.0 }
 0x5a4   : > { %v4405_v46 = vmax.f32 %v4309_v49, 0.0 }
 0x5a6   : > { %v4442_v55 = vpack.c.bf16 %v4405_v46, %v4404_v56 }
 0x5a7   : > { %v4313_v14 = vpop.f32.mrb[140].mxu1 }
 0x5a8   : > { %v4314_v23 = vadd.f32 %v7668_v25, %v4313_v14  ;;  %v4315_v59 = vpop.f32.mrb[141].mxu1  ;;  %5390 = vmatprep.mubr.msk.bf16.mxu0 %vm4487_vm1, %v4442_v55 }
 0x5a9   : > { %v4316_v10 = vpop.f32.mrb[142].mxu1 }
 0x5aa   : > { %v4317_v3 = vadd.f32 %v7668_v25, %v4316_v10  ;;  %v4318_v2 = vpop.f32.mrb[143].mxu1  ;;  %v4406_v6 = vmax.f32 %v4314_v23, 0.0 }
 0x5ac   : > { %v4407_v41 = vmax.f32 %v4317_v3, 0.0 }
 0x5ae   : > { %v4443_v32 = vpack.c.bf16 %v4407_v41, %v4406_v6 }
 0x5af   : > { %v4321_v38 = vpop.f32.mrb[144].mxu1 }
 0x5b0   : > { %v4322_v36 = vadd.f32 %v7668_v25, %v4321_v38  ;;  %v4323_v27 = vpop.f32.mrb[145].mxu1  ;;  %5391 = vmatmul.mubr.msk.bf16.gmra.mrb[20].mxu0 %vm4487_vm1, %v4443_v32 }
 0x5b1   : > { %v4324_v33 = vpop.f32.mrb[146].mxu1 }
 0x5b2   : > { %v4325_v29 = vadd.f32 %v7668_v25, %v4324_v33  ;;  %v4326_v47 = vpop.f32.mrb[147].mxu1  ;;  %v4408_v48 = vmax.f32 %v4322_v36, 0.0 }
 0x5b3   : > { %v5340_v7 = vpop.f32.mrb[224].mxu0 }
 0x5b4   : > { %v4409_v8 = vmax.f32 %v4325_v29, 0.0  ;;  %v4627_v51 = vadd.f32 %v5340_v7, %v7765_v22  ;;  %v4618_v19 = vpop.f32.mrb[225].mxu0 }
 0x5b5   : > { %v4619_v1 = vadd.f32 %v7765_v22, %v4618_v19  ;;  %v5341_v21 = vpop.f32.mrb[226].mxu0 }
 0x5b6   : > { %v4444_v35 = vpack.c.bf16 %v4409_v8, %v4408_v48  ;;  %4875 = vst [vmem:[%s7770_s25 + $0x10] sm:$0xff] %v4627_v51  ;;  %v4630_v57 = vadd.f32 %v5341_v21, %v7765_v22  ;;  %v4621_v15 = vpop.f32.mrb[227].mxu0 }
 0x5b7   : > { %4873 = vst [vmem:[%s7770_s25] sm:$0xff] %v4619_v1  ;;  %v4622_v30 = vadd.f32 %v7765_v22, %v4621_v15  ;;  %v4329_v45 = vpop.f32.mrb[148].mxu1 }
 0x5b8   : > { %4876 = vst [vmem:[%s7770_s25 + $0x18] sm:$0xff] %v4630_v57  ;;  %v4330_v17 = vadd.f32 %v7668_v25, %v4329_v45  ;;  %v4331_v54 = vpop.f32.mrb[149].mxu1  ;;  %5394 = vmatprep.mubr.msk.bf16.mxu0 %vm4487_vm1, %v4444_v35 }
 0x5b9   : > { %4874 = vst [vmem:[%s7770_s25 + $0x8] sm:$0xff] %v4622_v30  ;;  %v4332_v4 = vpop.f32.mrb[150].mxu1 }
 0x5ba   : > { %v4333_v20 = vadd.f32 %v7668_v25, %v4332_v4  ;;  %v4334_v44 = vpop.f32.mrb[151].mxu1  ;;  %v4410_v31 = vmax.f32 %v4330_v17, 0.0 }
 0x5bc   : > { %v4411_v50 = vmax.f32 %v4333_v20, 0.0 }
 0x5be   : > { %v4445_v63 = vpack.c.bf16 %v4411_v50, %v4410_v31 }
 0x5bf   : > { %v4337_v43 = vpop.f32.mrb[152].mxu1 }
 0x5c0   : > { %v4338_v39 = vadd.f32 %v7668_v25, %v4337_v43  ;;  %v4339_v42 = vpop.f32.mrb[153].mxu1  ;;  %5395 = vmatmul.mubr.msk.bf16.gmra.mrb[24].mxu0 %vm4487_vm1, %v4445_v63 }
 0x5c1   : > { %v4340_v28 = vpop.f32.mrb[154].mxu1 }
 0x5c2   : > { %v4341_v53 = vadd.f32 %v7668_v25, %v4340_v28  ;;  %v4342_v40 = vpop.f32.mrb[155].mxu1  ;;  %v4412_v18 = vmax.f32 %v4338_v39, 0.0 }
 0x5c3   : > { %v5344_v24 = vpop.f32.mrb[228].mxu0 }
 0x5c4   : > { %v4413_v9 = vmax.f32 %v4341_v53, 0.0  ;;  %v4643_v58 = vadd.f32 %v5344_v24, %v7765_v22  ;;  %v4634_v26 = vpop.f32.mrb[229].mxu0 }
 0x5c5   : > { %v4635_v0 = vadd.f32 %v7765_v22, %v4634_v26  ;;  %v5345_v61 = vpop.f32.mrb[230].mxu0 }
 0x5c6   : > { %v4446_v13 = vpack.c.bf16 %v4413_v9, %v4412_v18  ;;  %4879 = vst [vmem:[%s7770_s25 + $0x30] sm:$0xff] %v4643_v58  ;;  %v4646_v60 = vadd.f32 %v5345_v61, %v7765_v22  ;;  %v4637_v34 = vpop.f32.mrb[231].mxu0 }
 0x5c7   : > { %4877 = vst [vmem:[%s7770_s25 + $0x20] sm:$0xff] %v4635_v0  ;;  %v4638_v11 = vadd.f32 %v7765_v22, %v4637_v34  ;;  %v4345_v52 = vpop.f32.mrb[156].mxu1 }
 0x5c8   : > { %4880 = vst [vmem:[%s7770_s25 + $0x38] sm:$0xff] %v4646_v60  ;;  %v4346_v37 = vadd.f32 %v7668_v25, %v4345_v52  ;;  %v4347_v16 = vpop.f32.mrb[157].mxu1  ;;  %5398 = vmatprep.mubr.msk.bf16.mxu0 %vm4487_vm1, %v4446_v13 }
 0x5c9   : > { %4878 = vst [vmem:[%s7770_s25 + $0x28] sm:$0xff] %v4638_v11  ;;  %v4348_v62 = vpop.f32.mrb[158].mxu1 }
 0x5ca   : > { %v4349_v12 = vadd.f32 %v7668_v25, %v4348_v62  ;;  %v4350_v49 = vpop.f32.mrb[159].mxu1  ;;  %v4414_v5 = vmax.f32 %v4346_v37, 0.0 }
 0x5cc   : > { %v4415_v56 = vmax.f32 %v4349_v12, 0.0 }
 0x5ce   : > { %v4447_v46 = vpack.c.bf16 %v4415_v56, %v4414_v5 }
 0x5d0   : > { %5399 = vmatmul.mubr.msk.bf16.gmra.mrb[28].mxu0 %vm4487_vm1, %v4447_v46 }
 0x5d3   : > { %v5348_v55 = vpop.f32.mrb[232].mxu0 }
 0x5d4   : > { %v4659_v14 = vadd.f32 %v5348_v55, %v7765_v22  ;;  %v4650_v23 = vpop.f32.mrb[233].mxu0 }
 0x5d5   : > { %v4651_v59 = vadd.f32 %v7765_v22, %v4650_v23  ;;  %v5349_v10 = vpop.f32.mrb[234].mxu0 }
 0x5d6   : > { %4883 = vst [vmem:[%s7770_s25 + $0x50] sm:$0xff] %v4659_v14  ;;  %v4662_v25 = vadd.f32 %v5349_v10, %v7765_v22  ;;  %v4653_v3 = vpop.f32.mrb[235].mxu0 }
 0x5d7   : > { %4881 = vst [vmem:[%s7770_s25 + $0x40] sm:$0xff] %v4651_v59  ;;  %v4654_v2 = vadd.f32 %v7765_v22, %v4653_v3 }
 0x5d8   : > { %4884 = vst [vmem:[%s7770_s25 + $0x58] sm:$0xff] %v4662_v25 }
 0x5d9   : > { %4882 = vst [vmem:[%s7770_s25 + $0x48] sm:$0xff] %v4654_v2 }
 0x5e3   : > { %v5352_v6 = vpop.f32.mrb[236].mxu0 }
 0x5e4   : > { %v4675_v41 = vadd.f32 %v5352_v6, %v7765_v22  ;;  %v4666_v32 = vpop.f32.mrb[237].mxu0 }
 0x5e5   : > { %v4667_v38 = vadd.f32 %v7765_v22, %v4666_v32  ;;  %v5353_v36 = vpop.f32.mrb[238].mxu0 }
 0x5e6   : > { %4887 = vst [vmem:[%s7770_s25 + $0x70] sm:$0xff] %v4675_v41  ;;  %v4678_v27 = vadd.f32 %v5353_v36, %v7765_v22  ;;  %v4669_v33 = vpop.f32.mrb[239].mxu0 }
 0x5e7   : > { %4885 = vst [vmem:[%s7770_s25 + $0x60] sm:$0xff] %v4667_v38  ;;  %v4670_v29 = vadd.f32 %v7765_v22, %v4669_v33 }
 0x5e8   : > { %4888 = vst [vmem:[%s7770_s25 + $0x78] sm:$0xff] %v4678_v27 }
 0x5e9   : > { %4886 = vst [vmem:[%s7770_s25 + $0x68] sm:$0xff] %v4670_v29 }
 0x5f3   : > { %v5356_v47 = vpop.f32.mrb[240].mxu0 }
 0x5f4   : > { %v4691_v7 = vadd.f32 %v5356_v47, %v7765_v22  ;;  %v4682_v48 = vpop.f32.mrb[241].mxu0 }
 0x5f5   : > { %v4683_v8 = vadd.f32 %v7765_v22, %v4682_v48  ;;  %v5357_v51 = vpop.f32.mrb[242].mxu0 }
 0x5f6   : > { %4891 = vst [vmem:[%s7770_s25 + $0x90] sm:$0xff] %v4691_v7  ;;  %v4694_v19 = vadd.f32 %v5357_v51, %v7765_v22  ;;  %v4685_v1 = vpop.f32.mrb[243].mxu0 }
 0x5f7   : > { %4889 = vst [vmem:[%s7770_s25 + $0x80] sm:$0xff] %v4683_v8  ;;  %v4686_v21 = vadd.f32 %v7765_v22, %v4685_v1 }
 0x5f8   : > { %4892 = vst [vmem:[%s7770_s25 + $0x98] sm:$0xff] %v4694_v19 }
 0x5f9   : > { %4890 = vst [vmem:[%s7770_s25 + $0x88] sm:$0xff] %v4686_v21 }
 0x603   : > { %v5360_v35 = vpop.f32.mrb[244].mxu0 }
 0x604   : > { %v4707_v57 = vadd.f32 %v5360_v35, %v7765_v22  ;;  %v4698_v15 = vpop.f32.mrb[245].mxu0 }
 0x605   : > { %v4699_v30 = vadd.f32 %v7765_v22, %v4698_v15  ;;  %v5361_v45 = vpop.f32.mrb[246].mxu0 }
 0x606   : > { %4895 = vst [vmem:[%s7770_s25 + $0xb0] sm:$0xff] %v4707_v57  ;;  %v4710_v17 = vadd.f32 %v5361_v45, %v7765_v22  ;;  %v4701_v54 = vpop.f32.mrb[247].mxu0 }
 0x607   : > { %4893 = vst [vmem:[%s7770_s25 + $0xa0] sm:$0xff] %v4699_v30  ;;  %v4702_v4 = vadd.f32 %v7765_v22, %v4701_v54 }
 0x608   : > { %4896 = vst [vmem:[%s7770_s25 + $0xb8] sm:$0xff] %v4710_v17 }
 0x609   : > { %4894 = vst [vmem:[%s7770_s25 + $0xa8] sm:$0xff] %v4702_v4 }
 0x613   : > { %v5364_v20 = vpop.f32.mrb[248].mxu0 }
 0x614   : > { %v4723_v44 = vadd.f32 %v5364_v20, %v7765_v22  ;;  %v4714_v31 = vpop.f32.mrb[249].mxu0 }
 0x615   : > { %v4715_v50 = vadd.f32 %v7765_v22, %v4714_v31  ;;  %v5365_v63 = vpop.f32.mrb[250].mxu0 }
 0x616   : > { %4899 = vst [vmem:[%s7770_s25 + $0xd0] sm:$0xff] %v4723_v44  ;;  %v4726_v43 = vadd.f32 %v5365_v63, %v7765_v22  ;;  %v4717_v39 = vpop.f32.mrb[251].mxu0 }
 0x617   : > { %4897 = vst [vmem:[%s7770_s25 + $0xc0] sm:$0xff] %v4715_v50  ;;  %v4718_v42 = vadd.f32 %v7765_v22, %v4717_v39 }
 0x618   : > { %4900 = vst [vmem:[%s7770_s25 + $0xd8] sm:$0xff] %v4726_v43 }
 0x619   : > { %4898 = vst [vmem:[%s7770_s25 + $0xc8] sm:$0xff] %v4718_v42 }
 0x623   : > { %v5368_v28 = vpop.f32.mrb[252].mxu0 }
 0x624   : > { %v4739_v53 = vadd.f32 %v5368_v28, %v7765_v22  ;;  %v4730_v40 = vpop.f32.mrb[253].mxu0 }
 0x625   : > { %v4731_v24 = vadd.f32 %v7765_v22, %v4730_v40  ;;  %v5369_v18 = vpop.f32.mrb[254].mxu0 }
 0x626   : > { %4903 = vst [vmem:[%s7770_s25 + $0xf0] sm:$0xff] %v4739_v53  ;;  %v4742_v9 = vadd.f32 %v5369_v18, %v7765_v22  ;;  %v4733_v58 = vpop.f32.mrb[255].mxu0 }
 0x627   : > { %4901 = vst [vmem:[%s7770_s25 + $0xe0] sm:$0xff] %v4731_v24  ;;  %v4734_v26 = vadd.f32 %v7765_v22, %v4733_v58 }
 0x628   : > { %4904 = vst [vmem:[%s7770_s25 + $0xf8] sm:$0xff] %v4742_v9 }
 0x629   : > { %4902 = vst [vmem:[%s7770_s25 + $0xe8] sm:$0xff] %v4734_v26 }
 0x633   : > { %v5372_v0 = vpop.f32.mrb[0].mxu0 }
 0x634   : > { %v4755_v61 = vadd.f32 %v5372_v0, %v7765_v22  ;;  %v4746_v13 = vpop.f32.mrb[1].mxu0 }
 0x635   : > { %v4747_v60 = vadd.f32 %v7765_v22, %v4746_v13  ;;  %v5373_v34 = vpop.f32.mrb[2].mxu0 }
 0x636   : > { %4907 = vst [vmem:[%s7770_s25 + $0x110] sm:$0xff] %v4755_v61  ;;  %v4758_v11 = vadd.f32 %v5373_v34, %v7765_v22  ;;  %v4749_v52 = vpop.f32.mrb[3].mxu0 }
 0x637   : > { %4905 = vst [vmem:[%s7770_s25 + $0x100] sm:$0xff] %v4747_v60  ;;  %v4750_v37 = vadd.f32 %v7765_v22, %v4749_v52 }
 0x638   : > { %4908 = vst [vmem:[%s7770_s25 + $0x118] sm:$0xff] %v4758_v11 }
 0x639   : > { %4906 = vst [vmem:[%s7770_s25 + $0x108] sm:$0xff] %v4750_v37 }
 0x643   : > { %v5376_v16 = vpop.f32.mrb[4].mxu0 }
 0x644   : > { %v4771_v62 = vadd.f32 %v5376_v16, %v7765_v22  ;;  %v4762_v12 = vpop.f32.mrb[5].mxu0 }
 0x645   : > { %v4763_v49 = vadd.f32 %v7765_v22, %v4762_v12  ;;  %v5377_v5 = vpop.f32.mrb[6].mxu0 }
 0x646   : > { %4911 = vst [vmem:[%s7770_s25 + $0x130] sm:$0xff] %v4771_v62  ;;  %v4774_v56 = vadd.f32 %v5377_v5, %v7765_v22  ;;  %v4765_v46 = vpop.f32.mrb[7].mxu0 }
 0x647   : > { %4909 = vst [vmem:[%s7770_s25 + $0x120] sm:$0xff] %v4763_v49  ;;  %v4766_v55 = vadd.f32 %v7765_v22, %v4765_v46 }
 0x648   : > { %4912 = vst [vmem:[%s7770_s25 + $0x138] sm:$0xff] %v4774_v56 }
 0x649   : > { %4910 = vst [vmem:[%s7770_s25 + $0x128] sm:$0xff] %v4766_v55 }
 0x653   : > { %v5380_v14 = vpop.f32.mrb[8].mxu0 }
 0x654   : > { %v4787_v23 = vadd.f32 %v5380_v14, %v7765_v22  ;;  %v4778_v59 = vpop.f32.mrb[9].mxu0 }
 0x655   : > { %v4779_v10 = vadd.f32 %v7765_v22, %v4778_v59  ;;  %v5381_v25 = vpop.f32.mrb[10].mxu0 }
 0x656   : > { %4915 = vst [vmem:[%s7770_s25 + $0x150] sm:$0xff] %v4787_v23  ;;  %v4790_v3 = vadd.f32 %v5381_v25, %v7765_v22  ;;  %v4781_v2 = vpop.f32.mrb[11].mxu0 }
 0x657   : > { %4913 = vst [vmem:[%s7770_s25 + $0x140] sm:$0xff] %v4779_v10  ;;  %v4782_v6 = vadd.f32 %v7765_v22, %v4781_v2 }
 0x658   : > { %4916 = vst [vmem:[%s7770_s25 + $0x158] sm:$0xff] %v4790_v3 }
 0x659   : > { %4914 = vst [vmem:[%s7770_s25 + $0x148] sm:$0xff] %v4782_v6 }
 0x663   : > { %v5384_v41 = vpop.f32.mrb[12].mxu0 }
 0x664   : > { %v4803_v32 = vadd.f32 %v5384_v41, %v7765_v22  ;;  %v4794_v38 = vpop.f32.mrb[13].mxu0 }
 0x665   : > { %v4795_v36 = vadd.f32 %v7765_v22, %v4794_v38  ;;  %v5385_v27 = vpop.f32.mrb[14].mxu0 }
 0x666   : > { %4919 = vst [vmem:[%s7770_s25 + $0x170] sm:$0xff] %v4803_v32  ;;  %v4806_v33 = vadd.f32 %v5385_v27, %v7765_v22  ;;  %v4797_v29 = vpop.f32.mrb[15].mxu0 }
 0x667   : > { %4917 = vst [vmem:[%s7770_s25 + $0x160] sm:$0xff] %v4795_v36  ;;  %v4798_v47 = vadd.f32 %v7765_v22, %v4797_v29 }
 0x668   : > { %4920 = vst [vmem:[%s7770_s25 + $0x178] sm:$0xff] %v4806_v33 }
 0x669   : > { %4918 = vst [vmem:[%s7770_s25 + $0x168] sm:$0xff] %v4798_v47 }
 0x673   : > { %v5388_v7 = vpop.f32.mrb[16].mxu0 }
 0x674   : > { %v4819_v48 = vadd.f32 %v5388_v7, %v7765_v22  ;;  %v4810_v8 = vpop.f32.mrb[17].mxu0 }
 0x675   : > { %v4811_v51 = vadd.f32 %v7765_v22, %v4810_v8  ;;  %v5389_v19 = vpop.f32.mrb[18].mxu0 }
 0x676   : > { %4923 = vst [vmem:[%s7770_s25 + $0x190] sm:$0xff] %v4819_v48  ;;  %v4822_v1 = vadd.f32 %v5389_v19, %v7765_v22  ;;  %v4813_v21 = vpop.f32.mrb[19].mxu0 }
 0x677   : > { %4921 = vst [vmem:[%s7770_s25 + $0x180] sm:$0xff] %v4811_v51  ;;  %v4814_v35 = vadd.f32 %v7765_v22, %v4813_v21 }
 0x678   : > { %4924 = vst [vmem:[%s7770_s25 + $0x198] sm:$0xff] %v4822_v1 }
 0x679   : > { %4922 = vst [vmem:[%s7770_s25 + $0x188] sm:$0xff] %v4814_v35 }
 0x683   : > { %v5392_v57 = vpop.f32.mrb[20].mxu0 }
 0x684   : > { %v4835_v15 = vadd.f32 %v5392_v57, %v7765_v22  ;;  %v4826_v30 = vpop.f32.mrb[21].mxu0 }
 0x685   : > { %v4827_v45 = vadd.f32 %v7765_v22, %v4826_v30  ;;  %v5393_v17 = vpop.f32.mrb[22].mxu0 }
 0x686   : > { %4927 = vst [vmem:[%s7770_s25 + $0x1b0] sm:$0xff] %v4835_v15  ;;  %v4838_v54 = vadd.f32 %v5393_v17, %v7765_v22  ;;  %v4829_v4 = vpop.f32.mrb[23].mxu0 }
 0x687   : > { %4925 = vst [vmem:[%s7770_s25 + $0x1a0] sm:$0xff] %v4827_v45  ;;  %v4830_v20 = vadd.f32 %v7765_v22, %v4829_v4 }
 0x688   : > { %4928 = vst [vmem:[%s7770_s25 + $0x1b8] sm:$0xff] %v4838_v54 }
 0x689   : > { %4926 = vst [vmem:[%s7770_s25 + $0x1a8] sm:$0xff] %v4830_v20 }
 0x693   : > { %v5396_v44 = vpop.f32.mrb[24].mxu0 }
 0x694   : > { %v4851_v31 = vadd.f32 %v5396_v44, %v7765_v22  ;;  %v4842_v50 = vpop.f32.mrb[25].mxu0 }
 0x695   : > { %v4843_v63 = vadd.f32 %v7765_v22, %v4842_v50  ;;  %v5397_v43 = vpop.f32.mrb[26].mxu0 }
 0x696   : > { %4931 = vst [vmem:[%s7770_s25 + $0x1d0] sm:$0xff] %v4851_v31  ;;  %v4854_v39 = vadd.f32 %v5397_v43, %v7765_v22  ;;  %v4845_v42 = vpop.f32.mrb[27].mxu0 }
 0x697   : > { %4929 = vst [vmem:[%s7770_s25 + $0x1c0] sm:$0xff] %v4843_v63  ;;  %v4846_v28 = vadd.f32 %v7765_v22, %v4845_v42 }
 0x698   : > { %4932 = vst [vmem:[%s7770_s25 + $0x1d8] sm:$0xff] %v4854_v39 }
 0x699   : > { %4930 = vst [vmem:[%s7770_s25 + $0x1c8] sm:$0xff] %v4846_v28 }
 0x6a3   : > { %v5400_v53 = vpop.f32.mrb[28].mxu0 }
 0x6a4   : > { %v4867_v40 = vadd.f32 %v5400_v53, %v7765_v22  ;;  %v4858_v24 = vpop.f32.mrb[29].mxu0 }
 0x6a5   : > { %v4859_v18 = vadd.f32 %v7765_v22, %v4858_v24  ;;  %v5401_v9 = vpop.f32.mrb[30].mxu0 }
 0x6a6   : > { %4935 = vst [vmem:[%s7770_s25 + $0x1f0] sm:$0xff] %v4867_v40  ;;  %v4870_v58 = vadd.f32 %v5401_v9, %v7765_v22  ;;  %v4861_v26 = vpop.f32.mrb[31].mxu0 }
 0x6a7   : > { %4933 = vst [vmem:[%s7770_s25 + $0x1e0] sm:$0xff] %v4859_v18  ;;  %v4862_v0 = vadd.f32 %v7765_v22, %v4861_v26 }
 0x6a8   : > { %4936 = vst [vmem:[%s7770_s25 + $0x1f8] sm:$0xff] %v4870_v58 }
 0x6a9   : > { %4934 = vst [vmem:[%s7770_s25 + $0x1e8] sm:$0xff] %v4862_v0 }
 0x6aa   : > { %5974 = shalt.err (!%p5971_p7)
}
 0x6ab   : > { %s5975_s12 = scalar_lea.hbm %s7909_s15, 8192  ;;  %s5979_s22 = scalar_lea.hbm %s7971_s11, 16384 }
 0x6ac   : > { %p5976_p8 = scmp.ne.s32.totalorder %s7909_s15, %s5975_s12  ;;  %p5980_p1 = scmp.lt.u32.totalorder %s7909_s15, %s7971_s11 }
 0x6ad   : > { %p5981_p0 = scmp.lt.u32.totalorder %s5979_s22, %s5975_s12  ;;  %p5983_p6 = scmp.lt.u32.totalorder %s5975_s12, %s7909_s15 }
 0x6ae   : > { %p5977_p11 = pnand %p5976_p8, %p7983_p9 }
 0x6af   : > { %p5982_p5 = por %p5981_p0, %p5980_p1 }
 0x6b0   : > { %p5978_p13 = pneg %p5977_p11 }
 0x6b1   : > { %p5984_p10 = por %p5983_p6, %p5982_p5 }
 0x6b3   : > { %p5985_p12 = pnand %p5984_p10, %p5978_p13 }
 0x6b5   : > { %5988 = shalt.err (!%p5985_p12)
}
 0x6b6   : > { %s6034_s26 = smov 128   ;;  %s6035_s16 = smov 8  }
 0x6b7   : > { %5666 = dma.vmem_to_hbm [thread:$0]  (%p7983_p9), %s7911_s14, 8192, %s7909_s15, %s7919_s21, %s6034_s26, %s6034_s26, %s6035_s16  }
 0x6b8 PF: > { %p5678_p2 = scmp.ge.s32.totalorder %s6027_s20, 2  ;;  %s4966_s29 = sand.u32 1, %s6015_s17  }
 0x6b9   : > { %p7984_p3 = scmp.ne.s32.totalorder %s7977_s28, 0  ;;  %s4967_s12 = scalar_lea.sflag [#allocation4], %s4966_s29 }
 0x6bb   : > { %p5673_p4 = pnand %p5678_p2, %p7984_p3 }
 0x6bd   : > { %6010 = dma.done.wait (!%p5673_p4), %s4967_s12, 8192  }
 0x6be   : > { %6012 = vsyncadd (!%p5673_p4), %s4967_s12, 4294959104  ;;  %s7985_s25 = sld [smem:[#allocation8_spill]]  ;;  %p22_p7 = scmp.ge.s32.totalorder %s6121_s23, 4  }
 0x6bf   : > { %s7986_s17 = smov %s6019_s18  ;;  %s7987_s18 = smov %s6023_s19 }
 0x6c0   : > { %s7989_s20 = smov %s6121_s23  ;;  %24 = sbr.rel (!%p22_p7) target bundleno = 4 (0x4), region = 104 }
 0x6c4   : > { %s7988_s19 = smov %s7985_s25 }
 0x6c7   :  { %4972 = vsyncpa [#allocation3], 1 }
 0x6c8   :  { %4974 = vsyncpa [#allocation3 + $0x1], 1 }
 0x6c9   :  { %4975 = vsyncpa [#allocation4], 1 }
 0x6ca   :  { %4977 = vsyncpa [#allocation4 + $0x1], 1 }

</bundles_post_ra>
